<compile_context>
chip_gen: v7x
topology: tpu7x:2x2x1
jax: 0.10.0
libtpu: 0.0.40
codegen_flags: <defaults>
</compile_context>

<pallas_src>
import functools

import jax
import jax.numpy as jnp
from jax.experimental import pallas as pl
from jax.experimental.pallas import tpu as pltpu

INPUT_SIZE = 1024
HIDDEN_SIZE = 512
SEQ_LEN = 5
LANE = 128
SUBLANE = 8
TK = 256  # K-chunk for streaming the input projection


def rnn_kernel(x_ref, wih_ref, whh_ref, b_ref, wfc_ref, bfc_ref, o_ref, xw_ref, *, bp):
    """K-streamed input projection + full RNN unroll + final Linear.

    Grid axis 0 runs over INPUT_SIZE // TK reduction chunks.

    x_ref   : (T*Bp, TK)    f32   time-major, batch padded to Bp (multiple of 8)
    wih_ref : (TK, H)       f32   (K-chunk of W_ih^T)
    whh_ref : (H, H)        f32   (= W_hh^T, loop-invariant)
    b_ref   : (1, H)        f32   (= b_ih + b_hh)
    wfc_ref : (H, Cp)       f32   (= W_fc^T, N padded to a lane multiple)
    bfc_ref : (1, Cp)       f32
    o_ref   : (Bp, Cp)      f32   resident across the grid (constant index_map)
    xw_ref  : (T*Bp, H)     f32   VMEM scratch accumulator for x @ W_ih^T
    """
    k = pl.program_id(0)

    @pl.when(k == 0)
    def _():
        xw_ref[...] = jnp.zeros_like(xw_ref)

    # Streamed partial input projection: accumulate this K-chunk on the MXU
    # while the next chunk's DMA is in flight.
    xw_ref[...] += jnp.dot(x_ref[...], wih_ref[...],
                           preferred_element_type=jnp.float32)

    @pl.when(k == pl.num_programs(0) - 1)
    def _():
        xw = xw_ref[...] + b_ref[...]                   # (T*Bp, H), bias folded once
        whh = whh_ref[...]                              # loop-invariant load

        # Hidden state carried in vregs across the short static unroll.
        h = jnp.zeros((bp, HIDDEN_SIZE), jnp.float32)
        for t in range(SEQ_LEN):
            # Tile-aligned static slice: rows t*Bp : (t+1)*Bp, Bp a multiple of 8.
            pre = xw[t * bp:(t + 1) * bp, :] + jnp.dot(
                h, whh, preferred_element_type=jnp.float32)
            h = jnp.tanh(pre)

        out = jnp.dot(h, wfc_ref[...],
                      preferred_element_type=jnp.float32) + bfc_ref[...]
        o_ref[...] = out.astype(o_ref.dtype)


def prepare_params(w_ih, w_hh, b_ih, b_hh, w_fc, b_fc, num_classes):
    """One-time weight packing (hoisted out of the per-call forward).

    Returns (wih_t, whh_t, b, wfc_t, bfc) ready for rnn_forward.
    """
    Cp = max(LANE, ((num_classes + LANE - 1) // LANE) * LANE)

    wih_t = jnp.asarray(w_ih, jnp.float32).T                        # (D_in, H)
    whh_t = jnp.asarray(w_hh, jnp.float32).T                        # (H, H)
    b = (jnp.asarray(b_ih, jnp.float32) +
         jnp.asarray(b_hh, jnp.float32)).reshape(1, HIDDEN_SIZE)    # (1, H)

    # Pad the fc output dim to a lane multiple -> lane-dense (unmasked) stores.
    wfc_t = jnp.zeros((HIDDEN_SIZE, Cp), jnp.float32).at[:, :num_classes].set(
        jnp.asarray(w_fc, jnp.float32).T)
    bfc = jnp.zeros((1, Cp), jnp.float32).at[:, :num_classes].set(
        jnp.asarray(b_fc, jnp.float32).reshape(1, -1))

    packed = (wih_t, whh_t, b, wfc_t, bfc)
    return jax.tree_util.tree_map(jax.block_until_ready, packed)


@functools.partial(jax.jit, static_argnames=("num_classes",))
def rnn_forward(x_flat, wih_t, whh_t, b, wfc_t, bfc, *, num_classes):
    """x_flat: (B, 5*1024). Weights pre-packed by prepare_params().

    Returns (B, num_classes) — equivalent to the torch `out`.
    """
    B = x_flat.shape[0]
    Bp = max(SUBLANE, ((B + SUBLANE - 1) // SUBLANE) * SUBLANE)
    Cp = wfc_t.shape[1]

    # Time-major, batch padded to a sublane multiple, flattened to (T*Bp, D_in).
    x = x_flat.reshape(B, SEQ_LEN, INPUT_SIZE).astype(jnp.float32)
    x_tm = jnp.transpose(x, (1, 0, 2))                          # (T, B, D)
    x_tm = jnp.pad(x_tm, ((0, 0), (0, Bp - B), (0, 0)))
    x2d = x_tm.reshape(SEQ_LEN * Bp, INPUT_SIZE)

    kernel = functools.partial(rnn_kernel, bp=Bp)
    num_k = INPUT_SIZE // TK

    out_padded = pl.pallas_call(
        kernel,
        out_shape=jax.ShapeDtypeStruct((Bp, Cp), jnp.float32),
        grid_spec=pltpu.PrefetchScalarGridSpec(
            num_scalar_prefetch=0,
            grid=(num_k,),
            in_specs=[
                # Streamed over K:
                pl.BlockSpec((SEQ_LEN * Bp, TK), lambda k: (0, k)),
                pl.BlockSpec((TK, HIDDEN_SIZE), lambda k: (k, 0)),
                # Loop-invariant (constant block index -> fetched once):
                pl.BlockSpec((HIDDEN_SIZE, HIDDEN_SIZE), lambda k: (0, 0)),
                pl.BlockSpec((1, HIDDEN_SIZE), lambda k: (0, 0)),
                pl.BlockSpec((HIDDEN_SIZE, Cp), lambda k: (0, 0)),
                pl.BlockSpec((1, Cp), lambda k: (0, 0)),
            ],
            out_specs=pl.BlockSpec((Bp, Cp), lambda k: (0, 0)),
            scratch_shapes=[
                pltpu.VMEM((SEQ_LEN * Bp, HIDDEN_SIZE), jnp.float32),
            ],
        ),
        compiler_params=pltpu.CompilerParams(
            dimension_semantics=("arbitrary",),   # K is a reduction axis
            vmem_limit_bytes=32 << 20,            # ~4 MiB resident; v7x headroom
        ),
    )(x2d, wih_t, whh_t, b, wfc_t, bfc)

    return out_padded[:B, :num_classes]


def init_params(key, num_classes):
    """Deterministic parameter init matching PyTorch nn.RNN / nn.Linear shapes."""
    k1, k2, k3, k4, k5, k6 = jax.random.split(key, 6)
    bound = 1.0 / jnp.sqrt(HIDDEN_SIZE)
    w_ih = jax.random.uniform(k1, (HIDDEN_SIZE, INPUT_SIZE), jnp.float32, -bound, bound)
    w_hh = jax.random.uniform(k2, (HIDDEN_SIZE, HIDDEN_SIZE), jnp.float32, -bound, bound)
    b_ih = jax.random.uniform(k3, (HIDDEN_SIZE,), jnp.float32, -bound, bound)
    b_hh = jax.random.uniform(k4, (HIDDEN_SIZE,), jnp.float32, -bound, bound)
    w_fc = jax.random.uniform(k5, (num_classes, HIDDEN_SIZE), jnp.float32, -bound, bound)
    b_fc = jax.random.uniform(k6, (num_classes,), jnp.float32, -bound, bound)
    return w_ih, w_hh, b_ih, b_hh, w_fc, b_fc


def reference_forward(x_flat, w_ih, w_hh, b_ih, b_hh, w_fc, b_fc):
    """Pure-JAX reference mirroring torch semantics (correctness check)."""
    B = x_flat.shape[0]
    x = x_flat.reshape(B, SEQ_LEN, INPUT_SIZE)
    h = jnp.zeros((B, HIDDEN_SIZE), jnp.float32)
    for t in range(SEQ_LEN):
        h = jnp.tanh(x[:, t, :] @ w_ih.T + b_ih + h @ w_hh.T + b_hh)
    return h @ w_fc.T + b_fc


if __name__ == "__main__":
    NUM_CLASSES = 16
    BATCH = 2

    key = jax.random.PRNGKey(0)
    kx, kp = jax.random.split(key)
    x_flat = jax.random.normal(kx, (BATCH, SEQ_LEN * INPUT_SIZE), jnp.float32)
    raw_params = init_params(kp, NUM_CLASSES)

    # One-time weight packing (not part of the per-call latency path).
    packed = prepare_params(*raw_params, num_classes=NUM_CLASSES)

    out = rnn_forward(x_flat, *packed, num_classes=NUM_CLASSES)
    out = jax.block_until_ready(out)

    ref = reference_forward(x_flat, *raw_params)
    assert out.shape == (BATCH, NUM_CLASSES)
    assert jnp.allclose(out, ref, atol=1e-4, rtol=1e-4), float(jnp.max(jnp.abs(out - ref)))

    print("KERNEL_OK")
</pallas_src>

<mosaic_0001>
module attributes {stable_mosaic.version = 11 : i64} {
  func.func @rnn_kernel(%arg0: i32, %arg1: memref<40x256xf32, #tpu.memory_space<vmem>>, %arg2: memref<256x512xf32, #tpu.memory_space<vmem>>, %arg3: memref<512x512xf32, #tpu.memory_space<vmem>>, %arg4: memref<1x512xf32, #tpu.memory_space<vmem>>, %arg5: memref<512x128xf32, #tpu.memory_space<vmem>>, %arg6: memref<1x128xf32, #tpu.memory_space<vmem>>, %arg7: memref<8x128xf32, #tpu.memory_space<vmem>>, %arg8: memref<40x512xf32, #tpu.memory_space<vmem>>) attributes {dimension_semantics = [#tpu.dimension_semantics<arbitrary>], iteration_bounds = array<i64: 4>, scalar_prefetch = 0 : i64, scratch_operands = 1 : i64, tpu.core_type = #tpu.core_type<tc>, window_params = [{transform_indices = @transform_0, window_bounds = array<i64: 40, 256>}, {transform_indices = @transform_1, window_bounds = array<i64: 256, 512>}, {pipeline_mode = #tpu.pipeline_mode<synchronous>, transform_indices = @transform_2, window_bounds = array<i64: 512, 512>}, {pipeline_mode = #tpu.pipeline_mode<synchronous>, transform_indices = @transform_3, window_bounds = array<i64: 1, 512>}, {pipeline_mode = #tpu.pipeline_mode<synchronous>, transform_indices = @transform_4, window_bounds = array<i64: 512, 128>}, {pipeline_mode = #tpu.pipeline_mode<synchronous>, transform_indices = @transform_5, window_bounds = array<i64: 1, 128>}, {pipeline_mode = #tpu.pipeline_mode<synchronous>, transform_indices = @transform_6, window_bounds = array<i64: 8, 128>}]} {
    %c0_i32 = arith.constant 0 : i32
    %0 = arith.cmpi eq, %arg0, %c0_i32 : i32
    %1 = arith.extui %0 : i1 to i32
    %c0_i32_0 = arith.constant 0 : i32
    %2 = arith.cmpi ne, %1, %c0_i32_0 : i32
    scf.if %2 {
      %cst_9 = arith.constant 0.000000e+00 : f32
      %12 = vector.broadcast %cst_9 : f32 to vector<40x512xf32>
      %c0_10 = arith.constant 0 : index
      %c0_11 = arith.constant 0 : index
      %13 = vector.load %arg8[%c0_10, %c0_11] : memref<40x512xf32, #tpu.memory_space<vmem>>, vector<40x512xf32>
      tpu.vector_store %arg8[%c0_10, %c0_11], %12 {strides = array<i32>} : memref<40x512xf32, #tpu.memory_space<vmem>>, vector<40x512xf32>,
    } else {
    }
    %c0 = arith.constant 0 : index
    %c0_1 = arith.constant 0 : index
    %3 = vector.load %arg8[%c0, %c0_1] : memref<40x512xf32, #tpu.memory_space<vmem>>, vector<40x512xf32>
    %c0_2 = arith.constant 0 : index
    %c0_3 = arith.constant 0 : index
    %4 = vector.load %arg1[%c0_2, %c0_3] : memref<40x256xf32, #tpu.memory_space<vmem>>, vector<40x256xf32>
    %c0_4 = arith.constant 0 : index
    %c0_5 = arith.constant 0 : index
    %5 = vector.load %arg2[%c0_4, %c0_5] : memref<256x512xf32, #tpu.memory_space<vmem>>, vector<256x512xf32>
    %cst = arith.constant dense<0.000000e+00> : vector<40x512xf32>
    %6 = tpu.matmul %4, %5, %cst {dimension_numbers = #tpu.dot_dimension_numbers<[1], [0], [0], [1], [0, 0, 1, 1], [], []>} : vector<40x256xf32>, vector<256x512xf32>, vector<40x512xf32> -> vector<40x512xf32>
    %7 = arith.addf %3, %6 : vector<40x512xf32>
    %c0_6 = arith.constant 0 : index
    %c0_7 = arith.constant 0 : index
    %8 = vector.load %arg8[%c0_6, %c0_7] : memref<40x512xf32, #tpu.memory_space<vmem>>, vector<40x512xf32>
    tpu.vector_store %arg8[%c0_6, %c0_7], %7 {strides = array<i32>} : memref<40x512xf32, #tpu.memory_space<vmem>>, vector<40x512xf32>,
    %c3_i32 = arith.constant 3 : i32
    %9 = arith.cmpi eq, %arg0, %c3_i32 : i32
    %10 = arith.extui %9 : i1 to i32
    %c0_i32_8 = arith.constant 0 : i32
    %11 = arith.cmpi ne, %10, %c0_i32_8 : i32
    scf.if %11 {
      %c0_9 = arith.constant 0 : index
      %c0_10 = arith.constant 0 : index
      %12 = vector.load %arg8[%c0_9, %c0_10] : memref<40x512xf32, #tpu.memory_space<vmem>>, vector<40x512xf32>
      %c0_11 = arith.constant 0 : index
      %c0_12 = arith.constant 0 : index
      %13 = vector.load %arg4[%c0_11, %c0_12] : memref<1x512xf32, #tpu.memory_space<vmem>>, vector<1x512xf32>
      %14 = vector.broadcast %13 : vector<1x512xf32> to vector<40x512xf32>
      %15 = arith.addf %12, %14 : vector<40x512xf32>
      %c0_13 = arith.constant 0 : index
      %c0_14 = arith.constant 0 : index
      %16 = vector.load %arg3[%c0_13, %c0_14] : memref<512x512xf32, #tpu.memory_space<vmem>>, vector<512x512xf32>
      %cst_15 = arith.constant 0.000000e+00 : f32
      %17 = vector.broadcast %cst_15 : f32 to vector<8x512xf32>
      %18 = vector.extract_strided_slice %15 {offsets = [0, 0], sizes = [8, 512], strides = [1, 1]} : vector<40x512xf32> to vector<8x512xf32>
      %cst_16 = arith.constant dense<0.000000e+00> : vector<8x512xf32>
      %19 = tpu.matmul %17, %16, %cst_16 {dimension_numbers = #tpu.dot_dimension_numbers<[1], [0], [0], [1], [0, 0, 1, 1], [], []>} : vector<8x512xf32>, vector<512x512xf32>, vector<8x512xf32> -> vector<8x512xf32>
      %20 = arith.addf %18, %19 : vector<8x512xf32>
      %21 = math.tanh %20 : vector<8x512xf32>
      %22 = vector.extract_strided_slice %15 {offsets = [8, 0], sizes = [8, 512], strides = [1, 1]} : vector<40x512xf32> to vector<8x512xf32>
      %cst_17 = arith.constant dense<0.000000e+00> : vector<8x512xf32>
      %23 = tpu.matmul %21, %16, %cst_17 {dimension_numbers = #tpu.dot_dimension_numbers<[1], [0], [0], [1], [0, 0, 1, 1], [], []>} : vector<8x512xf32>, vector<512x512xf32>, vector<8x512xf32> -> vector<8x512xf32>
      %24 = arith.addf %22, %23 : vector<8x512xf32>
      %25 = math.tanh %24 : vector<8x512xf32>
      %26 = vector.extract_strided_slice %15 {offsets = [16, 0], sizes = [8, 512], strides = [1, 1]} : vector<40x512xf32> to vector<8x512xf32>
      %cst_18 = arith.constant dense<0.000000e+00> : vector<8x512xf32>
      %27 = tpu.matmul %25, %16, %cst_18 {dimension_numbers = #tpu.dot_dimension_numbers<[1], [0], [0], [1], [0, 0, 1, 1], [], []>} : vector<8x512xf32>, vector<512x512xf32>, vector<8x512xf32> -> vector<8x512xf32>
      %28 = arith.addf %26, %27 : vector<8x512xf32>
      %29 = math.tanh %28 : vector<8x512xf32>
      %30 = vector.extract_strided_slice %15 {offsets = [24, 0], sizes = [8, 512], strides = [1, 1]} : vector<40x512xf32> to vector<8x512xf32>
      %cst_19 = arith.constant dense<0.000000e+00> : vector<8x512xf32>
      %31 = tpu.matmul %29, %16, %cst_19 {dimension_numbers = #tpu.dot_dimension_numbers<[1], [0], [0], [1], [0, 0, 1, 1], [], []>} : vector<8x512xf32>, vector<512x512xf32>, vector<8x512xf32> -> vector<8x512xf32>
      %32 = arith.addf %30, %31 : vector<8x512xf32>
      %33 = math.tanh %32 : vector<8x512xf32>
      %34 = vector.extract_strided_slice %15 {offsets = [32, 0], sizes = [8, 512], strides = [1, 1]} : vector<40x512xf32> to vector<8x512xf32>
      %cst_20 = arith.constant dense<0.000000e+00> : vector<8x512xf32>
      %35 = tpu.matmul %33, %16, %cst_20 {dimension_numbers = #tpu.dot_dimension_numbers<[1], [0], [0], [1], [0, 0, 1, 1], [], []>} : vector<8x512xf32>, vector<512x512xf32>, vector<8x512xf32> -> vector<8x512xf32>
      %36 = arith.addf %34, %35 : vector<8x512xf32>
      %37 = math.tanh %36 : vector<8x512xf32>
      %c0_21 = arith.constant 0 : index
      %c0_22 = arith.constant 0 : index
      %38 = vector.load %arg5[%c0_21, %c0_22] : memref<512x128xf32, #tpu.memory_space<vmem>>, vector<512x128xf32>
      %cst_23 = arith.constant dense<0.000000e+00> : vector<8x128xf32>
      %39 = tpu.matmul %37, %38, %cst_23 {dimension_numbers = #tpu.dot_dimension_numbers<[1], [0], [0], [1], [0, 0, 1, 1], [], []>} : vector<8x512xf32>, vector<512x128xf32>, vector<8x128xf32> -> vector<8x128xf32>
      %c0_24 = arith.constant 0 : index
      %c0_25 = arith.constant 0 : index
      %40 = vector.load %arg6[%c0_24, %c0_25] : memref<1x128xf32, #tpu.memory_space<vmem>>, vector<1x128xf32>
      %41 = vector.broadcast %40 : vector<1x128xf32> to vector<8x128xf32>
      %42 = arith.addf %39, %41 : vector<8x128xf32>
      %c0_26 = arith.constant 0 : index
      %c0_27 = arith.constant 0 : index
      %43 = vector.load %arg7[%c0_26, %c0_27] : memref<8x128xf32, #tpu.memory_space<vmem>>, vector<8x128xf32>
      tpu.vector_store %arg7[%c0_26, %c0_27], %42 {strides = array<i32>} : memref<8x128xf32, #tpu.memory_space<vmem>>, vector<8x128xf32>,
    } else {
    }
    return
  }
  func.func @transform_0(%arg0: i32) -> (i32, i32) {
    %c0_i32 = arith.constant 0 : i32
    %c0_i32_0 = arith.constant 0 : i32
    return %c0_i32, %arg0 : i32, i32
  }
  func.func @transform_1(%arg0: i32) -> (i32, i32) {
    %c0_i32 = arith.constant 0 : i32
    %c0_i32_0 = arith.constant 0 : i32
    return %arg0, %c0_i32 : i32, i32
  }
  func.func @transform_2(%arg0: i32) -> (i32, i32) {
    %c0_i32 = arith.constant 0 : i32
    %c0_i32_0 = arith.constant 0 : i32
    %c0_i32_1 = arith.constant 0 : i32
    return %c0_i32, %c0_i32_0 : i32, i32
  }
  func.func @transform_3(%arg0: i32) -> (i32, i32) {
    %c0_i32 = arith.constant 0 : i32
    %c0_i32_0 = arith.constant 0 : i32
    %c0_i32_1 = arith.constant 0 : i32
    return %c0_i32, %c0_i32_0 : i32, i32
  }
  func.func @transform_4(%arg0: i32) -> (i32, i32) {
    %c0_i32 = arith.constant 0 : i32
    %c0_i32_0 = arith.constant 0 : i32
    %c0_i32_1 = arith.constant 0 : i32
    return %c0_i32, %c0_i32_0 : i32, i32
  }
  func.func @transform_5(%arg0: i32) -> (i32, i32) {
    %c0_i32 = arith.constant 0 : i32
    %c0_i32_0 = arith.constant 0 : i32
    %c0_i32_1 = arith.constant 0 : i32
    return %c0_i32, %c0_i32_0 : i32, i32
  }
  func.func @transform_6(%arg0: i32) -> (i32, i32) {
    %c0_i32 = arith.constant 0 : i32
    %c0_i32_0 = arith.constant 0 : i32
    %c0_i32_1 = arith.constant 0 : i32
    return %c0_i32, %c0_i32_0 : i32, i32
  }
}

</mosaic_0001>

<bundles_post_ra>
// kernel: rnn_forward.1
= control target key start
LH: loop header
LB: loop body
LE: loop exit
PB: predicated region body
PF: predicated region fallthrough
CT: control target
= control target key end

     0   :  { %s6145_s0 = inlined_call_operand.vmem [shape: f32[40,1024], index: 0, kind: input, shape index: {}]   ;;  %s6146_s1 = inlined_call_operand.hbm [shape: f32[1024,512], index: 1, kind: input, shape index: {}]   ;;  %s6147_s2 = inlined_call_operand.hbm [shape: f32[512,512], index: 2, kind: input, shape index: {}]   ;;  %s6148_s3 = inlined_call_operand.hbm [shape: f32[1,512], index: 3, kind: input, shape index: {}]   ;;  %s6149_s4 = inlined_call_operand.hbm [shape: f32[512,128], index: 4, kind: input, shape index: {}]   ;;  %s6150_s5 = inlined_call_operand.hbm [shape: f32[1,128], index: 5, kind: input, shape index: {}]   ;;  %s6151_s6 = inlined_call_operand.vmem [shape: f32[8,128], index: 6, kind: output, shape index: {}]  }
   0x1   :  { %6359 = sst [smem:[#allocation121_spill]] %s6147_s2 }
   0x2   :  { %11 = vsyncpa [#allocation5], 0 }
   0x3   :  { %13 = vsyncpa [#allocation5 + $0x1], 0 }
   0x4   :  { %14 = vsyncpa [#allocation7], 0 }
   0x5   :  { %15 = vsyncpa [#allocation10], 0  ;;  %s4819_s21 = smov 0   ;;  %s4821_s22 = smov 0  }
   0x6   :  { %s4823_s23 = smov 0   ;;  %s4825_s24 = smov 0  }
   0x7 LB: > { %s4838_s25 = sadd.s32 4294967295, %s4769_s24   ;;  %s4841_s26 = sadd.s32 1, %s4769_s24   ;;  %s4769_s24 = sphi %s4825_s24, %s6776_s24   ;;  %s4765_s23 = sphi %s4823_s23, %s6775_s23   ;;  %s4761_s22 = sphi %s4821_s22, %s6774_s22   ;;  %s4757_s21 = sphi %s4819_s21, %s6773_s21  }
   0x8   : > { %s25_s27 = ssub.s32 %s4769_s24, %s4841_s26  ;;  %s28_s28 = sadd.s32 1, %s4765_s23 }
   0x9   : > { %p26_p0 = scmp.eq.s32.totalorder %s25_s27, 0  ;;  %p35_p1 = scmp.ne.s32.totalorder %s4765_s23, %s4761_s22 }
   0xa   : > { %p36_p2 = scmp.eq.s32.totalorder %s4769_s24, 0  ;;  %p67_p3 = scmp.ne.s32.totalorder %s4761_s22, %s4757_s21 }
   0xb   : > { %s4851_s29 = scalar_select %p26_p0, %s4765_s23, %s28_s28  }
   0xc   : > { %p4853_p4 = por %p36_p2, %p35_p1  ;;  %p6152_p5 = scmp.eq.s32.totalorder %s4838_s25, 0 }
   0xd   : > { %p2874_p6 = scmp.ge.s32.totalorder %s4769_s24, 1  ;;  %p183_p7 = scmp.lt.s32.totalorder %s4769_s24, 5 }
   0xe   : > { %s6360_s30 = scalar_select %p4853_p4, 1, 0 }
   0xf   : > { %p4862_p8 = por %p6152_p5, %p67_p3  ;;  %p4867_p10 = pnand %p2874_p6, %p183_p7 }
  0x10   : > { %s4771_s9 = smov [#allocation6]   ;;  %s4772_s12 = smov [#allocation9]  }
  0x11   : > { %s6361_s7 = scalar_select %p4862_p8, 1, 0 }
  0x12   : > { %s6362_s8 = scalar_select %p4867_p10, 1, 0 }
  0x13   : > { %s195_s10 = sshll.u32 %s4771_s9, 4  ;;  %p4482_p11 = pneg %p4867_p10  ;;  %s196_s10 = int_to_ptr.vmem [resolvable:$true] %s195_s10 }
  0x14   : > { %s219_s13 = sshll.u32 %s4772_s12, 4  ;;  %s6364_s2 = sld [smem:[#allocation121_spill]]  ;;  %s4879_s13 = int_to_ptr.vmem [resolvable:$true] %s219_s13 }
  0x15   : > { %p4875_p12 = pnand %p4482_p11, %p6152_p5 }
  0x17   : > { %p4889_p0 = pneg %p4875_p12 }
  0x1a   : > { %s4587_s16 = scalar_lea.hbm %s6364_s2, 32768 }
  0x1b   : > { %p4588_p13 = scmp.ne.s32.totalorder %s6364_s2, %s4587_s16  ;;  %p4594_p3 = scmp.lt.u32.totalorder %s4587_s16, %s6364_s2 }
  0x1d   : > { %p4590_p1 = pnand %p4889_p0, %p4588_p13 }
  0x1f   : > { %p4591_p2 = pneg %p4590_p1 }
  0x21   : > { %p4596_p6 = pnand %p4594_p3, %p4591_p2 }
  0x23   : > { %4599 = shalt.err (!%p4596_p6)
}
  0x24   : > { %s4600_s27 = scalar_lea.vmem %s196_s10, 32768  ;;  %p4608_p5 = scmp.lt.s32.totalorder %s196_s10, %s196_s10 }
  0x25   : > { %p4601_p7 = scmp.ne.s32.totalorder %s196_s10, %s4600_s27  ;;  %p4609_p8 = scmp.lt.s32.totalorder %s4600_s27, %s4600_s27 }
  0x27   : > { %p4603_p11 = pnand %p4601_p7, %p4889_p0  ;;  %p4610_p10 = por %p4609_p8, %p4608_p5 }
  0x29   : > { %p4604_p9 = pneg %p4603_p11 }
  0x2b   : > { %p4611_p4 = pnand %p4610_p10, %p4604_p9 }
  0x2d   : > { %4614 = shalt.err (!%p4611_p4)
}
  0x2e   : > { %s4773_s28 = smov 512   ;;  %s4774_s9 = smov 32  }
  0x2f   : > { %4485 = dma.hbm_to_vmem [thread:$0]  (!%p4875_p12), %s6364_s2, 32768, %s196_s10, [#allocation7], %s4773_s28, %s4773_s28, %s4774_s9  }
  0x30   : > { %s4615_s17 = scalar_lea.hbm %s6149_s4, 8192 }
  0x31   : > { %p4616_p13 = scmp.ne.s32.totalorder %s6149_s4, %s4615_s17  ;;  %p4622_p8 = scmp.lt.u32.totalorder %s4615_s17, %s6149_s4 }
  0x33   : > { %p4618_p5 = pnand %p4616_p13, %p4889_p0 }
  0x35   : > { %p4619_p4 = pneg %p4618_p5 }
  0x37   : > { %p4624_p9 = pnand %p4622_p8, %p4619_p4 }
  0x39   : > { %4627 = shalt.err (!%p4624_p9)
}
  0x3a   : > { %s4628_s10 = scalar_lea.vmem %s4879_s13, 8192  ;;  %p4636_p3 = scmp.lt.s32.totalorder %s4879_s13, %s4879_s13 }
  0x3b   : > { %p4629_p10 = scmp.ne.s32.totalorder %s4879_s13, %s4628_s10  ;;  %p4637_p6 = scmp.lt.s32.totalorder %s4628_s10, %s4628_s10 }
  0x3d   : > { %p4631_p1 = pnand %p4629_p10, %p4889_p0  ;;  %p4638_p7 = por %p4637_p6, %p4636_p3 }
  0x3f   : > { %p4632_p2 = pneg %p4631_p1 }
  0x41   : > { %p4639_p11 = pnand %p4638_p7, %p4632_p2 }
  0x43   : > { %4642 = shalt.err (!%p4639_p11)
}
  0x44   : > { %s4775_s28 = smov 128   ;;  %s4776_s9 = smov 8  }
  0x45   : > { %4491 = dma.hbm_to_vmem [thread:$0]  (!%p4875_p12), %s6149_s4, 8192, %s4879_s13, [#allocation10], %s4775_s28, %s4775_s28, %s4776_s9  }
  0x46   : > { %s4777_s15 = smov [#allocation8]   ;;  %s4778_s17 = smov [#allocation11]  }
  0x47   : > { %s209_s16 = sshll.u32 %s4777_s15, 4  ;;  %s233_s18 = sshll.u32 %s4778_s17, 4  ;;  %s210_s16 = int_to_ptr.vmem [resolvable:$true] %s209_s16  ;;  %s4928_s18 = int_to_ptr.vmem [resolvable:$true] %s233_s18 }
  0x48   : > { %s4643_s27 = scalar_lea.hbm %s6148_s3, 64 }
  0x49   : > { %p4644_p13 = scmp.ne.s32.totalorder %s6148_s3, %s4643_s27  ;;  %p4650_p8 = scmp.lt.u32.totalorder %s4643_s27, %s6148_s3 }
  0x4b   : > { %p4646_p5 = pnand %p4644_p13, %p4889_p0 }
  0x4d   : > { %p4647_p4 = pneg %p4646_p5 }
  0x4f   : > { %p4652_p9 = pnand %p4650_p8, %p4647_p4 }
  0x51   : > { %4655 = shalt.err (!%p4652_p9)
}
  0x52   : > { %s4656_s28 = scalar_lea.vmem %s210_s16, 64  ;;  %p4664_p3 = scmp.lt.s32.totalorder %s210_s16, %s210_s16 }
  0x53   : > { %p4657_p10 = scmp.ne.s32.totalorder %s210_s16, %s4656_s28  ;;  %p4665_p6 = scmp.lt.s32.totalorder %s4656_s28, %s4656_s28 }
  0x55   : > { %p4659_p1 = pnand %p4657_p10, %p4889_p0  ;;  %p4666_p7 = por %p4665_p6, %p4664_p3 }
  0x57   : > { %p4660_p2 = pneg %p4659_p1 }
  0x59   : > { %p4667_p11 = pnand %p4666_p7, %p4660_p2 }
  0x5b   : > { %4670 = shalt.err (!%p4667_p11)
}
  0x5c   : > { %4488 = dma.hbm_to_vmem [thread:$0]  (!%p4875_p12), %s6148_s3, 64, %s210_s16, [#allocation7]  }
  0x5d   : > { %s4671_s17 = scalar_lea.hbm %s6150_s5, 16 }
  0x5e   : > { %p4672_p13 = scmp.ne.s32.totalorder %s6150_s5, %s4671_s17  ;;  %p4678_p8 = scmp.lt.u32.totalorder %s4671_s17, %s6150_s5 }
  0x60   : > { %p4674_p5 = pnand %p4672_p13, %p4889_p0 }
  0x62   : > { %p4675_p4 = pneg %p4674_p5 }
  0x64   : > { %p4680_p9 = pnand %p4678_p8, %p4675_p4 }
  0x66   : > { %4683 = shalt.err (!%p4680_p9)
}
  0x67   : > { %s4684_s16 = scalar_lea.vmem %s4928_s18, 16  ;;  %s4691_s12 = scalar_lea.vmem %s4928_s18, 32 }
  0x68   : > { %p4685_p10 = scmp.ne.s32.totalorder %s4928_s18, %s4684_s16  ;;  %p4692_p3 = scmp.lt.s32.totalorder %s4928_s18, %s4928_s18 }
  0x69   : > { %p4693_p6 = scmp.lt.s32.totalorder %s4691_s12, %s4684_s16 }
  0x6a   : > { %p4687_p1 = pnand %p4685_p10, %p4889_p0 }
  0x6b   : > { %p4694_p7 = por %p4693_p6, %p4692_p3 }
  0x6c   : > { %p4688_p2 = pneg %p4687_p1 }
  0x6e   : > { %p4695_p11 = pnand %p4694_p7, %p4688_p2 }
  0x70   : > { %4698 = shalt.err (!%p4695_p11)
}
  0x71   : > { %4494 = dma.hbm_to_vmem [thread:$0]  (!%p4875_p12), %s6150_s5, 16, %s4928_s18, [#allocation10]  }
  0x72   : > { %p2879_p13 = scmp.ge.s32.totalorder %s4769_s24, 4 }
  0x73   : > { %p6366_p0 = scmp.ne.s32.totalorder (!%p2879_p13), %s6360_s30, 0 }
  0x74   : > { %240 = sbr.rel (%p2879_p13) target bundleno = 159 (0x9f), region = 32 }
  0x7b   : > { %243 = sbr.rel (!%p6366_p0) target bundleno = 132 (0x84), region = 36  ;;  %s245_s19 = sand.u32 (%p6366_p0), 1, %s4765_s23  }
  0x7c   : > { %s2897_s2 = sshll.u32 (%p6366_p0), %s4769_s24, 4  ;;  %s4462_s9 = smul.u32 (%p6366_p0), 80, %s245_s19 }
  0x7d   : > { %s250_s11 = scalar_lea.vmem (%p6366_p0), %s6145_s0, %s2897_s2 }
  0x7e   : > { %v263_v0 = vld [vmem:[%s250_s11] sm:$0xff] (%p6366_p0)  ;;  %v265_v1 = vld [vmem:[%s250_s11 + $0x8] sm:$0xff] (%p6366_p0)  ;;  %s247_s18 = scalar_lea.vmem (%p6366_p0), [#allocation3], %s4462_s9 }
  0x7f   : > { %v267_v2 = vld [vmem:[%s250_s11 + $0x40] sm:$0xff] (%p6366_p0)  ;;  %v269_v3 = vld [vmem:[%s250_s11 + $0x48] sm:$0xff] (%p6366_p0)  ;;  %264 = vst [vmem:[%s247_s18] sm:$0xff] (%p6366_p0), %v263_v0  ;;  %266 = vst [vmem:[%s247_s18 + $0x8] sm:$0xff] (%p6366_p0), %v265_v1 }
  0x80   : > { %v271_v4 = vld [vmem:[%s250_s11 + $0x80] sm:$0xff] (%p6366_p0)  ;;  %v273_v5 = vld [vmem:[%s250_s11 + $0x88] sm:$0xff] (%p6366_p0)  ;;  %268 = vst [vmem:[%s247_s18 + $0x10] sm:$0xff] (%p6366_p0), %v267_v2  ;;  %270 = vst [vmem:[%s247_s18 + $0x18] sm:$0xff] (%p6366_p0), %v269_v3 }
  0x81   : > { %272 = vst [vmem:[%s247_s18 + $0x20] sm:$0xff] (%p6366_p0), %v271_v4  ;;  %274 = vst [vmem:[%s247_s18 + $0x28] sm:$0xff] (%p6366_p0), %v273_v5  ;;  %v275_v6 = vld [vmem:[%s250_s11 + $0xc0] sm:$0xff] (%p6366_p0)  ;;  %v277_v7 = vld [vmem:[%s250_s11 + $0xc8] sm:$0xff] (%p6366_p0) }
  0x82   : > { %v279_v8 = vld [vmem:[%s250_s11 + $0x100] sm:$0xff]  ;;  %276 = vst [vmem:[%s247_s18 + $0x30] sm:$0xff] %v275_v6  ;;  %278 = vst [vmem:[%s247_s18 + $0x38] sm:$0xff] %v277_v7  ;;  %v281_v9 = vld [vmem:[%s250_s11 + $0x108] sm:$0xff] }
  0x83   : > { %280 = vst [vmem:[%s247_s18 + $0x40] sm:$0xff] %v279_v8  ;;  %282 = vst [vmem:[%s247_s18 + $0x48] sm:$0xff] %v281_v9 }
  0x84 PF: > { %s289_s17 = sand.u32 1, %s4765_s23   ;;  %s2899_s20 = sshll.u32 %s4769_s24, 14 }
  0x85   : > { %s2882_s21 = sshll.u32 %s289_s17, 10  ;;  %s4985_s16 = scalar_lea.hbm %s6146_s1, %s2899_s20 }
  0x86   : > { %s293_s12 = scalar_lea.vmem [#allocation4], %s2882_s21  ;;  %s4989_s28 = scalar_lea.sflag [#allocation5], %s289_s17 }
  0x87   : > { %s301_s13 = sshll.u32 %s293_s12, 4  ;;  %s4699_s19 = scalar_lea.hbm %s4985_s16, 16384  ;;  %s4987_s13 = int_to_ptr.vmem [resolvable:$true] %s301_s13 }
  0x88   : > { %p4700_p12 = scmp.ne.s32.totalorder %s4985_s16, %s4699_s19  ;;  %p6367_p5 = scmp.ne.s32.totalorder %s6360_s30, 0 }
  0x89   : > { %s4703_s9 = scalar_lea.hbm %s6146_s1, 65536  ;;  %p4704_p9 = scmp.lt.u32.totalorder %s4985_s16, %s6146_s1 }
  0x8a   : > { %p4701_p4 = pnand %p4700_p12, %p6367_p5  ;;  %p4705_p10 = scmp.lt.u32.totalorder %s4703_s9, %s4699_s19 }
  0x8b   : > { %p4707_p2 = scmp.lt.u32.totalorder %s4699_s19, %s4985_s16 }
  0x8c   : > { %p4702_p8 = pneg %p4701_p4  ;;  %p4706_p1 = por %p4705_p10, %p4704_p9 }
  0x8e   : > { %p4708_p3 = por %p4707_p2, %p4706_p1 }
  0x90   : > { %p4709_p6 = pnand %p4708_p3, %p4702_p8 }
  0x92   : > { %4712 = shalt.err (!%p4709_p6)
}
  0x93   : > { %s4713_s11 = scalar_lea.vmem %s4987_s13, 16384  ;;  %s4779_s18 = smov [#allocation4]  }
  0x94   : > { %p4714_p7 = scmp.ne.s32.totalorder %s4987_s13, %s4713_s11  ;;  %s4717_s17 = sshll.u32 %s4779_s18, 4  ;;  %s4718_s17 = int_to_ptr.vmem [resolvable:$false] %s4717_s17 }
  0x95   : > { %s4719_s20 = scalar_lea.vmem %s4718_s17, 32768  ;;  %p4720_p0 = scmp.lt.s32.totalorder %s4987_s13, %s4718_s17 }
  0x96   : > { %p4715_p11 = pnand %p4714_p7, %p6367_p5  ;;  %p4721_p12 = scmp.lt.s32.totalorder %s4719_s20, %s4713_s11 }
  0x98   : > { %p4716_p13 = pneg %p4715_p11  ;;  %p4722_p4 = por %p4721_p12, %p4720_p0 }
  0x9a   : > { %p4723_p9 = pnand %p4722_p4, %p4716_p13 }
  0x9c   : > { %4726 = shalt.err (!%p4723_p9)
}
  0x9d   : > { %s4780_s21 = smov 512   ;;  %s4781_s27 = smov 32  }
  0x9e   : > { %4472 = dma.hbm_to_vmem [thread:$0]  (%p6367_p5), %s4985_s16, 16384, %s4987_s13, %s4989_s28, %s4780_s21, %s4780_s21, %s4781_s27  }
  0x9f PF: > { %p6368_p8 = scmp.ne.s32.totalorder %s6362_s8, 0 }
  0xa0   : > { %s316_s10 = sand.u32 (!%p6368_p8), 1, %s4761_s22   ;;  %p6369_p10 = scmp.ne.s32.totalorder (!%p6368_p8), %s6361_s7, 0 }
  0xa1   : > { %313 = sbr.rel (%p6368_p8) target bundleno = 2232 (0x8b8), region = 63  ;;  %s2887_s19 = sshll.u32 (!%p6368_p8), %s316_s10, 10 }
  0xa2   : > { %s4463_s12 = smul.u32 (!%p6368_p8), 80, %s316_s10  ;;  %s323_s2 = scalar_lea.sflag (!%p6368_p8), [#allocation5], %s316_s10 }
  0xa3   : > { %s5018_s9 = scalar_lea.vmem (!%p6368_p8), [#allocation4], %s2887_s19 }
  0xa4   : > { %s5016_s24 = scalar_lea.vmem (!%p6368_p8), [#allocation3], %s4463_s12 }
  0xa8   : > { %4744 = dma.done.wait (%p6369_p10), %s323_s2, 16384  }
  0xa9   : > { %4746 = vsyncadd (%p6369_p10), %s323_s2, 4294950912  ;;  %p6370_p5 = scmp.eq.s32.totalorder %s4838_s25, 0 }
  0xab   : > { %4748 = dma.done.wait (%p6370_p5), [#allocation7], 32832   ;;  %p6371_p1 = pmov %p6370_p5 }
  0xad   : > { %4750 = vsyncadd (%p6371_p1), [#allocation7], 4294934464  ;;  %p6372_p2 = pmov %p6371_p1 }
  0xae   : > { %p6373_p3 = pmov %p6371_p1 }
  0xaf   : > { %4752 = dma.done.wait (%p6372_p2), [#allocation10], 8208  }
  0xb0   : > { %4754 = vsyncadd (%p6373_p3), [#allocation10], 4294959088  ;;  %p6374_p6 = scmp.ne.s32.totalorder %s4838_s25, 0 }
  0xb1   : > { %v4782_v10 = vmov (!%p6374_p6), 0.0  }
  0xb2   : > { %375 = sbr.rel (%p6374_p6) target bundleno = 188 (0xbc), region = 91  ;;  %376 = vst [vmem:[#allocation2] sm:$0xff] (!%p6374_p6), %v4782_v10  ;;  %377 = vst [vmem:[#allocation2 + $0x8] sm:$0xff] (!%p6374_p6), %v4782_v10 }
  0xb3   : > { %378 = vst [vmem:[#allocation2 + $0x10] sm:$0xff] (!%p6374_p6), %v4782_v10  ;;  %379 = vst [vmem:[#allocation2 + $0x18] sm:$0xff] (!%p6374_p6), %v4782_v10 }
  0xb4   : > { %380 = vst [vmem:[#allocation2 + $0x20] sm:$0xff] (!%p6374_p6), %v4782_v10  ;;  %381 = vst [vmem:[#allocation2 + $0x28] sm:$0xff] (!%p6374_p6), %v4782_v10 }
  0xb5   : > { %382 = vst [vmem:[#allocation2 + $0x30] sm:$0xff] (!%p6374_p6), %v4782_v10  ;;  %383 = vst [vmem:[#allocation2 + $0x38] sm:$0xff] (!%p6374_p6), %v4782_v10 }
  0xb6   : > { %384 = vst [vmem:[#allocation2 + $0x40] sm:$0xff] (!%p6374_p6), %v4782_v10  ;;  %385 = vst [vmem:[#allocation2 + $0x48] sm:$0xff] (!%p6374_p6), %v4782_v10 }
  0xb7   : > { %386 = vst [vmem:[#allocation2 + $0x50] sm:$0xff] (!%p6374_p6), %v4782_v10  ;;  %387 = vst [vmem:[#allocation2 + $0x58] sm:$0xff] (!%p6374_p6), %v4782_v10 }
  0xb8   : > { %388 = vst [vmem:[#allocation2 + $0x60] sm:$0xff] (!%p6374_p6), %v4782_v10  ;;  %389 = vst [vmem:[#allocation2 + $0x68] sm:$0xff] (!%p6374_p6), %v4782_v10 }
  0xb9   : > { %390 = vst [vmem:[#allocation2 + $0x70] sm:$0xff] %v4782_v10  ;;  %391 = vst [vmem:[#allocation2 + $0x78] sm:$0xff] %v4782_v10 }
  0xba   : > { %392 = vst [vmem:[#allocation2 + $0x80] sm:$0xff] %v4782_v10  ;;  %393 = vst [vmem:[#allocation2 + $0x88] sm:$0xff] %v4782_v10 }
  0xbb   : > { %394 = vst [vmem:[#allocation2 + $0x90] sm:$0xff] %v4782_v10  ;;  %395 = vst [vmem:[#allocation2 + $0x98] sm:$0xff] %v4782_v10 }
  0xbc PF: > { %v427_v11 = vld [vmem:[%s5018_s9 + $0x8] sm:$0xff]  ;;  %v429_v13 = vld [vmem:[%s5018_s9 + $0x18] sm:$0xff]  ;;  %v426_v16 = vld [vmem:[%s5018_s9] sm:$0xff]  ;;  %p2893_p7 = scmp.ne.s32.totalorder %s4838_s25, 3 }
  0xbd   : > { %v431_v12 = vld [vmem:[%s5018_s9 + $0x28] sm:$0xff]  ;;  %v433_v15 = vld [vmem:[%s5018_s9 + $0x38] sm:$0xff]  ;;  %v430_v17 = vld [vmem:[%s5018_s9 + $0x20] sm:$0xff] }
  0xbe   : > { %v2970_v14 = vpack.c.bf16 %v431_v12, %v427_v11  ;;  %v3034_v18 = vpack.c.bf16 %v433_v15, %v429_v13  ;;  %v2972_v19 = vpack.c.bf16 %v430_v17, %v426_v16  ;;  %v428_v20 = vld [vmem:[%s5018_s9 + $0x10] sm:$0xff]  ;;  %v435_v22 = vld [vmem:[%s5018_s9 + $0x48] sm:$0xff]  ;;  %v437_v25 = vld [vmem:[%s5018_s9 + $0x58] sm:$0xff] }
  0xbf   : > { %v432_v21 = vld [vmem:[%s5018_s9 + $0x30] sm:$0xff]  ;;  %v439_v24 = vld [vmem:[%s5018_s9 + $0x68] sm:$0xff]  ;;  %v441_v26 = vld [vmem:[%s5018_s9 + $0x78] sm:$0xff] }
  0xc0   : > { %2971 = vmatprep.subr.bf16.mxu0 %v2970_v14  ;;  %v3036_v23 = vpack.c.bf16 %v432_v21, %v428_v20  ;;  %3035 = vmatprep.subr.bf16.mxu1 %v3034_v18  ;;  %v2974_v27 = vpack.c.bf16 %v439_v24, %v435_v22  ;;  %v3038_v28 = vpack.c.bf16 %v441_v26, %v437_v25  ;;  %v434_v29 = vld [vmem:[%s5018_s9 + $0x40] sm:$0xff]  ;;  %v436_v31 = vld [vmem:[%s5018_s9 + $0x50] sm:$0xff]  ;;  %v443_v34 = vld [vmem:[%s5018_s9 + $0x88] sm:$0xff] }
  0xc1   : > { %2973 = vmatpush1.bf16.msra.mxu0 %v2972_v19  ;;  %v438_v30 = vld [vmem:[%s5018_s9 + $0x60] sm:$0xff]  ;;  %v440_v33 = vld [vmem:[%s5018_s9 + $0x70] sm:$0xff]  ;;  %v447_v35 = vld [vmem:[%s5018_s9 + $0xa8] sm:$0xff] }
  0xc2   : > { %3037 = vmatpush1.bf16.msra.mxu1 %v3036_v23  ;;  %v2976_v32 = vpack.c.bf16 %v438_v30, %v434_v29  ;;  %2975 = vmatprep.subr.bf16.mxu0 %v2974_v27  ;;  %v3040_v36 = vpack.c.bf16 %v440_v33, %v436_v31  ;;  %v2978_v37 = vpack.c.bf16 %v447_v35, %v443_v34  ;;  %v445_v38 = vld [vmem:[%s5018_s9 + $0x98] sm:$0xff]  ;;  %v442_v40 = vld [vmem:[%s5018_s9 + $0x80] sm:$0xff]  ;;  %v444_v43 = vld [vmem:[%s5018_s9 + $0x90] sm:$0xff] }
  0xc3   : > { %3039 = vmatprep.subr.bf16.mxu1 %v3038_v28  ;;  %v449_v39 = vld [vmem:[%s5018_s9 + $0xb8] sm:$0xff]  ;;  %v446_v42 = vld [vmem:[%s5018_s9 + $0xa0] sm:$0xff]  ;;  %v448_v44 = vld [vmem:[%s5018_s9 + $0xb0] sm:$0xff] }
  0xc4   : > { %v3042_v41 = vpack.c.bf16 %v449_v39, %v445_v38  ;;  %v2980_v45 = vpack.c.bf16 %v446_v42, %v442_v40  ;;  %v451_v46 = vld [vmem:[%s5018_s9 + $0xc8] sm:$0xff]  ;;  %v453_v48 = vld [vmem:[%s5018_s9 + $0xd8] sm:$0xff]  ;;  %v3044_v49 = vpack.c.bf16 %v448_v44, %v444_v43  ;;  %v450_v52 = vld [vmem:[%s5018_s9 + $0xc0] sm:$0xff] }
  0xc5   : > { %2977 = vmatpush1.bf16.msra.mxu0 %v2976_v32  ;;  %v455_v47 = vld [vmem:[%s5018_s9 + $0xe8] sm:$0xff]  ;;  %v457_v51 = vld [vmem:[%s5018_s9 + $0xf8] sm:$0xff]  ;;  %v454_v53 = vld [vmem:[%s5018_s9 + $0xe0] sm:$0xff] }
  0xc6   : > { %3041 = vmatpush1.bf16.msra.mxu1 %v3040_v36  ;;  %2979 = vmatprep.subr.bf16.mxu0 %v2978_v37  ;;  %v2982_v50 = vpack.c.bf16 %v455_v47, %v451_v46  ;;  %v3046_v54 = vpack.c.bf16 %v457_v51, %v453_v48  ;;  %v452_v55 = vld [vmem:[%s5018_s9 + $0xd0] sm:$0xff]  ;;  %v459_v57 = vld [vmem:[%s5018_s9 + $0x108] sm:$0xff]  ;;  %v461_v59 = vld [vmem:[%s5018_s9 + $0x118] sm:$0xff]  ;;  %v2984_v61 = vpack.c.bf16 %v454_v53, %v450_v52 }
  0xc7   : > { %3043 = vmatprep.subr.bf16.mxu1 %v3042_v41  ;;  %v456_v56 = vld [vmem:[%s5018_s9 + $0xf0] sm:$0xff]  ;;  %v463_v58 = vld [vmem:[%s5018_s9 + $0x128] sm:$0xff]  ;;  %v465_v60 = vld [vmem:[%s5018_s9 + $0x138] sm:$0xff] }
  0xc8   : > { %v3048_v62 = vpack.c.bf16 %v456_v56, %v452_v55  ;;  %v2986_v63 = vpack.c.bf16 %v463_v58, %v459_v57  ;;  %v458_v0 = vld [vmem:[%s5018_s9 + $0x100] sm:$0xff]  ;;  %v460_v2 = vld [vmem:[%s5018_s9 + $0x110] sm:$0xff]  ;;  %v3050_v3 = vpack.c.bf16 %v465_v60, %v461_v59  ;;  %v467_v5 = vld [vmem:[%s5018_s9 + $0x148] sm:$0xff] }
  0xc9   : > { %2981 = vmatpush1.bf16.msra.mxu0 %v2980_v45  ;;  %v462_v1 = vld [vmem:[%s5018_s9 + $0x120] sm:$0xff]  ;;  %v464_v4 = vld [vmem:[%s5018_s9 + $0x130] sm:$0xff]  ;;  %v471_v6 = vld [vmem:[%s5018_s9 + $0x168] sm:$0xff] }
  0xca   : > { %3045 = vmatpush1.bf16.msra.mxu1 %v3044_v49  ;;  %2983 = vmatprep.subr.bf16.mxu0 %v2982_v50  ;;  %v469_v7 = vld [vmem:[%s5018_s9 + $0x158] sm:$0xff]  ;;  %v2988_v9 = vpack.c.bf16 %v462_v1, %v458_v0  ;;  %v3052_v10 = vpack.c.bf16 %v464_v4, %v460_v2  ;;  %v2990_v11 = vpack.c.bf16 %v471_v6, %v467_v5  ;;  %v466_v12 = vld [vmem:[%s5018_s9 + $0x140] sm:$0xff]  ;;  %v468_v14 = vld [vmem:[%s5018_s9 + $0x150] sm:$0xff] }
  0xcb   : > { %3047 = vmatprep.subr.bf16.mxu1 %v3046_v54  ;;  %v473_v8 = vld [vmem:[%s5018_s9 + $0x178] sm:$0xff]  ;;  %v470_v13 = vld [vmem:[%s5018_s9 + $0x160] sm:$0xff]  ;;  %v472_v16 = vld [vmem:[%s5018_s9 + $0x170] sm:$0xff] }
  0xcc   : > { %v3054_v15 = vpack.c.bf16 %v473_v8, %v469_v7  ;;  %v475_v17 = vld [vmem:[%s5018_s9 + $0x188] sm:$0xff]  ;;  %v477_v19 = vld [vmem:[%s5018_s9 + $0x198] sm:$0xff]  ;;  %v2992_v21 = vpack.c.bf16 %v470_v13, %v466_v12  ;;  %v3056_v22 = vpack.c.bf16 %v472_v16, %v468_v14  ;;  %v474_v24 = vld [vmem:[%s5018_s9 + $0x180] sm:$0xff] }
  0xcd   : > { %2985 = vmatpush1.bf16.msra.mxu0 %v2984_v61  ;;  %v479_v18 = vld [vmem:[%s5018_s9 + $0x1a8] sm:$0xff]  ;;  %v481_v20 = vld [vmem:[%s5018_s9 + $0x1b8] sm:$0xff]  ;;  %v478_v25 = vld [vmem:[%s5018_s9 + $0x1a0] sm:$0xff] }
  0xce   : > { %3049 = vmatpush1.bf16.msra.mxu1 %v3048_v62  ;;  %2987 = vmatprep.subr.bf16.mxu0 %v2986_v63  ;;  %v2994_v23 = vpack.c.bf16 %v479_v18, %v475_v17  ;;  %v476_v26 = vld [vmem:[%s5018_s9 + $0x190] sm:$0xff]  ;;  %v3058_v27 = vpack.c.bf16 %v481_v20, %v477_v19  ;;  %v483_v29 = vld [vmem:[%s5018_s9 + $0x1c8] sm:$0xff]  ;;  %v485_v31 = vld [vmem:[%s5018_s9 + $0x1d8] sm:$0xff]  ;;  %v2996_v33 = vpack.c.bf16 %v478_v25, %v474_v24 }
  0xcf   : > { %3051 = vmatprep.subr.bf16.mxu1 %v3050_v3  ;;  %v480_v28 = vld [vmem:[%s5018_s9 + $0x1b0] sm:$0xff]  ;;  %v487_v30 = vld [vmem:[%s5018_s9 + $0x1e8] sm:$0xff]  ;;  %v489_v32 = vld [vmem:[%s5018_s9 + $0x1f8] sm:$0xff] }
  0xd0   : > { %v3060_v34 = vpack.c.bf16 %v480_v28, %v476_v26  ;;  %v2998_v35 = vpack.c.bf16 %v487_v30, %v483_v29  ;;  %v482_v36 = vld [vmem:[%s5018_s9 + $0x1c0] sm:$0xff]  ;;  %v484_v38 = vld [vmem:[%s5018_s9 + $0x1d0] sm:$0xff]  ;;  %v3062_v39 = vpack.c.bf16 %v489_v32, %v485_v31  ;;  %v491_v41 = vld [vmem:[%s5018_s9 + $0x208] sm:$0xff] }
  0xd1   : > { %2989 = vmatpush1.bf16.msra.mxu0 %v2988_v9  ;;  %v486_v37 = vld [vmem:[%s5018_s9 + $0x1e0] sm:$0xff]  ;;  %v488_v40 = vld [vmem:[%s5018_s9 + $0x1f0] sm:$0xff]  ;;  %v495_v42 = vld [vmem:[%s5018_s9 + $0x228] sm:$0xff] }
  0xd2   : > { %3053 = vmatpush1.bf16.msra.mxu1 %v3052_v10  ;;  %2991 = vmatprep.subr.bf16.mxu0 %v2990_v11  ;;  %v493_v43 = vld [vmem:[%s5018_s9 + $0x218] sm:$0xff]  ;;  %v3000_v45 = vpack.c.bf16 %v486_v37, %v482_v36  ;;  %v3064_v46 = vpack.c.bf16 %v488_v40, %v484_v38  ;;  %v3002_v47 = vpack.c.bf16 %v495_v42, %v491_v41  ;;  %v490_v48 = vld [vmem:[%s5018_s9 + $0x200] sm:$0xff]  ;;  %v492_v50 = vld [vmem:[%s5018_s9 + $0x210] sm:$0xff] }
  0xd3   : > { %3055 = vmatprep.subr.bf16.mxu1 %v3054_v15  ;;  %v497_v44 = vld [vmem:[%s5018_s9 + $0x238] sm:$0xff]  ;;  %v494_v49 = vld [vmem:[%s5018_s9 + $0x220] sm:$0xff]  ;;  %v496_v52 = vld [vmem:[%s5018_s9 + $0x230] sm:$0xff] }
  0xd4   : > { %v3066_v51 = vpack.c.bf16 %v497_v44, %v493_v43  ;;  %v499_v53 = vld [vmem:[%s5018_s9 + $0x248] sm:$0xff]  ;;  %v501_v55 = vld [vmem:[%s5018_s9 + $0x258] sm:$0xff]  ;;  %v3004_v57 = vpack.c.bf16 %v494_v49, %v490_v48  ;;  %v3068_v58 = vpack.c.bf16 %v496_v52, %v492_v50  ;;  %v498_v60 = vld [vmem:[%s5018_s9 + $0x240] sm:$0xff] }
  0xd5   : > { %2993 = vmatpush1.bf16.msra.mxu0 %v2992_v21  ;;  %v503_v54 = vld [vmem:[%s5018_s9 + $0x268] sm:$0xff]  ;;  %v505_v56 = vld [vmem:[%s5018_s9 + $0x278] sm:$0xff]  ;;  %v502_v61 = vld [vmem:[%s5018_s9 + $0x260] sm:$0xff] }
  0xd6   : > { %3057 = vmatpush1.bf16.msra.mxu1 %v3056_v22  ;;  %2995 = vmatprep.subr.bf16.mxu0 %v2994_v23  ;;  %v3006_v59 = vpack.c.bf16 %v503_v54, %v499_v53  ;;  %v500_v62 = vld [vmem:[%s5018_s9 + $0x250] sm:$0xff]  ;;  %v3070_v63 = vpack.c.bf16 %v505_v56, %v501_v55  ;;  %v507_v1 = vld [vmem:[%s5018_s9 + $0x288] sm:$0xff]  ;;  %v509_v3 = vld [vmem:[%s5018_s9 + $0x298] sm:$0xff]  ;;  %v3008_v5 = vpack.c.bf16 %v502_v61, %v498_v60 }
  0xd7   : > { %3059 = vmatprep.subr.bf16.mxu1 %v3058_v27  ;;  %v504_v0 = vld [vmem:[%s5018_s9 + $0x270] sm:$0xff]  ;;  %v511_v2 = vld [vmem:[%s5018_s9 + $0x2a8] sm:$0xff]  ;;  %v513_v4 = vld [vmem:[%s5018_s9 + $0x2b8] sm:$0xff] }
  0xd8   : > { %v3072_v6 = vpack.c.bf16 %v504_v0, %v500_v62  ;;  %v3010_v7 = vpack.c.bf16 %v511_v2, %v507_v1  ;;  %v506_v8 = vld [vmem:[%s5018_s9 + $0x280] sm:$0xff]  ;;  %v508_v10 = vld [vmem:[%s5018_s9 + $0x290] sm:$0xff]  ;;  %v3074_v11 = vpack.c.bf16 %v513_v4, %v509_v3  ;;  %v515_v13 = vld [vmem:[%s5018_s9 + $0x2c8] sm:$0xff] }
  0xd9   : > { %2997 = vmatpush1.bf16.msra.mxu0 %v2996_v33  ;;  %v510_v9 = vld [vmem:[%s5018_s9 + $0x2a0] sm:$0xff]  ;;  %v512_v12 = vld [vmem:[%s5018_s9 + $0x2b0] sm:$0xff]  ;;  %v519_v14 = vld [vmem:[%s5018_s9 + $0x2e8] sm:$0xff] }
  0xda   : > { %3061 = vmatpush1.bf16.msra.mxu1 %v3060_v34  ;;  %2999 = vmatprep.subr.bf16.mxu0 %v2998_v35  ;;  %v517_v15 = vld [vmem:[%s5018_s9 + $0x2d8] sm:$0xff]  ;;  %v3012_v17 = vpack.c.bf16 %v510_v9, %v506_v8  ;;  %v514_v18 = vld [vmem:[%s5018_s9 + $0x2c0] sm:$0xff]  ;;  %v3076_v19 = vpack.c.bf16 %v512_v12, %v508_v10  ;;  %v3014_v20 = vpack.c.bf16 %v519_v14, %v515_v13  ;;  %v516_v22 = vld [vmem:[%s5018_s9 + $0x2d0] sm:$0xff] }
  0xdb   : > { %3063 = vmatprep.subr.bf16.mxu1 %v3062_v39  ;;  %v521_v16 = vld [vmem:[%s5018_s9 + $0x2f8] sm:$0xff]  ;;  %v518_v21 = vld [vmem:[%s5018_s9 + $0x2e0] sm:$0xff]  ;;  %v520_v23 = vld [vmem:[%s5018_s9 + $0x2f0] sm:$0xff] }
  0xdc   : > { %v3078_v24 = vpack.c.bf16 %v521_v16, %v517_v15  ;;  %v523_v25 = vld [vmem:[%s5018_s9 + $0x308] sm:$0xff]  ;;  %v525_v28 = vld [vmem:[%s5018_s9 + $0x318] sm:$0xff]  ;;  %v3016_v30 = vpack.c.bf16 %v518_v21, %v514_v18  ;;  %v3080_v31 = vpack.c.bf16 %v520_v23, %v516_v22  ;;  %v522_v33 = vld [vmem:[%s5018_s9 + $0x300] sm:$0xff] }
  0xdd   : > { %3001 = vmatpush1.bf16.msra.mxu0 %v3000_v45  ;;  %v527_v26 = vld [vmem:[%s5018_s9 + $0x328] sm:$0xff]  ;;  %v529_v29 = vld [vmem:[%s5018_s9 + $0x338] sm:$0xff]  ;;  %v526_v34 = vld [vmem:[%s5018_s9 + $0x320] sm:$0xff] }
  0xde   : > { %3065 = vmatpush1.bf16.msra.mxu1 %v3064_v46  ;;  %3003 = vmatprep.subr.bf16.mxu0 %v3002_v47  ;;  %v417_v27 = vld [vmem:[%s5016_s24 + $0x8] sm:$0xff]  ;;  %v3018_v32 = vpack.c.bf16 %v527_v26, %v523_v25  ;;  %v524_v35 = vld [vmem:[%s5018_s9 + $0x310] sm:$0xff]  ;;  %v3082_v36 = vpack.c.bf16 %v529_v29, %v525_v28  ;;  %v3020_v42 = vpack.c.bf16 %v526_v34, %v522_v33  ;;  %v530_v45 = vld [vmem:[%s5018_s9 + $0x340] sm:$0xff] }
  0xdf   : > { %3067 = vmatprep.subr.bf16.mxu1 %v3066_v51  ;;  %618 = vmatprep.mubr.f32.mxu0 %v417_v27  ;;  %v528_v37 = vld [vmem:[%s5018_s9 + $0x330] sm:$0xff]  ;;  %v531_v38 = vld [vmem:[%s5018_s9 + $0x348] sm:$0xff]  ;;  %v533_v40 = vld [vmem:[%s5018_s9 + $0x358] sm:$0xff] }
  0xe0   : > { %713 = vmatprep.mubr.f32.mxu1 %v417_v27  ;;  %v535_v39 = vld [vmem:[%s5018_s9 + $0x368] sm:$0xff]  ;;  %v537_v41 = vld [vmem:[%s5018_s9 + $0x378] sm:$0xff]  ;;  %v3084_v43 = vpack.c.bf16 %v528_v37, %v524_v35  ;;  %v534_v46 = vld [vmem:[%s5018_s9 + $0x360] sm:$0xff] }
  0xe1   : > { %3005 = vmatpush1.bf16.msra.mxu0 %v3004_v57  ;;  %v3022_v44 = vpack.c.bf16 %v535_v39, %v531_v38  ;;  %v532_v47 = vld [vmem:[%s5018_s9 + $0x350] sm:$0xff]  ;;  %v3086_v48 = vpack.c.bf16 %v537_v41, %v533_v40  ;;  %v539_v50 = vld [vmem:[%s5018_s9 + $0x388] sm:$0xff]  ;;  %v541_v52 = vld [vmem:[%s5018_s9 + $0x398] sm:$0xff]  ;;  %v3024_v54 = vpack.c.bf16 %v534_v46, %v530_v45 }
  0xe2   : > { %3069 = vmatpush1.bf16.msra.mxu1 %v3068_v58  ;;  %3007 = vmatprep.subr.bf16.mxu0 %v3006_v59  ;;  %v536_v49 = vld [vmem:[%s5018_s9 + $0x370] sm:$0xff]  ;;  %v543_v51 = vld [vmem:[%s5018_s9 + $0x3a8] sm:$0xff]  ;;  %v545_v53 = vld [vmem:[%s5018_s9 + $0x3b8] sm:$0xff] }
  0xe3   : > { %3071 = vmatprep.subr.bf16.mxu1 %v3070_v63  ;;  %v3088_v55 = vpack.c.bf16 %v536_v49, %v532_v47  ;;  %v3026_v56 = vpack.c.bf16 %v543_v51, %v539_v50  ;;  %v538_v57 = vld [vmem:[%s5018_s9 + $0x380] sm:$0xff]  ;;  %v540_v59 = vld [vmem:[%s5018_s9 + $0x390] sm:$0xff]  ;;  %v3090_v60 = vpack.c.bf16 %v545_v53, %v541_v52  ;;  %v547_v62 = vld [vmem:[%s5018_s9 + $0x3c8] sm:$0xff] }
  0xe4   : > { %v542_v58 = vld [vmem:[%s5018_s9 + $0x3a0] sm:$0xff]  ;;  %v544_v61 = vld [vmem:[%s5018_s9 + $0x3b0] sm:$0xff]  ;;  %v551_v63 = vld [vmem:[%s5018_s9 + $0x3e8] sm:$0xff] }
  0xe5   : > { %3009 = vmatpush1.bf16.msra.mxu0 %v3008_v5  ;;  %v549_v0 = vld [vmem:[%s5018_s9 + $0x3d8] sm:$0xff]  ;;  %v3028_v2 = vpack.c.bf16 %v542_v58, %v538_v57  ;;  %v3092_v3 = vpack.c.bf16 %v544_v61, %v540_v59  ;;  %v3030_v4 = vpack.c.bf16 %v551_v63, %v547_v62  ;;  %v546_v5 = vld [vmem:[%s5018_s9 + $0x3c0] sm:$0xff]  ;;  %v548_v8 = vld [vmem:[%s5018_s9 + $0x3d0] sm:$0xff] }
  0xe6   : > { %3073 = vmatpush1.bf16.msra.mxu1 %v3072_v6  ;;  %3011 = vmatprep.subr.bf16.mxu0 %v3010_v7  ;;  %v553_v1 = vld [vmem:[%s5018_s9 + $0x3f8] sm:$0xff]  ;;  %v550_v6 = vld [vmem:[%s5018_s9 + $0x3e0] sm:$0xff]  ;;  %v552_v9 = vld [vmem:[%s5018_s9 + $0x3f0] sm:$0xff] }
  0xe7   : > { %3075 = vmatprep.subr.bf16.mxu1 %v3074_v11  ;;  %v3094_v7 = vpack.c.bf16 %v553_v1, %v549_v0  ;;  %v3032_v10 = vpack.c.bf16 %v550_v6, %v546_v5  ;;  %v3096_v11 = vpack.c.bf16 %v552_v9, %v548_v8  ;;  %v416_v12 = vld [vmem:[%s5016_s24] sm:$0xff]  ;;  %v419_v13 = vld [vmem:[%s5016_s24 + $0x18] sm:$0xff]  ;;  %v418_v14 = vld [vmem:[%s5016_s24 + $0x10] sm:$0xff] }
  0xe8   : > { %v421_v15 = vld [vmem:[%s5016_s24 + $0x28] sm:$0xff]  ;;  %v420_v16 = vld [vmem:[%s5016_s24 + $0x20] sm:$0xff]  ;;  %v422_v18 = vld [vmem:[%s5016_s24 + $0x30] sm:$0xff] }
  0xe9   : > { %3013 = vmatpush1.bf16.msra.mxu0 %v3012_v17  ;;  %v423_v17 = vld [vmem:[%s5016_s24 + $0x38] sm:$0xff]  ;;  %v396_v21 = vld [vmem:[#allocation2] sm:$0xff]  ;;  %v398_v22 = vld [vmem:[#allocation2 + $0x10] sm:$0xff] }
  0xea   : > { %3077 = vmatpush1.bf16.msra.mxu1 %v3076_v19  ;;  %3015 = vmatprep.subr.bf16.mxu0 %v3014_v20  ;;  %v425_v19 = vld [vmem:[%s5016_s24 + $0x48] sm:$0xff]  ;;  %v424_v20 = vld [vmem:[%s5016_s24 + $0x40] sm:$0xff] }
  0xeb   : > { %3079 = vmatprep.subr.bf16.mxu1 %v3078_v24  ;;  %v397_v23 = vld [vmem:[#allocation2 + $0x8] sm:$0xff]  ;;  %v399_v25 = vld [vmem:[#allocation2 + $0x18] sm:$0xff]  ;;  %v402_v34 = vld [vmem:[#allocation2 + $0x30] sm:$0xff] }
  0xec   : > { %v401_v35 = vld [vmem:[#allocation2 + $0x28] sm:$0xff]  ;;  %v403_v37 = vld [vmem:[#allocation2 + $0x38] sm:$0xff]  ;;  %v406_v46 = vld [vmem:[#allocation2 + $0x50] sm:$0xff] }
  0xed   : > { %3017 = vmatpush1.bf16.msra.mxu0 %v3016_v30  ;;  %v405_v47 = vld [vmem:[#allocation2 + $0x48] sm:$0xff]  ;;  %v407_v49 = vld [vmem:[#allocation2 + $0x58] sm:$0xff]  ;;  %v410_v58 = vld [vmem:[#allocation2 + $0x70] sm:$0xff] }
  0xee   : > { %3081 = vmatpush1.bf16.msra.mxu1 %v3080_v31  ;;  %3019 = vmatprep.subr.bf16.mxu0 %v3018_v32  ;;  %v400_v32 = vld [vmem:[#allocation2 + $0x20] sm:$0xff]  ;;  %v409_v59 = vld [vmem:[#allocation2 + $0x68] sm:$0xff]  ;;  %v411_v61 = vld [vmem:[#allocation2 + $0x78] sm:$0xff] }
  0xef   : > { %3083 = vmatprep.subr.bf16.mxu1 %v3082_v36  ;;  %v414_v6 = vld [vmem:[#allocation2 + $0x90] sm:$0xff]  ;;  %v415_v9 = vld [vmem:[#allocation2 + $0x98] sm:$0xff] }
  0xf1   : > { %3021 = vmatpush1.bf16.msra.mxu0 %v3020_v42 }
  0xf2   : > { %3085 = vmatpush1.bf16.msra.mxu1 %v3084_v43  ;;  %3023 = vmatprep.subr.bf16.mxu0 %v3022_v44  ;;  %v404_v44 = vld [vmem:[#allocation2 + $0x40] sm:$0xff] }
  0xf3   : > { %3087 = vmatprep.subr.bf16.mxu1 %v3086_v48 }
  0xf5   : > { %3025 = vmatpush1.bf16.msra.mxu0 %v3024_v54 }
  0xf6   : > { %3089 = vmatpush1.bf16.msra.mxu1 %v3088_v55  ;;  %3027 = vmatprep.subr.bf16.mxu0 %v3026_v56  ;;  %v408_v56 = vld [vmem:[#allocation2 + $0x60] sm:$0xff] }
  0xf7   : > { %3091 = vmatprep.subr.bf16.mxu1 %v3090_v60 }
  0xf9   : > { %3029 = vmatpush1.bf16.msra.mxu0 %v3028_v2 }
  0xfa   : > { %3093 = vmatpush1.bf16.msra.mxu1 %v3092_v3  ;;  %3031 = vmatprep.subr.bf16.mxu0 %v3030_v4  ;;  %v412_v4 = vld [vmem:[#allocation2 + $0x80] sm:$0xff] }
  0xfb   : > { %3095 = vmatprep.subr.bf16.mxu1 %v3094_v7  ;;  %v413_v7 = vld [vmem:[#allocation2 + $0x88] sm:$0xff] }
  0xfd   : > { %3033 = vmatpush1.bf16.msra.mxu0 %v3032_v10 }
  0xfe   : > { %3097 = vmatpush1.bf16.msra.mxu1 %v3096_v11 }
 0x100   : > { %619 = vmatmul.mubr.f32.vlgmr.msra.gmra.mrb[0].mxu0 %v416_v12 }
 0x101   : > { %714 = vmatmul.mubr.f32.vlgmr.msra.gmra.mrb[0].mxu1 %v416_v12  ;;  %624 = vmatprep.mubr.f32.mxu0 %v419_v13 }
 0x102   : > { %719 = vmatprep.mubr.f32.mxu1 %v419_v13 }
 0x104   : > { %625 = vmatmul.mubr.f32.gmra.mrb[2].mxu0 %v418_v14 }
 0x105   : > { %720 = vmatmul.mubr.f32.gmra.mrb[2].mxu1 %v418_v14  ;;  %630 = vmatprep.mubr.f32.mxu0 %v421_v15 }
 0x106   : > { %725 = vmatprep.mubr.f32.mxu1 %v421_v15 }
 0x108   : > { %631 = vmatmul.mubr.f32.gmra.mrb[4].mxu0 %v420_v16 }
 0x109   : > { %726 = vmatmul.mubr.f32.gmra.mrb[4].mxu1 %v420_v16  ;;  %636 = vmatprep.mubr.f32.mxu0 %v423_v17 }
 0x10a   : > { %731 = vmatprep.mubr.f32.mxu1 %v423_v17 }
 0x10c   : > { %637 = vmatmul.mubr.f32.gmra.mrb[6].mxu0 %v422_v18 }
 0x10d   : > { %732 = vmatmul.mubr.f32.gmra.mrb[6].mxu1 %v422_v18  ;;  %642 = vmatprep.mubr.f32.mxu0 %v425_v19 }
 0x10e   : > { %737 = vmatprep.mubr.f32.mxu1 %v425_v19 }
 0x110   : > { %643 = vmatmul.mubr.f32.gmra.mrb[8].mxu0 %v424_v20 }
 0x111   : > { %738 = vmatmul.mubr.f32.gmra.mrb[8].mxu1 %v424_v20 }
 0x1d3   : > { %v620_v24 = vpop.f32.mrb[0].mxu0 }
 0x1d4   : > { %v744_v26 = vadd.f32 %v620_v24, %v396_v21  ;;  %v715_v27 = vpop.f32.mrb[0].mxu1  ;;  %v622_v28 = vpop.f32.mrb[1].mxu0 }
 0x1d5   : > { %v746_v29 = vadd.f32 %v715_v27, %v398_v22  ;;  %v745_v30 = vadd.f32 %v622_v28, %v397_v23  ;;  %v717_v31 = vpop.f32.mrb[1].mxu1 }
 0x1d6   : > { %764 = vst [vmem:[#allocation2] sm:$0xff] %v744_v26  ;;  %v747_v33 = vadd.f32 %v717_v31, %v399_v25 }
 0x1d7   : > { %766 = vst [vmem:[#allocation2 + $0x10] sm:$0xff] %v746_v29  ;;  %765 = vst [vmem:[#allocation2 + $0x8] sm:$0xff] %v745_v30  ;;  %v626_v36 = vpop.f32.mrb[2].mxu0 }
 0x1d8   : > { %767 = vst [vmem:[#allocation2 + $0x18] sm:$0xff] %v747_v33  ;;  %v748_v38 = vadd.f32 %v626_v36, %v400_v32  ;;  %v721_v39 = vpop.f32.mrb[2].mxu1  ;;  %v628_v40 = vpop.f32.mrb[3].mxu0 }
 0x1d9   : > { %v750_v41 = vadd.f32 %v721_v39, %v402_v34  ;;  %v749_v42 = vadd.f32 %v628_v40, %v401_v35  ;;  %v723_v43 = vpop.f32.mrb[3].mxu1 }
 0x1da   : > { %768 = vst [vmem:[#allocation2 + $0x20] sm:$0xff] %v748_v38  ;;  %v751_v45 = vadd.f32 %v723_v43, %v403_v37 }
 0x1db   : > { %770 = vst [vmem:[#allocation2 + $0x30] sm:$0xff] %v750_v41  ;;  %769 = vst [vmem:[#allocation2 + $0x28] sm:$0xff] %v749_v42  ;;  %v632_v48 = vpop.f32.mrb[4].mxu0 }
 0x1dc   : > { %771 = vst [vmem:[#allocation2 + $0x38] sm:$0xff] %v751_v45  ;;  %v752_v50 = vadd.f32 %v632_v48, %v404_v44  ;;  %v727_v51 = vpop.f32.mrb[4].mxu1  ;;  %v634_v52 = vpop.f32.mrb[5].mxu0 }
 0x1dd   : > { %v754_v53 = vadd.f32 %v727_v51, %v406_v46  ;;  %v753_v54 = vadd.f32 %v634_v52, %v405_v47  ;;  %v729_v55 = vpop.f32.mrb[5].mxu1 }
 0x1de   : > { %772 = vst [vmem:[#allocation2 + $0x40] sm:$0xff] %v752_v50  ;;  %v755_v57 = vadd.f32 %v729_v55, %v407_v49 }
 0x1df   : > { %774 = vst [vmem:[#allocation2 + $0x50] sm:$0xff] %v754_v53  ;;  %773 = vst [vmem:[#allocation2 + $0x48] sm:$0xff] %v753_v54  ;;  %v638_v60 = vpop.f32.mrb[6].mxu0 }
 0x1e0   : > { %775 = vst [vmem:[#allocation2 + $0x58] sm:$0xff] %v755_v57  ;;  %v756_v62 = vadd.f32 %v638_v60, %v408_v56  ;;  %v733_v63 = vpop.f32.mrb[6].mxu1  ;;  %v640_v0 = vpop.f32.mrb[7].mxu0 }
 0x1e1   : > { %v758_v1 = vadd.f32 %v733_v63, %v410_v58  ;;  %v757_v2 = vadd.f32 %v640_v0, %v409_v59  ;;  %v735_v3 = vpop.f32.mrb[7].mxu1 }
 0x1e2   : > { %776 = vst [vmem:[#allocation2 + $0x60] sm:$0xff] %v756_v62  ;;  %v759_v5 = vadd.f32 %v735_v3, %v411_v61  ;;  %787 = sbr.rel (%p2893_p7) target bundleno = 2232 (0x8b8), region = 95 }
 0x1e3   : > { %778 = vst [vmem:[#allocation2 + $0x70] sm:$0xff] %v758_v1  ;;  %777 = vst [vmem:[#allocation2 + $0x68] sm:$0xff] %v757_v2  ;;  %v644_v8 = vpop.f32.mrb[8].mxu0 }
 0x1e4   : > { %779 = vst [vmem:[#allocation2 + $0x78] sm:$0xff] %v759_v5  ;;  %v760_v10 = vadd.f32 %v644_v8, %v412_v4  ;;  %v739_v11 = vpop.f32.mrb[8].mxu1  ;;  %v646_v12 = vpop.f32.mrb[9].mxu0 }
 0x1e5   : > { %v762_v13 = vadd.f32 %v739_v11, %v414_v6  ;;  %v761_v14 = vadd.f32 %v646_v12, %v413_v7  ;;  %v741_v15 = vpop.f32.mrb[9].mxu1 }
 0x1e6   : > { %780 = vst [vmem:[#allocation2 + $0x80] sm:$0xff] %v760_v10  ;;  %v763_v16 = vadd.f32 %v741_v15, %v415_v9 }
 0x1e7   : > { %782 = vst [vmem:[#allocation2 + $0x90] sm:$0xff] %v762_v13  ;;  %781 = vst [vmem:[#allocation2 + $0x88] sm:$0xff] %v761_v14 }
 0x1e8   : > { %783 = vst [vmem:[#allocation2 + $0x98] sm:$0xff] %v763_v16 }
 0x1e9   : > { %v851_v17 = vld [vmem:[#allocation6 + $0x8] sm:$0xff]  ;;  %v853_v19 = vld [vmem:[#allocation6 + $0x18] sm:$0xff]  ;;  %v850_v22 = vld [vmem:[#allocation6] sm:$0xff]  ;;  %v6156_v24 = vmov 0.0  }
 0x1ea   : > { %v855_v18 = vld [vmem:[#allocation6 + $0x28] sm:$0xff]  ;;  %v857_v21 = vld [vmem:[#allocation6 + $0x38] sm:$0xff]  ;;  %v854_v23 = vld [vmem:[#allocation6 + $0x20] sm:$0xff]  ;;  %1170 = vmatprep.mubr.f32.mxu0 %v6156_v24  ;;  %1312 = vmatprep.mubr.f32.mxu1 %v6156_v24 }
 0x1eb   : > { %v5173_v20 = vpack.c.bf16 %v855_v18, %v851_v17  ;;  %v5177_v25 = vpack.c.bf16 %v857_v21, %v853_v19  ;;  %v5179_v26 = vpack.c.bf16 %v854_v23, %v850_v22  ;;  %v852_v27 = vld [vmem:[#allocation6 + $0x10] sm:$0xff]  ;;  %v859_v29 = vld [vmem:[#allocation6 + $0x48] sm:$0xff]  ;;  %v861_v32 = vld [vmem:[#allocation6 + $0x58] sm:$0xff] }
 0x1ec   : > { %v856_v28 = vld [vmem:[#allocation6 + $0x30] sm:$0xff]  ;;  %v863_v31 = vld [vmem:[#allocation6 + $0x68] sm:$0xff]  ;;  %v865_v33 = vld [vmem:[#allocation6 + $0x78] sm:$0xff] }
 0x1ed   : > { %3099 = vmatprep.subr.bf16.mxu0 %v5173_v20  ;;  %v5182_v30 = vpack.c.bf16 %v856_v28, %v852_v27  ;;  %3227 = vmatprep.subr.bf16.mxu1 %v5177_v25  ;;  %v5186_v34 = vpack.c.bf16 %v863_v31, %v859_v29  ;;  %v5188_v35 = vpack.c.bf16 %v865_v33, %v861_v32  ;;  %v858_v36 = vld [vmem:[#allocation6 + $0x40] sm:$0xff]  ;;  %v860_v38 = vld [vmem:[#allocation6 + $0x50] sm:$0xff]  ;;  %v867_v41 = vld [vmem:[#allocation6 + $0x88] sm:$0xff] }
 0x1ee   : > { %3101 = vmatpush1.bf16.msra.mxu0 %v5179_v26  ;;  %v862_v37 = vld [vmem:[#allocation6 + $0x60] sm:$0xff]  ;;  %v864_v40 = vld [vmem:[#allocation6 + $0x70] sm:$0xff]  ;;  %v871_v42 = vld [vmem:[#allocation6 + $0xa8] sm:$0xff] }
 0x1ef   : > { %3229 = vmatpush1.bf16.msra.mxu1 %v5182_v30  ;;  %v5191_v39 = vpack.c.bf16 %v862_v37, %v858_v36  ;;  %3103 = vmatprep.subr.bf16.mxu0 %v5186_v34  ;;  %v5195_v43 = vpack.c.bf16 %v864_v40, %v860_v38  ;;  %v5197_v44 = vpack.c.bf16 %v871_v42, %v867_v41  ;;  %v869_v45 = vld [vmem:[#allocation6 + $0x98] sm:$0xff]  ;;  %v866_v47 = vld [vmem:[#allocation6 + $0x80] sm:$0xff]  ;;  %v868_v50 = vld [vmem:[#allocation6 + $0x90] sm:$0xff] }
 0x1f0   : > { %3231 = vmatprep.subr.bf16.mxu1 %v5188_v35  ;;  %v873_v46 = vld [vmem:[#allocation6 + $0xb8] sm:$0xff]  ;;  %v870_v49 = vld [vmem:[#allocation6 + $0xa0] sm:$0xff]  ;;  %v872_v51 = vld [vmem:[#allocation6 + $0xb0] sm:$0xff] }
 0x1f1   : > { %v5199_v48 = vpack.c.bf16 %v873_v46, %v869_v45  ;;  %v5202_v52 = vpack.c.bf16 %v870_v49, %v866_v47  ;;  %v875_v53 = vld [vmem:[#allocation6 + $0xc8] sm:$0xff]  ;;  %v877_v55 = vld [vmem:[#allocation6 + $0xd8] sm:$0xff]  ;;  %v5206_v56 = vpack.c.bf16 %v872_v51, %v868_v50  ;;  %v874_v59 = vld [vmem:[#allocation6 + $0xc0] sm:$0xff] }
 0x1f2   : > { %3105 = vmatpush1.bf16.msra.mxu0 %v5191_v39  ;;  %v879_v54 = vld [vmem:[#allocation6 + $0xe8] sm:$0xff]  ;;  %v881_v58 = vld [vmem:[#allocation6 + $0xf8] sm:$0xff]  ;;  %v878_v60 = vld [vmem:[#allocation6 + $0xe0] sm:$0xff] }
 0x1f3   : > { %3233 = vmatpush1.bf16.msra.mxu1 %v5195_v43  ;;  %3107 = vmatprep.subr.bf16.mxu0 %v5197_v44  ;;  %6375 = vst [vmem:[#allocation15_spill] sm:$0xff] %v5206_v56  ;;  %v5208_v57 = vpack.c.bf16 %v879_v54, %v875_v53  ;;  %v5211_v61 = vpack.c.bf16 %v881_v58, %v877_v55  ;;  %v876_v62 = vld [vmem:[#allocation6 + $0xd0] sm:$0xff]  ;;  %v883_v0 = vld [vmem:[#allocation6 + $0x108] sm:$0xff]  ;;  %v885_v2 = vld [vmem:[#allocation6 + $0x118] sm:$0xff] }
 0x1f4   : > { %3235 = vmatprep.subr.bf16.mxu1 %v5199_v48  ;;  %v880_v63 = vld [vmem:[#allocation6 + $0xf0] sm:$0xff]  ;;  %v887_v1 = vld [vmem:[#allocation6 + $0x128] sm:$0xff]  ;;  %v889_v3 = vld [vmem:[#allocation6 + $0x138] sm:$0xff]  ;;  %v5214_v4 = vpack.c.bf16 %v878_v60, %v874_v59 }
 0x1f5   : > { %6376 = vst [vmem:[#allocation16_spill] sm:$0xff] %v5208_v57  ;;  %6377 = vst [vmem:[#allocation17_spill] sm:$0xff] %v5211_v61  ;;  %v5218_v5 = vpack.c.bf16 %v880_v63, %v876_v62  ;;  %v5220_v6 = vpack.c.bf16 %v887_v1, %v883_v0  ;;  %v882_v7 = vld [vmem:[#allocation6 + $0x100] sm:$0xff]  ;;  %v884_v9 = vld [vmem:[#allocation6 + $0x110] sm:$0xff]  ;;  %v5223_v10 = vpack.c.bf16 %v889_v3, %v885_v2 }
 0x1f6   : > { %3109 = vmatpush1.bf16.msra.mxu0 %v5202_v52  ;;  %6378 = vst [vmem:[#allocation18_spill] sm:$0xff] %v5214_v4  ;;  %v886_v8 = vld [vmem:[#allocation6 + $0x120] sm:$0xff]  ;;  %v888_v11 = vld [vmem:[#allocation6 + $0x130] sm:$0xff]  ;;  %v891_v12 = vld [vmem:[#allocation6 + $0x148] sm:$0xff] }
 0x1f7   : > { %3237 = vmatpush1.bf16.msra.mxu1 %v5206_v56  ;;  %3111 = vmatprep.subr.bf16.mxu0 %v5208_v57  ;;  %6379 = vst [vmem:[#allocation19_spill] sm:$0xff] %v5218_v5  ;;  %6380 = vst [vmem:[#allocation20_spill] sm:$0xff] %v5220_v6  ;;  %v895_v13 = vld [vmem:[#allocation6 + $0x168] sm:$0xff]  ;;  %v893_v14 = vld [vmem:[#allocation6 + $0x158] sm:$0xff]  ;;  %v5226_v16 = vpack.c.bf16 %v886_v8, %v882_v7  ;;  %v5230_v17 = vpack.c.bf16 %v888_v11, %v884_v9 }
 0x1f8   : > { %3239 = vmatprep.subr.bf16.mxu1 %v5211_v61  ;;  %6381 = vst [vmem:[#allocation21_spill] sm:$0xff] %v5223_v10  ;;  %v897_v15 = vld [vmem:[#allocation6 + $0x178] sm:$0xff]  ;;  %v5232_v18 = vpack.c.bf16 %v895_v13, %v891_v12  ;;  %v890_v19 = vld [vmem:[#allocation6 + $0x140] sm:$0xff]  ;;  %v892_v22 = vld [vmem:[#allocation6 + $0x150] sm:$0xff] }
 0x1f9   : > { %6382 = vst [vmem:[#allocation22_spill] sm:$0xff] %v5226_v16  ;;  %6383 = vst [vmem:[#allocation23_spill] sm:$0xff] %v5230_v17  ;;  %v894_v21 = vld [vmem:[#allocation6 + $0x160] sm:$0xff]  ;;  %v5235_v23 = vpack.c.bf16 %v897_v15, %v893_v14  ;;  %v896_v27 = vld [vmem:[#allocation6 + $0x170] sm:$0xff] }
 0x1fa   : > { %3113 = vmatpush1.bf16.msra.mxu0 %v5214_v4  ;;  %6384 = vst [vmem:[#allocation24_spill] sm:$0xff] %v5232_v18  ;;  %v899_v28 = vld [vmem:[#allocation6 + $0x188] sm:$0xff]  ;;  %v901_v31 = vld [vmem:[#allocation6 + $0x198] sm:$0xff]  ;;  %v5238_v33 = vpack.c.bf16 %v894_v21, %v890_v19  ;;  %v5242_v36 = vpack.c.bf16 %v896_v27, %v892_v22  ;;  %v898_v38 = vld [vmem:[#allocation6 + $0x180] sm:$0xff] }
 0x1fb   : > { %3241 = vmatpush1.bf16.msra.mxu1 %v5218_v5  ;;  %3115 = vmatprep.subr.bf16.mxu0 %v5220_v6  ;;  %6385 = vst [vmem:[#allocation25_spill] sm:$0xff] %v5235_v23  ;;  %v903_v29 = vld [vmem:[#allocation6 + $0x1a8] sm:$0xff]  ;;  %v905_v32 = vld [vmem:[#allocation6 + $0x1b8] sm:$0xff]  ;;  %v902_v40 = vld [vmem:[#allocation6 + $0x1a0] sm:$0xff] }
 0x1fc   : > { %3243 = vmatprep.subr.bf16.mxu1 %v5223_v10  ;;  %6386 = vst [vmem:[#allocation26_spill] sm:$0xff] %v5238_v33  ;;  %6387 = vst [vmem:[#allocation27_spill] sm:$0xff] %v5242_v36  ;;  %v5244_v37 = vpack.c.bf16 %v903_v29, %v899_v28  ;;  %v900_v41 = vld [vmem:[#allocation6 + $0x190] sm:$0xff]  ;;  %v5247_v42 = vpack.c.bf16 %v905_v32, %v901_v31  ;;  %v907_v46 = vld [vmem:[#allocation6 + $0x1c8] sm:$0xff]  ;;  %v5250_v51 = vpack.c.bf16 %v902_v40, %v898_v38 }
 0x1fd   : > { %v904_v45 = vld [vmem:[#allocation6 + $0x1b0] sm:$0xff]  ;;  %v911_v47 = vld [vmem:[#allocation6 + $0x1e8] sm:$0xff]  ;;  %v909_v49 = vld [vmem:[#allocation6 + $0x1d8] sm:$0xff] }
 0x1fe   : > { %3117 = vmatpush1.bf16.msra.mxu0 %v5226_v16  ;;  %6388 = vst [vmem:[#allocation28_spill] sm:$0xff] %v5244_v37  ;;  %6389 = vst [vmem:[#allocation29_spill] sm:$0xff] %v5247_v42  ;;  %v913_v50 = vld [vmem:[#allocation6 + $0x1f8] sm:$0xff]  ;;  %v5254_v53 = vpack.c.bf16 %v904_v45, %v900_v41  ;;  %v5256_v54 = vpack.c.bf16 %v911_v47, %v907_v46  ;;  %v906_v55 = vld [vmem:[#allocation6 + $0x1c0] sm:$0xff] }
 0x1ff   : > { %3245 = vmatpush1.bf16.msra.mxu1 %v5230_v17  ;;  %3119 = vmatprep.subr.bf16.mxu0 %v5232_v18  ;;  %6390 = vst [vmem:[#allocation30_spill] sm:$0xff] %v5250_v51  ;;  %v910_v58 = vld [vmem:[#allocation6 + $0x1e0] sm:$0xff]  ;;  %v908_v59 = vld [vmem:[#allocation6 + $0x1d0] sm:$0xff]  ;;  %v5259_v60 = vpack.c.bf16 %v913_v50, %v909_v49  ;;  %v915_v63 = vld [vmem:[#allocation6 + $0x208] sm:$0xff] }
 0x200   : > { %3247 = vmatprep.subr.bf16.mxu1 %v5235_v23  ;;  %6391 = vst [vmem:[#allocation31_spill] sm:$0xff] %v5254_v53  ;;  %6392 = vst [vmem:[#allocation32_spill] sm:$0xff] %v5256_v54  ;;  %v912_v62 = vld [vmem:[#allocation6 + $0x1f0] sm:$0xff]  ;;  %v919_v0 = vld [vmem:[#allocation6 + $0x228] sm:$0xff]  ;;  %v5262_v3 = vpack.c.bf16 %v910_v58, %v906_v55 }
 0x201   : > { %6393 = vst [vmem:[#allocation33_spill] sm:$0xff] %v5259_v60  ;;  %v917_v1 = vld [vmem:[#allocation6 + $0x218] sm:$0xff]  ;;  %v5266_v7 = vpack.c.bf16 %v912_v62, %v908_v59  ;;  %v5268_v8 = vpack.c.bf16 %v919_v0, %v915_v63  ;;  %v914_v9 = vld [vmem:[#allocation6 + $0x200] sm:$0xff]  ;;  %v916_v12 = vld [vmem:[#allocation6 + $0x210] sm:$0xff] }
 0x202   : > { %3121 = vmatpush1.bf16.msra.mxu0 %v5238_v33  ;;  %v921_v2 = vld [vmem:[#allocation6 + $0x238] sm:$0xff]  ;;  %6394 = vst [vmem:[#allocation34_spill] sm:$0xff] %v5262_v3  ;;  %v918_v11 = vld [vmem:[#allocation6 + $0x220] sm:$0xff]  ;;  %v920_v14 = vld [vmem:[#allocation6 + $0x230] sm:$0xff] }
 0x203   : > { %3249 = vmatpush1.bf16.msra.mxu1 %v5242_v36  ;;  %3123 = vmatprep.subr.bf16.mxu0 %v5244_v37  ;;  %6395 = vst [vmem:[#allocation35_spill] sm:$0xff] %v5266_v7  ;;  %6396 = vst [vmem:[#allocation36_spill] sm:$0xff] %v5268_v8  ;;  %v5271_v13 = vpack.c.bf16 %v921_v2, %v917_v1  ;;  %v923_v15 = vld [vmem:[#allocation6 + $0x248] sm:$0xff]  ;;  %v925_v21 = vld [vmem:[#allocation6 + $0x258] sm:$0xff]  ;;  %v5274_v27 = vpack.c.bf16 %v918_v11, %v914_v9 }
 0x204   : > { %3251 = vmatprep.subr.bf16.mxu1 %v5247_v42  ;;  %v927_v19 = vld [vmem:[#allocation6 + $0x268] sm:$0xff]  ;;  %v929_v22 = vld [vmem:[#allocation6 + $0x278] sm:$0xff]  ;;  %v5278_v28 = vpack.c.bf16 %v920_v14, %v916_v12  ;;  %v922_v31 = vld [vmem:[#allocation6 + $0x240] sm:$0xff] }
 0x205   : > { %6397 = vst [vmem:[#allocation37_spill] sm:$0xff] %v5271_v13  ;;  %6398 = vst [vmem:[#allocation38_spill] sm:$0xff] %v5274_v27  ;;  %v5280_v29 = vpack.c.bf16 %v927_v19, %v923_v15  ;;  %v926_v32 = vld [vmem:[#allocation6 + $0x260] sm:$0xff]  ;;  %v924_v38 = vld [vmem:[#allocation6 + $0x250] sm:$0xff]  ;;  %v5283_v40 = vpack.c.bf16 %v929_v22, %v925_v21 }
 0x206   : > { %3125 = vmatpush1.bf16.msra.mxu0 %v5250_v51  ;;  %6399 = vst [vmem:[#allocation39_spill] sm:$0xff] %v5278_v28  ;;  %v928_v41 = vld [vmem:[#allocation6 + $0x270] sm:$0xff]  ;;  %v931_v45 = vld [vmem:[#allocation6 + $0x288] sm:$0xff]  ;;  %v933_v47 = vld [vmem:[#allocation6 + $0x298] sm:$0xff]  ;;  %v5286_v50 = vpack.c.bf16 %v926_v32, %v922_v31 }
 0x207   : > { %3253 = vmatpush1.bf16.msra.mxu1 %v5254_v53  ;;  %3127 = vmatprep.subr.bf16.mxu0 %v5256_v54  ;;  %6400 = vst [vmem:[#allocation40_spill] sm:$0xff] %v5280_v29  ;;  %6401 = vst [vmem:[#allocation41_spill] sm:$0xff] %v5283_v40  ;;  %v935_v46 = vld [vmem:[#allocation6 + $0x2a8] sm:$0xff]  ;;  %v937_v49 = vld [vmem:[#allocation6 + $0x2b8] sm:$0xff]  ;;  %v5290_v55 = vpack.c.bf16 %v928_v41, %v924_v38 }
 0x208   : > { %3255 = vmatprep.subr.bf16.mxu1 %v5259_v60  ;;  %6402 = vst [vmem:[#allocation42_spill] sm:$0xff] %v5286_v50  ;;  %v5292_v58 = vpack.c.bf16 %v935_v46, %v931_v45  ;;  %v930_v59 = vld [vmem:[#allocation6 + $0x280] sm:$0xff]  ;;  %v932_v63 = vld [vmem:[#allocation6 + $0x290] sm:$0xff]  ;;  %v5295_v0 = vpack.c.bf16 %v937_v49, %v933_v47  ;;  %v939_v2 = vld [vmem:[#allocation6 + $0x2c8] sm:$0xff] }
 0x209   : > { %6403 = vst [vmem:[#allocation43_spill] sm:$0xff] %v5290_v55  ;;  %v934_v62 = vld [vmem:[#allocation6 + $0x2a0] sm:$0xff]  ;;  %v936_v1 = vld [vmem:[#allocation6 + $0x2b0] sm:$0xff]  ;;  %v943_v9 = vld [vmem:[#allocation6 + $0x2e8] sm:$0xff] }
 0x20a   : > { %3129 = vmatpush1.bf16.msra.mxu0 %v5262_v3  ;;  %6404 = vst [vmem:[#allocation44_spill] sm:$0xff] %v5292_v58  ;;  %6405 = vst [vmem:[#allocation45_spill] sm:$0xff] %v5295_v0  ;;  %v941_v11 = vld [vmem:[#allocation6 + $0x2d8] sm:$0xff]  ;;  %v5298_v14 = vpack.c.bf16 %v934_v62, %v930_v59  ;;  %v5302_v15 = vpack.c.bf16 %v936_v1, %v932_v63  ;;  %v5304_v19 = vpack.c.bf16 %v943_v9, %v939_v2  ;;  %v938_v21 = vld [vmem:[#allocation6 + $0x2c0] sm:$0xff] }
 0x20b   : > { %3257 = vmatpush1.bf16.msra.mxu1 %v5266_v7  ;;  %3131 = vmatprep.subr.bf16.mxu0 %v5268_v8  ;;  %v945_v12 = vld [vmem:[#allocation6 + $0x2f8] sm:$0xff]  ;;  %v942_v22 = vld [vmem:[#allocation6 + $0x2e0] sm:$0xff]  ;;  %v940_v31 = vld [vmem:[#allocation6 + $0x2d0] sm:$0xff] }
 0x20c   : > { %3259 = vmatprep.subr.bf16.mxu1 %v5271_v13  ;;  %6406 = vst [vmem:[#allocation46_spill] sm:$0xff] %v5298_v14  ;;  %6407 = vst [vmem:[#allocation47_spill] sm:$0xff] %v5302_v15  ;;  %v5307_v32 = vpack.c.bf16 %v945_v12, %v941_v11  ;;  %v944_v38 = vld [vmem:[#allocation6 + $0x2f0] sm:$0xff]  ;;  %v947_v41 = vld [vmem:[#allocation6 + $0x308] sm:$0xff]  ;;  %v5310_v49 = vpack.c.bf16 %v942_v22, %v938_v21 }
 0x20d   : > { %6408 = vst [vmem:[#allocation48_spill] sm:$0xff] %v5304_v19  ;;  %v951_v45 = vld [vmem:[#allocation6 + $0x328] sm:$0xff]  ;;  %v949_v46 = vld [vmem:[#allocation6 + $0x318] sm:$0xff]  ;;  %v5314_v59 = vpack.c.bf16 %v944_v38, %v940_v31  ;;  %v946_v63 = vld [vmem:[#allocation6 + $0x300] sm:$0xff] }
 0x20e   : > { %3133 = vmatpush1.bf16.msra.mxu0 %v5274_v27  ;;  %6409 = vst [vmem:[#allocation49_spill] sm:$0xff] %v5307_v32  ;;  %v953_v47 = vld [vmem:[#allocation6 + $0x338] sm:$0xff]  ;;  %6410 = vst [vmem:[#allocation50_spill] sm:$0xff] %v5310_v49  ;;  %v5316_v62 = vpack.c.bf16 %v951_v45, %v947_v41  ;;  %v950_v1 = vld [vmem:[#allocation6 + $0x320] sm:$0xff] }
 0x20f   : > { %3261 = vmatpush1.bf16.msra.mxu1 %v5278_v28  ;;  %3135 = vmatprep.subr.bf16.mxu0 %v5280_v29  ;;  %6411 = vst [vmem:[#allocation51_spill] sm:$0xff] %v5314_v59  ;;  %v948_v2 = vld [vmem:[#allocation6 + $0x310] sm:$0xff]  ;;  %v5319_v9 = vpack.c.bf16 %v953_v47, %v949_v46  ;;  %v955_v12 = vld [vmem:[#allocation6 + $0x348] sm:$0xff]  ;;  %v957_v21 = vld [vmem:[#allocation6 + $0x358] sm:$0xff] }
 0x210   : > { %3263 = vmatprep.subr.bf16.mxu1 %v5283_v40  ;;  %6412 = vst [vmem:[#allocation52_spill] sm:$0xff] %v5316_v62  ;;  %v952_v11 = vld [vmem:[#allocation6 + $0x330] sm:$0xff]  ;;  %v959_v24 = vld [vmem:[#allocation6 + $0x368] sm:$0xff]  ;;  %v961_v22 = vld [vmem:[#allocation6 + $0x378] sm:$0xff] }
 0x211   : > { %6413 = vst [vmem:[#allocation53_spill] sm:$0xff] %v5319_v9  ;;  %v5326_v31 = vpack.c.bf16 %v952_v11, %v948_v2  ;;  %v5328_v38 = vpack.c.bf16 %v959_v24, %v955_v12  ;;  %v954_v41 = vld [vmem:[#allocation6 + $0x340] sm:$0xff]  ;;  %v956_v46 = vld [vmem:[#allocation6 + $0x350] sm:$0xff]  ;;  %v5331_v47 = vpack.c.bf16 %v961_v22, %v957_v21 }
 0x212   : > { %3137 = vmatpush1.bf16.msra.mxu0 %v5286_v50  ;;  %v958_v45 = vld [vmem:[#allocation6 + $0x360] sm:$0xff]  ;;  %v964_v21 = vld [vmem:[#allocation6 + $0x390] sm:$0xff] }
 0x213   : > { %3265 = vmatpush1.bf16.msra.mxu1 %v5290_v55  ;;  %3139 = vmatprep.subr.bf16.mxu0 %v5292_v58  ;;  %6415 = vst [vmem:[#allocation55_spill] sm:$0xff] %v5326_v31  ;;  %6416 = vst [vmem:[#allocation56_spill] sm:$0xff] %v5328_v38  ;;  %v962_v11 = vld [vmem:[#allocation6 + $0x380] sm:$0xff] }
 0x214   : > { %3267 = vmatprep.subr.bf16.mxu1 %v5295_v0  ;;  %6417 = vst [vmem:[#allocation57_spill] sm:$0xff] %v5331_v47  ;;  %v966_v12 = vld [vmem:[#allocation6 + $0x3a0] sm:$0xff] }
 0x216   : > { %3141 = vmatpush1.bf16.msra.mxu0 %v5298_v14  ;;  %v1007_v14 = vld [vmem:[#allocation6 + $0x4e8] sm:$0xff] }
 0x217   : > { %3269 = vmatpush1.bf16.msra.mxu1 %v5302_v15  ;;  %3143 = vmatprep.subr.bf16.mxu0 %v5304_v19  ;;  %v5322_v15 = vpack.c.bf16 %v950_v1, %v946_v63  ;;  %v963_v19 = vld [vmem:[#allocation6 + $0x388] sm:$0xff]  ;;  %v965_v63 = vld [vmem:[#allocation6 + $0x398] sm:$0xff] }
 0x218   : > { %3271 = vmatprep.subr.bf16.mxu1 %v5307_v32  ;;  %v960_v32 = vld [vmem:[#allocation6 + $0x370] sm:$0xff]  ;;  %v969_v1 = vld [vmem:[#allocation6 + $0x3b8] sm:$0xff] }
 0x219   : > { %6414 = vst [vmem:[#allocation54_spill] sm:$0xff] %v5322_v15  ;;  %v5338_v24 = vpack.c.bf16 %v960_v32, %v956_v46  ;;  %v5343_v22 = vpack.c.bf16 %v969_v1, %v965_v63  ;;  %v974_v46 = vld [vmem:[#allocation6 + $0x3e0] sm:$0xff]  ;;  %v972_v63 = vld [vmem:[#allocation6 + $0x3d0] sm:$0xff] }
 0x21a   : > { %3145 = vmatpush1.bf16.msra.mxu0 %v5310_v49  ;;  %v967_v49 = vld [vmem:[#allocation6 + $0x3a8] sm:$0xff] }
 0x21b   : > { %3273 = vmatpush1.bf16.msra.mxu1 %v5314_v59  ;;  %3147 = vmatprep.subr.bf16.mxu0 %v5316_v62  ;;  %v5334_v59 = vpack.c.bf16 %v958_v45, %v954_v41  ;;  %6419 = vst [vmem:[#allocation59_spill] sm:$0xff] %v5338_v24  ;;  %v5340_v2 = vpack.c.bf16 %v967_v49, %v963_v19  ;;  %6421 = vst [vmem:[#allocation61_spill] sm:$0xff] %v5343_v22  ;;  %v971_v62 = vld [vmem:[#allocation6 + $0x3c8] sm:$0xff]  ;;  %v973_v41 = vld [vmem:[#allocation6 + $0x3d8] sm:$0xff] }
 0x21c   : > { %3275 = vmatprep.subr.bf16.mxu1 %v5319_v9  ;;  %v968_v9 = vld [vmem:[#allocation6 + $0x3b0] sm:$0xff]  ;;  %v977_v45 = vld [vmem:[#allocation6 + $0x3f8] sm:$0xff]  ;;  %v970_v49 = vld [vmem:[#allocation6 + $0x3c0] sm:$0xff] }
 0x21d   : > { %6418 = vst [vmem:[#allocation58_spill] sm:$0xff] %v5334_v59  ;;  %6420 = vst [vmem:[#allocation60_spill] sm:$0xff] %v5340_v2  ;;  %v5350_v19 = vpack.c.bf16 %v968_v9, %v964_v21  ;;  %v5355_v1 = vpack.c.bf16 %v977_v45, %v973_v41  ;;  %v978_v9 = vld [vmem:[#allocation6 + $0x400] sm:$0xff]  ;;  %v980_v41 = vld [vmem:[#allocation6 + $0x410] sm:$0xff] }
 0x21e   : > { %3149 = vmatpush1.bf16.msra.mxu0 %v5322_v15  ;;  %v975_v15 = vld [vmem:[#allocation6 + $0x3e8] sm:$0xff]  ;;  %v982_v21 = vld [vmem:[#allocation6 + $0x420] sm:$0xff] }
 0x21f   : > { %3277 = vmatpush1.bf16.msra.mxu1 %v5326_v31  ;;  %3151 = vmatprep.subr.bf16.mxu0 %v5328_v38  ;;  %v5346_v31 = vpack.c.bf16 %v966_v12, %v962_v11  ;;  %6423 = vst [vmem:[#allocation63_spill] sm:$0xff] %v5350_v19  ;;  %v5352_v32 = vpack.c.bf16 %v975_v15, %v971_v62  ;;  %6425 = vst [vmem:[#allocation65_spill] sm:$0xff] %v5355_v1  ;;  %v979_v38 = vld [vmem:[#allocation6 + $0x408] sm:$0xff]  ;;  %v981_v11 = vld [vmem:[#allocation6 + $0x418] sm:$0xff] }
 0x220   : > { %3279 = vmatprep.subr.bf16.mxu1 %v5331_v47  ;;  %v976_v47 = vld [vmem:[#allocation6 + $0x3f0] sm:$0xff]  ;;  %v985_v12 = vld [vmem:[#allocation6 + $0x438] sm:$0xff] }
 0x221   : > { %6422 = vst [vmem:[#allocation62_spill] sm:$0xff] %v5346_v31  ;;  %6424 = vst [vmem:[#allocation64_spill] sm:$0xff] %v5352_v32  ;;  %v5362_v15 = vpack.c.bf16 %v976_v47, %v972_v63  ;;  %v5367_v45 = vpack.c.bf16 %v985_v12, %v981_v11  ;;  %v986_v47 = vld [vmem:[#allocation6 + $0x440] sm:$0xff]  ;;  %v988_v11 = vld [vmem:[#allocation6 + $0x450] sm:$0xff] }
 0x222   : > { %3153 = vmatpush1.bf16.msra.mxu0 %v5334_v59  ;;  %v983_v59 = vld [vmem:[#allocation6 + $0x428] sm:$0xff]  ;;  %v990_v63 = vld [vmem:[#allocation6 + $0x460] sm:$0xff] }
 0x223   : > { %3281 = vmatpush1.bf16.msra.mxu1 %v5338_v24  ;;  %3155 = vmatprep.subr.bf16.mxu0 %v5340_v2  ;;  %v5358_v24 = vpack.c.bf16 %v974_v46, %v970_v49  ;;  %6427 = vst [vmem:[#allocation67_spill] sm:$0xff] %v5362_v15  ;;  %v5364_v62 = vpack.c.bf16 %v983_v59, %v979_v38  ;;  %6429 = vst [vmem:[#allocation69_spill] sm:$0xff] %v5367_v45  ;;  %v987_v2 = vld [vmem:[#allocation6 + $0x448] sm:$0xff]  ;;  %v989_v49 = vld [vmem:[#allocation6 + $0x458] sm:$0xff] }
 0x224   : > { %3283 = vmatprep.subr.bf16.mxu1 %v5343_v22  ;;  %v984_v22 = vld [vmem:[#allocation6 + $0x430] sm:$0xff]  ;;  %v993_v46 = vld [vmem:[#allocation6 + $0x478] sm:$0xff] }
 0x225   : > { %6426 = vst [vmem:[#allocation66_spill] sm:$0xff] %v5358_v24  ;;  %6428 = vst [vmem:[#allocation68_spill] sm:$0xff] %v5364_v62  ;;  %v5374_v59 = vpack.c.bf16 %v984_v22, %v980_v41  ;;  %v5379_v12 = vpack.c.bf16 %v993_v46, %v989_v49  ;;  %v994_v41 = vld [vmem:[#allocation6 + $0x480] sm:$0xff]  ;;  %v996_v46 = vld [vmem:[#allocation6 + $0x490] sm:$0xff] }
 0x226   : > { %3157 = vmatpush1.bf16.msra.mxu0 %v5346_v31  ;;  %v991_v31 = vld [vmem:[#allocation6 + $0x468] sm:$0xff]  ;;  %v998_v49 = vld [vmem:[#allocation6 + $0x4a0] sm:$0xff] }
 0x227   : > { %3285 = vmatpush1.bf16.msra.mxu1 %v5350_v19  ;;  %3159 = vmatprep.subr.bf16.mxu0 %v5352_v32  ;;  %v5370_v19 = vpack.c.bf16 %v982_v21, %v978_v9  ;;  %6431 = vst [vmem:[#allocation71_spill] sm:$0xff] %v5374_v59  ;;  %v5376_v38 = vpack.c.bf16 %v991_v31, %v987_v2  ;;  %6433 = vst [vmem:[#allocation73_spill] sm:$0xff] %v5379_v12  ;;  %v995_v32 = vld [vmem:[#allocation6 + $0x488] sm:$0xff]  ;;  %v6434_v9 = vmov 0.0   ;;  %v997_v21 = vld [vmem:[#allocation6 + $0x498] sm:$0xff] }
 0x228   : > { %3287 = vmatprep.subr.bf16.mxu1 %v5355_v1  ;;  %v992_v1 = vld [vmem:[#allocation6 + $0x470] sm:$0xff]  ;;  %v5384_v31 = vpack.c.bf16 %v990_v63, %v986_v47  ;;  %v1005_v47 = vld [vmem:[#allocation6 + $0x4d8] sm:$0xff] }
 0x229   : > { %6430 = vst [vmem:[#allocation70_spill] sm:$0xff] %v5370_v19  ;;  %6432 = vst [vmem:[#allocation72_spill] sm:$0xff] %v5376_v38  ;;  %v5388_v2 = vpack.c.bf16 %v992_v1, %v988_v11  ;;  %v1009_v63 = vld [vmem:[#allocation6 + $0x4f8] sm:$0xff]  ;;  %v1006_v11 = vld [vmem:[#allocation6 + $0x4e0] sm:$0xff] }
 0x22a   : > { %3161 = vmatpush1.bf16.msra.mxu0 %v5358_v24  ;;  %v999_v24 = vld [vmem:[#allocation6 + $0x4a8] sm:$0xff]  ;;  %6435 = vst [vmem:[#allocation74_spill] sm:$0xff] %v5384_v31 }
 0x22b   : > { %3289 = vmatpush1.bf16.msra.mxu1 %v5362_v15  ;;  %3163 = vmatprep.subr.bf16.mxu0 %v5364_v62  ;;  %v1001_v15 = vld [vmem:[#allocation6 + $0x4b8] sm:$0xff]  ;;  %6436 = vst [vmem:[#allocation75_spill] sm:$0xff] %v5388_v2  ;;  %v5390_v22 = vpack.c.bf16 %v999_v24, %v995_v32  ;;  %v1003_v62 = vld [vmem:[#allocation6 + $0x4c8] sm:$0xff]  ;;  %v5398_v24 = vpack.c.bf16 %v998_v49, %v994_v41 }
 0x22c   : > { %3291 = vmatprep.subr.bf16.mxu1 %v5367_v45  ;;  %v5393_v45 = vpack.c.bf16 %v1001_v15, %v997_v21  ;;  %v5404_v1 = vpack.c.bf16 %v1007_v14, %v1003_v62  ;;  %v1002_v15 = vld [vmem:[#allocation6 + $0x4c0] sm:$0xff]  ;;  %v1004_v21 = vld [vmem:[#allocation6 + $0x4d0] sm:$0xff]  ;;  %v1013_v41 = vld [vmem:[#allocation6 + $0x518] sm:$0xff] }
 0x22d   : > { %1171 = vmatmul.mubr.f32.vlgmr.msra.gmra.mrb[0].mxu0 %v6434_v9  ;;  %6437 = vst [vmem:[#allocation76_spill] sm:$0xff] %v5390_v22  ;;  %6439 = vst [vmem:[#allocation78_spill] sm:$0xff] %v5398_v24  ;;  %v1017_v49 = vld [vmem:[#allocation6 + $0x538] sm:$0xff]  ;;  %v1010_v62 = vld [vmem:[#allocation6 + $0x500] sm:$0xff] }
 0x22e   : > { %3165 = vmatpush1.bf16.msra.mxu0 %v5370_v19  ;;  %1313 = vmatmul.mubr.f32.vlgmr.msra.gmra.mrb[0].mxu1 %v6434_v9  ;;  %6438 = vst [vmem:[#allocation77_spill] sm:$0xff] %v5393_v45  ;;  %v1000_v19 = vld [vmem:[#allocation6 + $0x4b0] sm:$0xff]  ;;  %6441 = vst [vmem:[#allocation80_spill] sm:$0xff] %v5404_v1 }
 0x22f   : > { %3293 = vmatpush1.bf16.msra.mxu1 %v5374_v59  ;;  %3167 = vmatprep.subr.bf16.mxu0 %v5376_v38  ;;  %v5402_v32 = vpack.c.bf16 %v1000_v19, %v996_v46  ;;  %v1008_v38 = vld [vmem:[#allocation6 + $0x4f0] sm:$0xff]  ;;  %v1011_v59 = vld [vmem:[#allocation6 + $0x508] sm:$0xff]  ;;  %v1014_v46 = vld [vmem:[#allocation6 + $0x520] sm:$0xff] }
 0x230   : > { %3295 = vmatprep.subr.bf16.mxu1 %v5379_v12  ;;  %1241 = vmatprep.mubr.f32.mxu0 %v6434_v9  ;;  %v5407_v12 = vpack.c.bf16 %v1009_v63, %v1005_v47  ;;  %v5414_v14 = vpack.c.bf16 %v1008_v38, %v1004_v21  ;;  %v1012_v47 = vld [vmem:[#allocation6 + $0x510] sm:$0xff]  ;;  %v5419_v63 = vpack.c.bf16 %v1017_v49, %v1013_v41  ;;  %v1022_v21 = vld [vmem:[#allocation6 + $0x560] sm:$0xff] }
 0x231   : > { %1383 = vmatprep.mubr.f32.mxu1 %v6434_v9  ;;  %6440 = vst [vmem:[#allocation79_spill] sm:$0xff] %v5402_v32  ;;  %v1020_v41 = vld [vmem:[#allocation6 + $0x550] sm:$0xff] }
 0x232   : > { %3169 = vmatpush1.bf16.msra.mxu0 %v5384_v31  ;;  %6442 = vst [vmem:[#allocation81_spill] sm:$0xff] %v5407_v12  ;;  %v1015_v31 = vld [vmem:[#allocation6 + $0x528] sm:$0xff]  ;;  %6444 = vst [vmem:[#allocation83_spill] sm:$0xff] %v5414_v14 }
 0x233   : > { %3297 = vmatpush1.bf16.msra.mxu1 %v5388_v2  ;;  %3171 = vmatprep.subr.bf16.mxu0 %v5390_v22  ;;  %v5410_v2 = vpack.c.bf16 %v1006_v11, %v1002_v15  ;;  %v5416_v19 = vpack.c.bf16 %v1015_v31, %v1011_v59  ;;  %6446 = vst [vmem:[#allocation85_spill] sm:$0xff] %v5419_v63  ;;  %v1019_v22 = vld [vmem:[#allocation6 + $0x548] sm:$0xff]  ;;  %v1021_v15 = vld [vmem:[#allocation6 + $0x558] sm:$0xff]  ;;  %v1018_v31 = vld [vmem:[#allocation6 + $0x540] sm:$0xff] }
 0x234   : > { %3299 = vmatprep.subr.bf16.mxu1 %v5393_v45  ;;  %v1016_v45 = vld [vmem:[#allocation6 + $0x530] sm:$0xff]  ;;  %v1025_v11 = vld [vmem:[#allocation6 + $0x578] sm:$0xff] }
 0x235   : > { %6443 = vst [vmem:[#allocation82_spill] sm:$0xff] %v5410_v2  ;;  %6445 = vst [vmem:[#allocation84_spill] sm:$0xff] %v5416_v19  ;;  %v5426_v59 = vpack.c.bf16 %v1016_v45, %v1012_v47  ;;  %v5431_v49 = vpack.c.bf16 %v1025_v11, %v1021_v15  ;;  %v1030_v47 = vld [vmem:[#allocation6 + $0x5a0] sm:$0xff]  ;;  %v1028_v15 = vld [vmem:[#allocation6 + $0x590] sm:$0xff] }
 0x236   : > { %3173 = vmatpush1.bf16.msra.mxu0 %v5398_v24  ;;  %v1023_v24 = vld [vmem:[#allocation6 + $0x568] sm:$0xff] }
 0x237   : > { %3301 = vmatpush1.bf16.msra.mxu1 %v5402_v32  ;;  %3175 = vmatprep.subr.bf16.mxu0 %v5404_v1  ;;  %v5422_v32 = vpack.c.bf16 %v1014_v46, %v1010_v62  ;;  %6448 = vst [vmem:[#allocation87_spill] sm:$0xff] %v5426_v59  ;;  %v5428_v38 = vpack.c.bf16 %v1023_v24, %v1019_v22  ;;  %6450 = vst [vmem:[#allocation89_spill] sm:$0xff] %v5431_v49  ;;  %v1027_v1 = vld [vmem:[#allocation6 + $0x588] sm:$0xff]  ;;  %v1029_v62 = vld [vmem:[#allocation6 + $0x598] sm:$0xff] }
 0x238   : > { %3303 = vmatprep.subr.bf16.mxu1 %v5407_v12  ;;  %v1024_v12 = vld [vmem:[#allocation6 + $0x570] sm:$0xff]  ;;  %v1033_v46 = vld [vmem:[#allocation6 + $0x5b8] sm:$0xff]  ;;  %v1026_v24 = vld [vmem:[#allocation6 + $0x580] sm:$0xff] }
 0x239   : > { %6447 = vst [vmem:[#allocation86_spill] sm:$0xff] %v5422_v32  ;;  %6449 = vst [vmem:[#allocation88_spill] sm:$0xff] %v5428_v38  ;;  %v5438_v45 = vpack.c.bf16 %v1024_v12, %v1020_v41  ;;  %v5443_v11 = vpack.c.bf16 %v1033_v46, %v1029_v62  ;;  %v1038_v41 = vld [vmem:[#allocation6 + $0x5e0] sm:$0xff]  ;;  %v1036_v62 = vld [vmem:[#allocation6 + $0x5d0] sm:$0xff] }
 0x23a   : > { %3177 = vmatpush1.bf16.msra.mxu0 %v5410_v2  ;;  %v1031_v2 = vld [vmem:[#allocation6 + $0x5a8] sm:$0xff] }
 0x23b   : > { %3305 = vmatpush1.bf16.msra.mxu1 %v5414_v14  ;;  %3179 = vmatprep.subr.bf16.mxu0 %v5416_v19  ;;  %v5434_v14 = vpack.c.bf16 %v1022_v21, %v1018_v31  ;;  %6452 = vst [vmem:[#allocation91_spill] sm:$0xff] %v5438_v45  ;;  %v5440_v22 = vpack.c.bf16 %v1031_v2, %v1027_v1  ;;  %6454 = vst [vmem:[#allocation93_spill] sm:$0xff] %v5443_v11  ;;  %v1035_v19 = vld [vmem:[#allocation6 + $0x5c8] sm:$0xff]  ;;  %v1037_v31 = vld [vmem:[#allocation6 + $0x5d8] sm:$0xff] }
 0x23c   : > { %3307 = vmatprep.subr.bf16.mxu1 %v5419_v63  ;;  %v1032_v63 = vld [vmem:[#allocation6 + $0x5b0] sm:$0xff]  ;;  %v1041_v21 = vld [vmem:[#allocation6 + $0x5f8] sm:$0xff]  ;;  %v1034_v1 = vld [vmem:[#allocation6 + $0x5c0] sm:$0xff] }
 0x23d   : > { %6451 = vst [vmem:[#allocation90_spill] sm:$0xff] %v5434_v14  ;;  %6453 = vst [vmem:[#allocation92_spill] sm:$0xff] %v5440_v22  ;;  %v5450_v12 = vpack.c.bf16 %v1032_v63, %v1028_v15  ;;  %v5455_v46 = vpack.c.bf16 %v1041_v21, %v1037_v31  ;;  %v1042_v63 = vld [vmem:[#allocation6 + $0x600] sm:$0xff]  ;;  %v1044_v31 = vld [vmem:[#allocation6 + $0x610] sm:$0xff] }
 0x23e   : > { %3181 = vmatpush1.bf16.msra.mxu0 %v5422_v32  ;;  %v1039_v32 = vld [vmem:[#allocation6 + $0x5e8] sm:$0xff]  ;;  %v1046_v15 = vld [vmem:[#allocation6 + $0x620] sm:$0xff] }
 0x23f   : > { %3309 = vmatpush1.bf16.msra.mxu1 %v5426_v59  ;;  %3183 = vmatprep.subr.bf16.mxu0 %v5428_v38  ;;  %v5446_v59 = vpack.c.bf16 %v1030_v47, %v1026_v24  ;;  %6456 = vst [vmem:[#allocation95_spill] sm:$0xff] %v5450_v12  ;;  %v5452_v2 = vpack.c.bf16 %v1039_v32, %v1035_v19  ;;  %6458 = vst [vmem:[#allocation97_spill] sm:$0xff] %v5455_v46  ;;  %v1043_v38 = vld [vmem:[#allocation6 + $0x608] sm:$0xff]  ;;  %v1045_v24 = vld [vmem:[#allocation6 + $0x618] sm:$0xff] }
 0x240   : > { %3311 = vmatprep.subr.bf16.mxu1 %v5431_v49  ;;  %v1040_v49 = vld [vmem:[#allocation6 + $0x5f0] sm:$0xff]  ;;  %v1049_v47 = vld [vmem:[#allocation6 + $0x638] sm:$0xff] }
 0x241   : > { %6455 = vst [vmem:[#allocation94_spill] sm:$0xff] %v5446_v59  ;;  %6457 = vst [vmem:[#allocation96_spill] sm:$0xff] %v5452_v2  ;;  %v5462_v32 = vpack.c.bf16 %v1040_v49, %v1036_v62  ;;  %v5467_v21 = vpack.c.bf16 %v1049_v47, %v1045_v24  ;;  %v1050_v49 = vld [vmem:[#allocation6 + $0x640] sm:$0xff]  ;;  %v1052_v24 = vld [vmem:[#allocation6 + $0x650] sm:$0xff] }
 0x242   : > { %3185 = vmatpush1.bf16.msra.mxu0 %v5434_v14  ;;  %v1047_v14 = vld [vmem:[#allocation6 + $0x628] sm:$0xff]  ;;  %v1054_v62 = vld [vmem:[#allocation6 + $0x660] sm:$0xff] }
 0x243   : > { %3313 = vmatpush1.bf16.msra.mxu1 %v5438_v45  ;;  %3187 = vmatprep.subr.bf16.mxu0 %v5440_v22  ;;  %v5458_v45 = vpack.c.bf16 %v1038_v41, %v1034_v1  ;;  %6460 = vst [vmem:[#allocation99_spill] sm:$0xff] %v5462_v32  ;;  %v5464_v19 = vpack.c.bf16 %v1047_v14, %v1043_v38  ;;  %6462 = vst [vmem:[#allocation101_spill] sm:$0xff] %v5467_v21  ;;  %v1051_v22 = vld [vmem:[#allocation6 + $0x648] sm:$0xff]  ;;  %v1053_v1 = vld [vmem:[#allocation6 + $0x658] sm:$0xff] }
 0x244   : > { %3315 = vmatprep.subr.bf16.mxu1 %v5443_v11  ;;  %v1048_v11 = vld [vmem:[#allocation6 + $0x630] sm:$0xff]  ;;  %v1057_v41 = vld [vmem:[#allocation6 + $0x678] sm:$0xff] }
 0x245   : > { %6459 = vst [vmem:[#allocation98_spill] sm:$0xff] %v5458_v45  ;;  %6461 = vst [vmem:[#allocation100_spill] sm:$0xff] %v5464_v19  ;;  %v5474_v14 = vpack.c.bf16 %v1048_v11, %v1044_v31  ;;  %v5479_v47 = vpack.c.bf16 %v1057_v41, %v1053_v1  ;;  %v1058_v11 = vld [vmem:[#allocation6 + $0x680] sm:$0xff]  ;;  %v1060_v1 = vld [vmem:[#allocation6 + $0x690] sm:$0xff] }
 0x246   : > { %3189 = vmatpush1.bf16.msra.mxu0 %v5446_v59  ;;  %v1055_v59 = vld [vmem:[#allocation6 + $0x668] sm:$0xff]  ;;  %v1062_v31 = vld [vmem:[#allocation6 + $0x6a0] sm:$0xff] }
 0x247   : > { %3317 = vmatpush1.bf16.msra.mxu1 %v5450_v12  ;;  %3191 = vmatprep.subr.bf16.mxu0 %v5452_v2  ;;  %v5470_v12 = vpack.c.bf16 %v1046_v15, %v1042_v63  ;;  %6464 = vst [vmem:[#allocation103_spill] sm:$0xff] %v5474_v14  ;;  %v5476_v38 = vpack.c.bf16 %v1055_v59, %v1051_v22  ;;  %6466 = vst [vmem:[#allocation105_spill] sm:$0xff] %v5479_v47  ;;  %v1059_v2 = vld [vmem:[#allocation6 + $0x688] sm:$0xff]  ;;  %v1061_v63 = vld [vmem:[#allocation6 + $0x698] sm:$0xff] }
 0x248   : > { %3319 = vmatprep.subr.bf16.mxu1 %v5455_v46  ;;  %v1056_v46 = vld [vmem:[#allocation6 + $0x670] sm:$0xff]  ;;  %v1065_v15 = vld [vmem:[#allocation6 + $0x6b8] sm:$0xff] }
 0x249   : > { %6463 = vst [vmem:[#allocation102_spill] sm:$0xff] %v5470_v12  ;;  %6465 = vst [vmem:[#allocation104_spill] sm:$0xff] %v5476_v38  ;;  %v5486_v59 = vpack.c.bf16 %v1056_v46, %v1052_v24  ;;  %v5491_v41 = vpack.c.bf16 %v1065_v15, %v1061_v63  ;;  %v1066_v46 = vld [vmem:[#allocation6 + $0x6c0] sm:$0xff]  ;;  %v1068_v63 = vld [vmem:[#allocation6 + $0x6d0] sm:$0xff] }
 0x24a   : > { %3193 = vmatpush1.bf16.msra.mxu0 %v5458_v45  ;;  %v1063_v45 = vld [vmem:[#allocation6 + $0x6a8] sm:$0xff]  ;;  %v1070_v24 = vld [vmem:[#allocation6 + $0x6e0] sm:$0xff] }
 0x24b   : > { %3321 = vmatpush1.bf16.msra.mxu1 %v5462_v32  ;;  %3195 = vmatprep.subr.bf16.mxu0 %v5464_v19  ;;  %v5482_v32 = vpack.c.bf16 %v1054_v62, %v1050_v49  ;;  %6468 = vst [vmem:[#allocation107_spill] sm:$0xff] %v5486_v59  ;;  %v5488_v22 = vpack.c.bf16 %v1063_v45, %v1059_v2  ;;  %6470 = vst [vmem:[#allocation109_spill] sm:$0xff] %v5491_v41  ;;  %v1067_v19 = vld [vmem:[#allocation6 + $0x6c8] sm:$0xff]  ;;  %v1069_v49 = vld [vmem:[#allocation6 + $0x6d8] sm:$0xff] }
 0x24c   : > { %3323 = vmatprep.subr.bf16.mxu1 %v5467_v21  ;;  %v1064_v21 = vld [vmem:[#allocation6 + $0x6b0] sm:$0xff]  ;;  %v1073_v62 = vld [vmem:[#allocation6 + $0x6f8] sm:$0xff] }
 0x24d   : > { %6467 = vst [vmem:[#allocation106_spill] sm:$0xff] %v5482_v32  ;;  %6469 = vst [vmem:[#allocation108_spill] sm:$0xff] %v5488_v22  ;;  %v5498_v45 = vpack.c.bf16 %v1064_v21, %v1060_v1  ;;  %v5503_v15 = vpack.c.bf16 %v1073_v62, %v1069_v49  ;;  %v1074_v21 = vld [vmem:[#allocation6 + $0x700] sm:$0xff]  ;;  %v1076_v49 = vld [vmem:[#allocation6 + $0x710] sm:$0xff] }
 0x24e   : > { %3197 = vmatpush1.bf16.msra.mxu0 %v5470_v12  ;;  %v1071_v12 = vld [vmem:[#allocation6 + $0x6e8] sm:$0xff]  ;;  %v1078_v1 = vld [vmem:[#allocation6 + $0x720] sm:$0xff] }
 0x24f   : > { %3325 = vmatpush1.bf16.msra.mxu1 %v5474_v14  ;;  %3199 = vmatprep.subr.bf16.mxu0 %v5476_v38  ;;  %v5494_v14 = vpack.c.bf16 %v1062_v31, %v1058_v11  ;;  %6472 = vst [vmem:[#allocation111_spill] sm:$0xff] %v5498_v45  ;;  %v5500_v2 = vpack.c.bf16 %v1071_v12, %v1067_v19  ;;  %6474 = vst [vmem:[#allocation113_spill] sm:$0xff] %v5503_v15  ;;  %v1075_v38 = vld [vmem:[#allocation6 + $0x708] sm:$0xff]  ;;  %v1077_v11 = vld [vmem:[#allocation6 + $0x718] sm:$0xff] }
 0x250   : > { %3327 = vmatprep.subr.bf16.mxu1 %v5479_v47  ;;  %v1072_v47 = vld [vmem:[#allocation6 + $0x6f0] sm:$0xff]  ;;  %v1081_v31 = vld [vmem:[#allocation6 + $0x738] sm:$0xff] }
 0x251   : > { %6471 = vst [vmem:[#allocation110_spill] sm:$0xff] %v5494_v14  ;;  %6473 = vst [vmem:[#allocation112_spill] sm:$0xff] %v5500_v2  ;;  %v5510_v12 = vpack.c.bf16 %v1072_v47, %v1068_v63  ;;  %v5515_v62 = vpack.c.bf16 %v1081_v31, %v1077_v11  ;;  %v1082_v47 = vld [vmem:[#allocation6 + $0x740] sm:$0xff]  ;;  %v1084_v11 = vld [vmem:[#allocation6 + $0x750] sm:$0xff] }
 0x252   : > { %3201 = vmatpush1.bf16.msra.mxu0 %v5482_v32  ;;  %v1079_v32 = vld [vmem:[#allocation6 + $0x728] sm:$0xff]  ;;  %v1086_v63 = vld [vmem:[#allocation6 + $0x760] sm:$0xff] }
 0x253   : > { %3329 = vmatpush1.bf16.msra.mxu1 %v5486_v59  ;;  %3203 = vmatprep.subr.bf16.mxu0 %v5488_v22  ;;  %v5506_v59 = vpack.c.bf16 %v1070_v24, %v1066_v46  ;;  %6476 = vst [vmem:[#allocation115_spill] sm:$0xff] %v5510_v12  ;;  %v5512_v19 = vpack.c.bf16 %v1079_v32, %v1075_v38  ;;  %6478 = vst [vmem:[#allocation117_spill] sm:$0xff] %v5515_v62  ;;  %v1083_v22 = vld [vmem:[#allocation6 + $0x748] sm:$0xff]  ;;  %v1085_v46 = vld [vmem:[#allocation6 + $0x758] sm:$0xff] }
 0x254   : > { %3331 = vmatprep.subr.bf16.mxu1 %v5491_v41  ;;  %v1080_v41 = vld [vmem:[#allocation6 + $0x730] sm:$0xff]  ;;  %v1089_v24 = vld [vmem:[#allocation6 + $0x778] sm:$0xff] }
 0x255   : > { %6475 = vst [vmem:[#allocation114_spill] sm:$0xff] %v5506_v59  ;;  %6477 = vst [vmem:[#allocation116_spill] sm:$0xff] %v5512_v19  ;;  %v5522_v32 = vpack.c.bf16 %v1080_v41, %v1076_v49  ;;  %v5527_v31 = vpack.c.bf16 %v1089_v24, %v1085_v46  ;;  %v1090_v41 = vld [vmem:[#allocation6 + $0x780] sm:$0xff]  ;;  %v1092_v46 = vld [vmem:[#allocation6 + $0x790] sm:$0xff] }
 0x256   : > { %3205 = vmatpush1.bf16.msra.mxu0 %v5494_v14  ;;  %v1087_v14 = vld [vmem:[#allocation6 + $0x768] sm:$0xff]  ;;  %v1094_v49 = vld [vmem:[#allocation6 + $0x7a0] sm:$0xff] }
 0x257   : > { %3333 = vmatpush1.bf16.msra.mxu1 %v5498_v45  ;;  %3207 = vmatprep.subr.bf16.mxu0 %v5500_v2  ;;  %v5518_v45 = vpack.c.bf16 %v1078_v1, %v1074_v21  ;;  %6480 = vst [vmem:[#allocation119_spill] sm:$0xff] %v5522_v32  ;;  %v5524_v38 = vpack.c.bf16 %v1087_v14, %v1083_v22  ;;  %6481 = vst [vmem:[#allocation120_spill] sm:$0xff] %v5527_v31  ;;  %v1091_v2 = vld [vmem:[#allocation6 + $0x788] sm:$0xff]  ;;  %v1093_v21 = vld [vmem:[#allocation6 + $0x798] sm:$0xff] }
 0x258   : > { %3335 = vmatprep.subr.bf16.mxu1 %v5503_v15  ;;  %v1088_v15 = vld [vmem:[#allocation6 + $0x770] sm:$0xff]  ;;  %v1097_v1 = vld [vmem:[#allocation6 + $0x7b8] sm:$0xff] }
 0x259   : > { %6479 = vst [vmem:[#allocation118_spill] sm:$0xff] %v5518_v45  ;;  %v5534_v14 = vpack.c.bf16 %v1088_v15, %v1084_v11  ;;  %v5539_v24 = vpack.c.bf16 %v1097_v1, %v1093_v21  ;;  %v1098_v15 = vld [vmem:[#allocation6 + $0x7c0] sm:$0xff]  ;;  %v1100_v1 = vld [vmem:[#allocation6 + $0x7d0] sm:$0xff] }
 0x25a   : > { %3209 = vmatpush1.bf16.msra.mxu0 %v5506_v59  ;;  %v1095_v59 = vld [vmem:[#allocation6 + $0x7a8] sm:$0xff]  ;;  %v1102_v11 = vld [vmem:[#allocation6 + $0x7e0] sm:$0xff] }
 0x25b   : > { %3337 = vmatpush1.bf16.msra.mxu1 %v5510_v12  ;;  %3211 = vmatprep.subr.bf16.mxu0 %v5512_v19  ;;  %v5530_v12 = vpack.c.bf16 %v1086_v63, %v1082_v47  ;;  %v5536_v22 = vpack.c.bf16 %v1095_v59, %v1091_v2  ;;  %v1099_v19 = vld [vmem:[#allocation6 + $0x7c8] sm:$0xff]  ;;  %v1101_v47 = vld [vmem:[#allocation6 + $0x7d8] sm:$0xff] }
 0x25c   : > { %3339 = vmatprep.subr.bf16.mxu1 %v5515_v62  ;;  %v1096_v62 = vld [vmem:[#allocation6 + $0x7b0] sm:$0xff]  ;;  %v1105_v63 = vld [vmem:[#allocation6 + $0x7f8] sm:$0xff] }
 0x25d   : > { %v5546_v59 = vpack.c.bf16 %v1096_v62, %v1092_v46  ;;  %v5551_v21 = vpack.c.bf16 %v1105_v63, %v1101_v47  ;;  %v6487_v46 = vld [vmem:[#allocation51_spill] sm:$0xff]  ;;  %v6488_v47 = vld [vmem:[#allocation52_spill] sm:$0xff]  ;;  %v6489_v63 = vld [vmem:[#allocation53_spill] sm:$0xff] }
 0x25e   : > { %3213 = vmatpush1.bf16.msra.mxu0 %v5518_v45  ;;  %v1103_v45 = vld [vmem:[#allocation6 + $0x7e8] sm:$0xff] }
 0x25f   : > { %3341 = vmatpush1.bf16.msra.mxu1 %v5522_v32  ;;  %3215 = vmatprep.subr.bf16.mxu0 %v5524_v38  ;;  %v5542_v32 = vpack.c.bf16 %v1094_v49, %v1090_v41  ;;  %v5548_v2 = vpack.c.bf16 %v1103_v45, %v1099_v19  ;;  %v5554_v41 = vpack.c.bf16 %v1102_v11, %v1098_v15  ;;  %v6483_v45 = vld [vmem:[#allocation47_spill] sm:$0xff]  ;;  %v6484_v19 = vld [vmem:[#allocation48_spill] sm:$0xff]  ;;  %v6486_v49 = vld [vmem:[#allocation50_spill] sm:$0xff] }
 0x260   : > { %3343 = vmatprep.subr.bf16.mxu1 %v5527_v31  ;;  %v1104_v31 = vld [vmem:[#allocation6 + $0x7f0] sm:$0xff]  ;;  %v6490_v15 = vld [vmem:[#allocation54_spill] sm:$0xff]  ;;  %v6491_v11 = vld [vmem:[#allocation55_spill] sm:$0xff] }
 0x261   : > { %v5558_v62 = vpack.c.bf16 %v1104_v31, %v1100_v1  ;;  %v6485_v31 = vld [vmem:[#allocation49_spill] sm:$0xff]  ;;  %v6492_v1 = vld [vmem:[#allocation56_spill] sm:$0xff] }
 0x262   : > { %3217 = vmatpush1.bf16.msra.mxu0 %v5530_v12 }
 0x263   : > { %3345 = vmatpush1.bf16.msra.mxu1 %v5534_v14  ;;  %3219 = vmatprep.subr.bf16.mxu0 %v5536_v22 }
 0x264   : > { %3347 = vmatprep.subr.bf16.mxu1 %v5539_v24 }
 0x266   : > { %3221 = vmatpush1.bf16.msra.mxu0 %v5542_v32 }
 0x267   : > { %3349 = vmatpush1.bf16.msra.mxu1 %v5546_v59  ;;  %3223 = vmatprep.subr.bf16.mxu0 %v5548_v2 }
 0x268   : > { %3351 = vmatprep.subr.bf16.mxu1 %v5551_v21 }
 0x26a   : > { %3225 = vmatpush1.bf16.msra.mxu0 %v5554_v41 }
 0x26b   : > { %3353 = vmatpush1.bf16.msra.mxu1 %v5558_v62  ;;  %3355 = vmatprep.subr.bf16.mxu0 %v5173_v20 }
 0x26c   : > { %3483 = vmatprep.subr.bf16.mxu1 %v5177_v25 }
 0x26d   : > { %1242 = vmatmul.mubr.f32.vlgmr.msra.gmra.mrb[0].mxu0 %v6434_v9 }
 0x26e   : > { %1384 = vmatmul.mubr.f32.vlgmr.msra.gmra.mrb[0].mxu1 %v6434_v9  ;;  %3357 = vmatpush1.bf16.msra.mxu0 %v5179_v26  ;;  %v6482_v9 = vld [vmem:[#allocation46_spill] sm:$0xff] }
 0x26f   : > { %3485 = vmatpush1.bf16.msra.mxu1 %v5182_v30  ;;  %3359 = vmatprep.subr.bf16.mxu0 %v5186_v34 }
 0x270   : > { %3487 = vmatprep.subr.bf16.mxu1 %v5188_v35 }
 0x272   : > { %3361 = vmatpush1.bf16.msra.mxu0 %v5191_v39 }
 0x273   : > { %3489 = vmatpush1.bf16.msra.mxu1 %v5195_v43  ;;  %3363 = vmatprep.subr.bf16.mxu0 %v5197_v44 }
 0x274   : > { %3491 = vmatprep.subr.bf16.mxu1 %v5199_v48 }
 0x276   : > { %3365 = vmatpush1.bf16.msra.mxu0 %v5202_v52 }
 0x277   : > { %3493 = vmatpush1.bf16.msra.mxu1 %v5206_v56  ;;  %3367 = vmatprep.subr.bf16.mxu0 %v5208_v57 }
 0x278   : > { %3495 = vmatprep.subr.bf16.mxu1 %v5211_v61 }
 0x27a   : > { %3369 = vmatpush1.bf16.msra.mxu0 %v5214_v4 }
 0x27b   : > { %3497 = vmatpush1.bf16.msra.mxu1 %v5218_v5  ;;  %3371 = vmatprep.subr.bf16.mxu0 %v5220_v6 }
 0x27c   : > { %3499 = vmatprep.subr.bf16.mxu1 %v5223_v10 }
 0x27e   : > { %3373 = vmatpush1.bf16.msra.mxu0 %v5226_v16 }
 0x27f   : > { %3501 = vmatpush1.bf16.msra.mxu1 %v5230_v17  ;;  %3375 = vmatprep.subr.bf16.mxu0 %v5232_v18 }
 0x280   : > { %3503 = vmatprep.subr.bf16.mxu1 %v5235_v23 }
 0x282   : > { %3377 = vmatpush1.bf16.msra.mxu0 %v5238_v33 }
 0x283   : > { %3505 = vmatpush1.bf16.msra.mxu1 %v5242_v36  ;;  %3379 = vmatprep.subr.bf16.mxu0 %v5244_v37 }
 0x284   : > { %3507 = vmatprep.subr.bf16.mxu1 %v5247_v42 }
 0x286   : > { %3381 = vmatpush1.bf16.msra.mxu0 %v5250_v51 }
 0x287   : > { %3509 = vmatpush1.bf16.msra.mxu1 %v5254_v53  ;;  %3383 = vmatprep.subr.bf16.mxu0 %v5256_v54 }
 0x288   : > { %3511 = vmatprep.subr.bf16.mxu1 %v5259_v60 }
 0x28a   : > { %3385 = vmatpush1.bf16.msra.mxu0 %v5262_v3 }
 0x28b   : > { %3513 = vmatpush1.bf16.msra.mxu1 %v5266_v7  ;;  %3387 = vmatprep.subr.bf16.mxu0 %v5268_v8 }
 0x28c   : > { %3515 = vmatprep.subr.bf16.mxu1 %v5271_v13 }
 0x28e   : > { %3389 = vmatpush1.bf16.msra.mxu0 %v5274_v27 }
 0x28f   : > { %3517 = vmatpush1.bf16.msra.mxu1 %v5278_v28  ;;  %3391 = vmatprep.subr.bf16.mxu0 %v5280_v29 }
 0x290   : > { %3519 = vmatprep.subr.bf16.mxu1 %v5283_v40 }
 0x292   : > { %3393 = vmatpush1.bf16.msra.mxu0 %v5286_v50 }
 0x293   : > { %3521 = vmatpush1.bf16.msra.mxu1 %v5290_v55  ;;  %3395 = vmatprep.subr.bf16.mxu0 %v5292_v58 }
 0x294   : > { %3523 = vmatprep.subr.bf16.mxu1 %v5295_v0 }
 0x296   : > { %3397 = vmatpush1.bf16.msra.mxu0 %v6482_v9  ;;  %v6493_v9 = vld [vmem:[#allocation57_spill] sm:$0xff] }
 0x297   : > { %3525 = vmatpush1.bf16.msra.mxu1 %v6483_v45  ;;  %3399 = vmatprep.subr.bf16.mxu0 %v6484_v19  ;;  %v6494_v45 = vld [vmem:[#allocation58_spill] sm:$0xff]  ;;  %v6495_v19 = vld [vmem:[#allocation59_spill] sm:$0xff] }
 0x298   : > { %3527 = vmatprep.subr.bf16.mxu1 %v6485_v31  ;;  %v6496_v31 = vld [vmem:[#allocation60_spill] sm:$0xff] }
 0x29a   : > { %3401 = vmatpush1.bf16.msra.mxu0 %v6486_v49  ;;  %v6497_v49 = vld [vmem:[#allocation61_spill] sm:$0xff] }
 0x29b   : > { %3529 = vmatpush1.bf16.msra.mxu1 %v6487_v46  ;;  %3403 = vmatprep.subr.bf16.mxu0 %v6488_v47  ;;  %v6498_v46 = vld [vmem:[#allocation62_spill] sm:$0xff]  ;;  %v6499_v47 = vld [vmem:[#allocation63_spill] sm:$0xff] }
 0x29c   : > { %3531 = vmatprep.subr.bf16.mxu1 %v6489_v63  ;;  %v6500_v63 = vld [vmem:[#allocation64_spill] sm:$0xff] }
 0x29e   : > { %3405 = vmatpush1.bf16.msra.mxu0 %v6490_v15  ;;  %v6501_v15 = vld [vmem:[#allocation65_spill] sm:$0xff] }
 0x29f   : > { %3533 = vmatpush1.bf16.msra.mxu1 %v6491_v11  ;;  %3407 = vmatprep.subr.bf16.mxu0 %v6492_v1  ;;  %v6502_v11 = vld [vmem:[#allocation66_spill] sm:$0xff]  ;;  %v6503_v1 = vld [vmem:[#allocation67_spill] sm:$0xff] }
 0x2a0   : > { %3535 = vmatprep.subr.bf16.mxu1 %v6493_v9  ;;  %v6504_v9 = vld [vmem:[#allocation68_spill] sm:$0xff] }
 0x2a2   : > { %3409 = vmatpush1.bf16.msra.mxu0 %v6494_v45  ;;  %v6505_v45 = vld [vmem:[#allocation69_spill] sm:$0xff] }
 0x2a3   : > { %3537 = vmatpush1.bf16.msra.mxu1 %v6495_v19  ;;  %3411 = vmatprep.subr.bf16.mxu0 %v6496_v31  ;;  %v810_v19 = vlaneseq }
 0x2a4   : > { %3539 = vmatprep.subr.bf16.mxu1 %v6497_v49 }
 0x2a5   : > { %v5631_v31 = vshrl.u32 %v810_v19, 7  ;;  %v791_v19 = vld [vmem:[#allocation2 + $0x18] sm:$0xff] }
 0x2a6   : > { %3413 = vmatpush1.bf16.msra.mxu0 %v6498_v46 }
 0x2a7   : > { %3541 = vmatpush1.bf16.msra.mxu1 %v6499_v47  ;;  %3415 = vmatprep.subr.bf16.mxu0 %v6500_v63  ;;  %v812_v49 = vsub.s32 0, %v5631_v31  ;;  %v816_v46 = vsub.s32 1, %v5631_v31  ;;  %v5635_v47 = vld [vmem:[#allocation8] sm:$0xf]  ;;  %v824_v63 = vsub.s32 3, %v5631_v31 }
 0x2a8   : > { %3543 = vmatprep.subr.bf16.mxu1 %v6501_v15 }
 0x2a9   : > { %v5639_v15 = vrot.slane %v5635_v47, %v812_v49 }
 0x2aa   : > { %3417 = vmatpush1.bf16.msra.mxu0 %v6502_v11  ;;  %v789_v11 = vld [vmem:[#allocation2 + $0x8] sm:$0xff] }
 0x2ab   : > { %3545 = vmatpush1.bf16.msra.mxu1 %v6503_v1  ;;  %3419 = vmatprep.subr.bf16.mxu0 %v6504_v9  ;;  %v5642_v1 = vrot.slane %v5635_v47, %v816_v46  ;;  %v788_v9 = vld [vmem:[#allocation2] sm:$0xff] }
 0x2ac   : > { %3547 = vmatprep.subr.bf16.mxu1 %v6505_v45  ;;  %v5645_v45 = vrot.slane %v5635_v47, %v824_v63  ;;  %v830_v0 = vadd.f32 %v5639_v15, %v788_v9 }
 0x2ad   : > { %v831_v58 = vadd.f32 %v5642_v1, %v789_v11  ;;  %v6506_v11 = vld [vmem:[#allocation70_spill] sm:$0xff] }
 0x2ae   : > { %v833_v50 = vadd.f32 %v5645_v45, %v791_v19  ;;  %v6507_v19 = vld [vmem:[#allocation71_spill] sm:$0xff] }
 0x340   : > { %v1243_v55 = vpop.f32.mrb[0].mxu0 }
 0x341   : > { %v5650_v40 = vpop.f32.mrb[0].mxu1  ;;  %v1245_v49 = vpop.f32.mrb[1].mxu0  ;;  %v1390_v29 = vadd.f32 %v1243_v55, %v830_v0  ;;  %v6508_v55 = vld [vmem:[#allocation72_spill] sm:$0xff]  ;;  %v6515_v0 = vld [vmem:[#allocation79_spill] sm:$0xff] }
 0x342   : > { %v1391_v28 = vadd.f32 %v1245_v49, %v831_v58  ;;  %v1387_v46 = vpop.f32.mrb[1].mxu1  ;;  %v6509_v58 = vld [vmem:[#allocation73_spill] sm:$0xff]  ;;  %v6516_v49 = vld [vmem:[#allocation80_spill] sm:$0xff] }
 0x343   : > { %v1393_v27 = vadd.f32 %v1387_v46, %v833_v50  ;;  %v6513_v50 = vld [vmem:[#allocation77_spill] sm:$0xff] }
 0x344   : > { %4547 = vtanh.f32 %v1391_v28  ;;  %v6510_v28 = vld [vmem:[#allocation74_spill] sm:$0xff]  ;;  %v6517_v46 = vld [vmem:[#allocation81_spill] sm:$0xff] }
 0x345   : > { %4549 = vtanh.f32 %v1390_v29  ;;  %v6512_v29 = vld [vmem:[#allocation76_spill] sm:$0xff] }
 0x346   : > { %4551 = vtanh.f32 %v1393_v27  ;;  %v6511_v27 = vld [vmem:[#allocation75_spill] sm:$0xff] }
 0x34e   : > { %v4548_v63 = vpop.eup %4547 }
 0x34f   : > { %v4550_v13 = vpop.eup %4549  ;;  %1462 = vmatprep.mubr.f32.mxu0 %v4548_v63  ;;  %1604 = vmatprep.mubr.f32.mxu1 %v4548_v63  ;;  %v6518_v63 = vld [vmem:[#allocation82_spill] sm:$0xff] }
 0x350   : > { %1463 = vmatmul.mubr.f32.vlgmr.msra.gmra.mrb[2].mxu0 %v4550_v13  ;;  %1605 = vmatmul.mubr.f32.vlgmr.msra.gmra.mrb[2].mxu1 %v4550_v13  ;;  %v4552_v9 = vpop.eup %4551  ;;  %v6514_v13 = vld [vmem:[#allocation78_spill] sm:$0xff] }
 0x351   : > { %3421 = vmatpush1.bf16.msra.mxu0 %v6506_v11  ;;  %3549 = vmatpush1.bf16.msra.mxu1 %v6507_v19 }
 0x352   : > { %1533 = vmatprep.mubr.f32.mxu0 %v4552_v9  ;;  %1675 = vmatprep.mubr.f32.mxu1 %v4552_v9  ;;  %v6519_v9 = vld [vmem:[#allocation83_spill] sm:$0xff] }
 0x353   : > { %3423 = vmatprep.subr.bf16.mxu0 %v6508_v55  ;;  %3551 = vmatprep.subr.bf16.mxu1 %v6509_v58  ;;  %v6520_v58 = vld [vmem:[#allocation84_spill] sm:$0xff] }
 0x355   : > { %3425 = vmatpush1.bf16.msra.mxu0 %v6510_v28  ;;  %3553 = vmatpush1.bf16.msra.mxu1 %v6511_v27  ;;  %v6521_v28 = vld [vmem:[#allocation85_spill] sm:$0xff]  ;;  %v6522_v27 = vld [vmem:[#allocation86_spill] sm:$0xff] }
 0x356   : > { %3427 = vmatprep.subr.bf16.mxu0 %v6512_v29  ;;  %3555 = vmatprep.subr.bf16.mxu1 %v6513_v50  ;;  %v6523_v29 = vld [vmem:[#allocation87_spill] sm:$0xff]  ;;  %v6524_v50 = vld [vmem:[#allocation88_spill] sm:$0xff] }
 0x359   : > { %3429 = vmatpush1.bf16.msra.mxu0 %v6514_v13  ;;  %3557 = vmatpush1.bf16.msra.mxu1 %v6515_v0  ;;  %v6525_v13 = vld [vmem:[#allocation89_spill] sm:$0xff]  ;;  %v6526_v0 = vld [vmem:[#allocation90_spill] sm:$0xff] }
 0x35a   : > { %3431 = vmatprep.subr.bf16.mxu0 %v6516_v49  ;;  %3559 = vmatprep.subr.bf16.mxu1 %v6517_v46  ;;  %v6527_v49 = vld [vmem:[#allocation91_spill] sm:$0xff]  ;;  %v6528_v46 = vld [vmem:[#allocation92_spill] sm:$0xff] }
 0x35d   : > { %3433 = vmatpush1.bf16.msra.mxu0 %v6518_v63  ;;  %3561 = vmatpush1.bf16.msra.mxu1 %v6519_v9  ;;  %v6529_v63 = vld [vmem:[#allocation93_spill] sm:$0xff]  ;;  %v6530_v9 = vld [vmem:[#allocation94_spill] sm:$0xff] }
 0x35e   : > { %3435 = vmatprep.subr.bf16.mxu0 %v6520_v58  ;;  %3563 = vmatprep.subr.bf16.mxu1 %v6521_v28  ;;  %v6531_v58 = vld [vmem:[#allocation95_spill] sm:$0xff]  ;;  %v6532_v28 = vld [vmem:[#allocation96_spill] sm:$0xff] }
 0x361   : > { %3437 = vmatpush1.bf16.msra.mxu0 %v6522_v27  ;;  %3565 = vmatpush1.bf16.msra.mxu1 %v6523_v29  ;;  %v6533_v27 = vld [vmem:[#allocation97_spill] sm:$0xff]  ;;  %v6534_v29 = vld [vmem:[#allocation98_spill] sm:$0xff] }
 0x362   : > { %3439 = vmatprep.subr.bf16.mxu0 %v6524_v50  ;;  %3567 = vmatprep.subr.bf16.mxu1 %v6525_v13  ;;  %v6535_v50 = vld [vmem:[#allocation99_spill] sm:$0xff]  ;;  %v6536_v13 = vld [vmem:[#allocation100_spill] sm:$0xff] }
 0x365   : > { %3441 = vmatpush1.bf16.msra.mxu0 %v6526_v0  ;;  %3569 = vmatpush1.bf16.msra.mxu1 %v6527_v49  ;;  %v6537_v0 = vld [vmem:[#allocation101_spill] sm:$0xff]  ;;  %v6538_v49 = vld [vmem:[#allocation102_spill] sm:$0xff] }
 0x366   : > { %3443 = vmatprep.subr.bf16.mxu0 %v6528_v46  ;;  %3571 = vmatprep.subr.bf16.mxu1 %v6529_v63  ;;  %v6539_v46 = vld [vmem:[#allocation103_spill] sm:$0xff]  ;;  %v6540_v63 = vld [vmem:[#allocation104_spill] sm:$0xff] }
 0x369   : > { %3445 = vmatpush1.bf16.msra.mxu0 %v6530_v9  ;;  %3573 = vmatpush1.bf16.msra.mxu1 %v6531_v58  ;;  %v6541_v9 = vld [vmem:[#allocation105_spill] sm:$0xff]  ;;  %v6542_v58 = vld [vmem:[#allocation106_spill] sm:$0xff] }
 0x36a   : > { %3447 = vmatprep.subr.bf16.mxu0 %v6532_v28  ;;  %3575 = vmatprep.subr.bf16.mxu1 %v6533_v27  ;;  %v820_v28 = vsub.s32 2, %v5631_v31  ;;  %v6543_v27 = vld [vmem:[#allocation107_spill] sm:$0xff] }
 0x36d   : > { %3449 = vmatpush1.bf16.msra.mxu0 %v6534_v29  ;;  %3577 = vmatpush1.bf16.msra.mxu1 %v6535_v50  ;;  %v6544_v29 = vld [vmem:[#allocation108_spill] sm:$0xff]  ;;  %v6545_v50 = vld [vmem:[#allocation109_spill] sm:$0xff] }
 0x36e   : > { %3451 = vmatprep.subr.bf16.mxu0 %v6536_v13  ;;  %3579 = vmatprep.subr.bf16.mxu1 %v6537_v0  ;;  %v5694_v0 = vrot.slane %v5635_v47, %v820_v28  ;;  %v6548_v13 = vld [vmem:[#allocation112_spill] sm:$0xff]  ;;  %v6554_v28 = vld [vmem:[#allocation118_spill] sm:$0xff] }
 0x371   : > { %3453 = vmatpush1.bf16.msra.mxu0 %v6538_v49  ;;  %3581 = vmatpush1.bf16.msra.mxu1 %v6539_v46  ;;  %v6546_v49 = vld [vmem:[#allocation110_spill] sm:$0xff]  ;;  %v6547_v46 = vld [vmem:[#allocation111_spill] sm:$0xff] }
 0x372   : > { %3455 = vmatprep.subr.bf16.mxu0 %v6540_v63  ;;  %3583 = vmatprep.subr.bf16.mxu1 %v6541_v9  ;;  %v790_v63 = vld [vmem:[#allocation2 + $0x10] sm:$0xff] }
 0x373   : > { %v6549_v9 = vld [vmem:[#allocation113_spill] sm:$0xff]  ;;  %v832_v31 = vadd.f32 %v5694_v0, %v790_v63 }
 0x374   : > { %v6557_v63 = vld [vmem:[#allocation37_spill] sm:$0xff] }
 0x375   : > { %3457 = vmatpush1.bf16.msra.mxu0 %v6542_v58  ;;  %3585 = vmatpush1.bf16.msra.mxu1 %v6543_v27  ;;  %v6550_v58 = vld [vmem:[#allocation114_spill] sm:$0xff]  ;;  %v6551_v27 = vld [vmem:[#allocation115_spill] sm:$0xff]  ;;  %v1392_v47 = vadd.f32 %v5650_v40, %v832_v31 }
 0x376   : > { %3459 = vmatprep.subr.bf16.mxu0 %v6544_v29  ;;  %3587 = vmatprep.subr.bf16.mxu1 %v6545_v50  ;;  %v6552_v29 = vld [vmem:[#allocation116_spill] sm:$0xff]  ;;  %v6553_v50 = vld [vmem:[#allocation117_spill] sm:$0xff]  ;;  %v6558_v31 = vld [vmem:[#allocation38_spill] sm:$0xff] }
 0x377   : > { %4553 = vtanh.f32 %v1392_v47  ;;  %v6559_v47 = vld [vmem:[#allocation39_spill] sm:$0xff] }
 0x379   : > { %3461 = vmatpush1.bf16.msra.mxu0 %v6546_v49  ;;  %3589 = vmatpush1.bf16.msra.mxu1 %v6547_v46  ;;  %v6555_v46 = vld [vmem:[#allocation119_spill] sm:$0xff] }
 0x37a   : > { %3463 = vmatprep.subr.bf16.mxu0 %v6548_v13  ;;  %3591 = vmatprep.subr.bf16.mxu1 %v6549_v9  ;;  %v6556_v13 = vld [vmem:[#allocation120_spill] sm:$0xff] }
 0x37d   : > { %3465 = vmatpush1.bf16.msra.mxu0 %v6550_v58  ;;  %3593 = vmatpush1.bf16.msra.mxu1 %v6551_v27 }
 0x37e   : > { %3467 = vmatprep.subr.bf16.mxu0 %v6552_v29  ;;  %3595 = vmatprep.subr.bf16.mxu1 %v6553_v50 }
 0x381   : > { %3469 = vmatpush1.bf16.msra.mxu0 %v6554_v28  ;;  %3597 = vmatpush1.bf16.msra.mxu1 %v6555_v46  ;;  %v4554_v40 = vpop.eup %4553 }
 0x382   : > { %3471 = vmatprep.subr.bf16.mxu0 %v5524_v38  ;;  %3599 = vmatprep.subr.bf16.mxu1 %v6556_v13 }
 0x385   : > { %3473 = vmatpush1.bf16.msra.mxu0 %v5530_v12  ;;  %3601 = vmatpush1.bf16.msra.mxu1 %v5534_v14 }
 0x386   : > { %3475 = vmatprep.subr.bf16.mxu0 %v5536_v22  ;;  %3603 = vmatprep.subr.bf16.mxu1 %v5539_v24 }
 0x389   : > { %3477 = vmatpush1.bf16.msra.mxu0 %v5542_v32  ;;  %3605 = vmatpush1.bf16.msra.mxu1 %v5546_v59 }
 0x38a   : > { %3479 = vmatprep.subr.bf16.mxu0 %v5548_v2  ;;  %3607 = vmatprep.subr.bf16.mxu1 %v5551_v21 }
 0x38d   : > { %3481 = vmatpush1.bf16.msra.mxu0 %v5554_v41  ;;  %3609 = vmatpush1.bf16.msra.mxu1 %v5558_v62 }
 0x38e   : > { %3611 = vmatprep.subr.bf16.mxu0 %v5173_v20  ;;  %3739 = vmatprep.subr.bf16.mxu1 %v5177_v25 }
 0x390   : > { %1534 = vmatmul.mubr.f32.vlgmr.msra.gmra.mrb[2].mxu0 %v4554_v40  ;;  %1676 = vmatmul.mubr.f32.vlgmr.msra.gmra.mrb[2].mxu1 %v4554_v40  ;;  %v6560_v40 = vld [vmem:[#allocation40_spill] sm:$0xff] }
 0x391   : > { %3613 = vmatpush1.bf16.msra.mxu0 %v5179_v26  ;;  %3741 = vmatpush1.bf16.msra.mxu1 %v5182_v30 }
 0x392   : > { %3615 = vmatprep.subr.bf16.mxu0 %v5186_v34  ;;  %3743 = vmatprep.subr.bf16.mxu1 %v5188_v35 }
 0x395   : > { %3617 = vmatpush1.bf16.msra.mxu0 %v5191_v39  ;;  %3745 = vmatpush1.bf16.msra.mxu1 %v5195_v43 }
 0x396   : > { %3619 = vmatprep.subr.bf16.mxu0 %v5197_v44  ;;  %3747 = vmatprep.subr.bf16.mxu1 %v5199_v48 }
 0x399   : > { %3621 = vmatpush1.bf16.msra.mxu0 %v5202_v52  ;;  %3749 = vmatpush1.bf16.msra.mxu1 %v5206_v56 }
 0x39a   : > { %3623 = vmatprep.subr.bf16.mxu0 %v5208_v57  ;;  %3751 = vmatprep.subr.bf16.mxu1 %v5211_v61 }
 0x39d   : > { %3625 = vmatpush1.bf16.msra.mxu0 %v5214_v4  ;;  %3753 = vmatpush1.bf16.msra.mxu1 %v5218_v5 }
 0x39e   : > { %3627 = vmatprep.subr.bf16.mxu0 %v5220_v6  ;;  %3755 = vmatprep.subr.bf16.mxu1 %v5223_v10 }
 0x3a1   : > { %3629 = vmatpush1.bf16.msra.mxu0 %v5226_v16  ;;  %3757 = vmatpush1.bf16.msra.mxu1 %v5230_v17 }
 0x3a2   : > { %3631 = vmatprep.subr.bf16.mxu0 %v5232_v18  ;;  %3759 = vmatprep.subr.bf16.mxu1 %v5235_v23 }
 0x3a5   : > { %3633 = vmatpush1.bf16.msra.mxu0 %v5238_v33  ;;  %3761 = vmatpush1.bf16.msra.mxu1 %v5242_v36 }
 0x3a6   : > { %3635 = vmatprep.subr.bf16.mxu0 %v5244_v37  ;;  %3763 = vmatprep.subr.bf16.mxu1 %v5247_v42  ;;  %v795_v42 = vld [vmem:[#allocation2 + $0x38] sm:$0xff] }
 0x3a9   : > { %3637 = vmatpush1.bf16.msra.mxu0 %v5250_v51  ;;  %3765 = vmatpush1.bf16.msra.mxu1 %v5254_v53  ;;  %v6561_v51 = vld [vmem:[#allocation41_spill] sm:$0xff]  ;;  %v6562_v53 = vld [vmem:[#allocation42_spill] sm:$0xff] }
 0x3aa   : > { %3639 = vmatprep.subr.bf16.mxu0 %v5256_v54  ;;  %3767 = vmatprep.subr.bf16.mxu1 %v5259_v60  ;;  %v6563_v54 = vld [vmem:[#allocation43_spill] sm:$0xff]  ;;  %v6564_v60 = vld [vmem:[#allocation44_spill] sm:$0xff] }
 0x3ad   : > { %3641 = vmatpush1.bf16.msra.mxu0 %v5262_v3  ;;  %3769 = vmatpush1.bf16.msra.mxu1 %v5266_v7  ;;  %v6565_v3 = vld [vmem:[#allocation45_spill] sm:$0xff]  ;;  %v6566_v7 = vld [vmem:[#allocation46_spill] sm:$0xff] }
 0x3ae   : > { %3643 = vmatprep.subr.bf16.mxu0 %v5268_v8  ;;  %3771 = vmatprep.subr.bf16.mxu1 %v6557_v63  ;;  %v6567_v8 = vld [vmem:[#allocation47_spill] sm:$0xff]  ;;  %v6568_v63 = vld [vmem:[#allocation48_spill] sm:$0xff] }
 0x3b1   : > { %3645 = vmatpush1.bf16.msra.mxu0 %v6558_v31  ;;  %3773 = vmatpush1.bf16.msra.mxu1 %v6559_v47  ;;  %v6569_v31 = vld [vmem:[#allocation49_spill] sm:$0xff]  ;;  %v6570_v47 = vld [vmem:[#allocation50_spill] sm:$0xff] }
 0x3b2   : > { %3647 = vmatprep.subr.bf16.mxu0 %v6560_v40  ;;  %3775 = vmatprep.subr.bf16.mxu1 %v6561_v51  ;;  %v6571_v40 = vld [vmem:[#allocation51_spill] sm:$0xff]  ;;  %v6572_v51 = vld [vmem:[#allocation52_spill] sm:$0xff] }
 0x3b5   : > { %3649 = vmatpush1.bf16.msra.mxu0 %v6562_v53  ;;  %3777 = vmatpush1.bf16.msra.mxu1 %v6563_v54  ;;  %v6573_v53 = vld [vmem:[#allocation53_spill] sm:$0xff]  ;;  %v6574_v54 = vld [vmem:[#allocation54_spill] sm:$0xff] }
 0x3b6   : > { %3651 = vmatprep.subr.bf16.mxu0 %v6564_v60  ;;  %3779 = vmatprep.subr.bf16.mxu1 %v6565_v3  ;;  %v6575_v60 = vld [vmem:[#allocation55_spill] sm:$0xff]  ;;  %v6576_v3 = vld [vmem:[#allocation56_spill] sm:$0xff] }
 0x3b9   : > { %3653 = vmatpush1.bf16.msra.mxu0 %v6566_v7  ;;  %3781 = vmatpush1.bf16.msra.mxu1 %v6567_v8  ;;  %v6577_v7 = vld [vmem:[#allocation57_spill] sm:$0xff]  ;;  %v6578_v8 = vld [vmem:[#allocation58_spill] sm:$0xff] }
 0x3ba   : > { %3655 = vmatprep.subr.bf16.mxu0 %v6568_v63  ;;  %3783 = vmatprep.subr.bf16.mxu1 %v6569_v31  ;;  %v6579_v63 = vld [vmem:[#allocation59_spill] sm:$0xff]  ;;  %v6580_v31 = vld [vmem:[#allocation60_spill] sm:$0xff] }
 0x3bd   : > { %3657 = vmatpush1.bf16.msra.mxu0 %v6570_v47  ;;  %3785 = vmatpush1.bf16.msra.mxu1 %v6571_v40  ;;  %v6581_v47 = vld [vmem:[#allocation61_spill] sm:$0xff]  ;;  %v6582_v40 = vld [vmem:[#allocation62_spill] sm:$0xff] }
 0x3be   : > { %3659 = vmatprep.subr.bf16.mxu0 %v6572_v51  ;;  %3787 = vmatprep.subr.bf16.mxu1 %v6573_v53  ;;  %v6583_v51 = vld [vmem:[#allocation63_spill] sm:$0xff]  ;;  %v6584_v53 = vld [vmem:[#allocation64_spill] sm:$0xff] }
 0x3c1   : > { %3661 = vmatpush1.bf16.msra.mxu0 %v6574_v54  ;;  %3789 = vmatpush1.bf16.msra.mxu1 %v6575_v60  ;;  %v6585_v54 = vld [vmem:[#allocation65_spill] sm:$0xff]  ;;  %v6586_v60 = vld [vmem:[#allocation66_spill] sm:$0xff] }
 0x3c2   : > { %3663 = vmatprep.subr.bf16.mxu0 %v6576_v3  ;;  %3791 = vmatprep.subr.bf16.mxu1 %v6577_v7  ;;  %v6587_v3 = vld [vmem:[#allocation67_spill] sm:$0xff]  ;;  %v6588_v7 = vld [vmem:[#allocation68_spill] sm:$0xff] }
 0x3c5   : > { %3665 = vmatpush1.bf16.msra.mxu0 %v6578_v8  ;;  %3793 = vmatpush1.bf16.msra.mxu1 %v6579_v63  ;;  %v6589_v8 = vld [vmem:[#allocation69_spill] sm:$0xff]  ;;  %v792_v63 = vld [vmem:[#allocation2 + $0x20] sm:$0xff] }
 0x3c6   : > { %3667 = vmatprep.subr.bf16.mxu0 %v6580_v31  ;;  %3795 = vmatprep.subr.bf16.mxu1 %v6581_v47  ;;  %v793_v31 = vld [vmem:[#allocation2 + $0x28] sm:$0xff]  ;;  %v834_v47 = vadd.f32 %v5639_v15, %v792_v63 }
 0x3c9   : > { %3669 = vmatpush1.bf16.msra.mxu0 %v6582_v40  ;;  %3797 = vmatpush1.bf16.msra.mxu1 %v6583_v51  ;;  %v835_v40 = vadd.f32 %v5642_v1, %v793_v31  ;;  %v6600_v31 = vld [vmem:[#allocation83_spill] sm:$0xff] }
 0x3ca   : > { %3671 = vmatprep.subr.bf16.mxu0 %v6584_v53  ;;  %3799 = vmatprep.subr.bf16.mxu1 %v6585_v54  ;;  %v837_v54 = vadd.f32 %v5645_v45, %v795_v42  ;;  %v6590_v42 = vld [vmem:[#allocation73_spill] sm:$0xff] }
 0x3cd   : > { %3673 = vmatpush1.bf16.msra.mxu0 %v6586_v60  ;;  %3801 = vmatpush1.bf16.msra.mxu1 %v6587_v3 }
 0x3ce   : > { %3675 = vmatprep.subr.bf16.mxu0 %v6588_v7  ;;  %3803 = vmatprep.subr.bf16.mxu1 %v6589_v8 }
 0x463   : > { %v1535_v51 = vpop.f32.mrb[2].mxu0  ;;  %v5788_v37 = vpop.f32.mrb[2].mxu1 }
 0x464   : > { %v1537_v53 = vpop.f32.mrb[3].mxu0  ;;  %v1679_v60 = vpop.f32.mrb[3].mxu1  ;;  %v1682_v36 = vadd.f32 %v1535_v51, %v834_v47  ;;  %v6591_v51 = vld [vmem:[#allocation74_spill] sm:$0xff]  ;;  %v6601_v47 = vld [vmem:[#allocation84_spill] sm:$0xff] }
 0x465   : > { %v1683_v3 = vadd.f32 %v1537_v53, %v835_v40  ;;  %v1685_v33 = vadd.f32 %v1679_v60, %v837_v54  ;;  %v6594_v53 = vld [vmem:[#allocation77_spill] sm:$0xff]  ;;  %v6595_v54 = vld [vmem:[#allocation78_spill] sm:$0xff]  ;;  %v6596_v60 = vld [vmem:[#allocation79_spill] sm:$0xff] }
 0x466   : > { %v6602_v40 = vld [vmem:[#allocation85_spill] sm:$0xff] }
 0x467   : > { %4555 = vtanh.f32 %v1683_v3  ;;  %v6597_v3 = vld [vmem:[#allocation80_spill] sm:$0xff] }
 0x468   : > { %4557 = vtanh.f32 %v1682_v36  ;;  %v6593_v36 = vld [vmem:[#allocation76_spill] sm:$0xff] }
 0x469   : > { %4559 = vtanh.f32 %v1685_v33  ;;  %v6592_v33 = vld [vmem:[#allocation75_spill] sm:$0xff] }
 0x471   : > { %v4556_v8 = vpop.eup %4555 }
 0x472   : > { %v4558_v7 = vpop.eup %4557  ;;  %1754 = vmatprep.mubr.f32.mxu0 %v4556_v8  ;;  %1896 = vmatprep.mubr.f32.mxu1 %v4556_v8  ;;  %v6599_v8 = vld [vmem:[#allocation82_spill] sm:$0xff] }
 0x473   : > { %1755 = vmatmul.mubr.f32.vlgmr.msra.gmra.mrb[4].mxu0 %v4558_v7  ;;  %1897 = vmatmul.mubr.f32.vlgmr.msra.gmra.mrb[4].mxu1 %v4558_v7  ;;  %v4560_v63 = vpop.eup %4559  ;;  %v6598_v7 = vld [vmem:[#allocation81_spill] sm:$0xff] }
 0x474   : > { %3677 = vmatpush1.bf16.msra.mxu0 %v6506_v11  ;;  %3805 = vmatpush1.bf16.msra.mxu1 %v6507_v19 }
 0x475   : > { %1825 = vmatprep.mubr.f32.mxu0 %v4560_v63  ;;  %1967 = vmatprep.mubr.f32.mxu1 %v4560_v63  ;;  %v6603_v63 = vld [vmem:[#allocation86_spill] sm:$0xff] }
 0x476   : > { %3679 = vmatprep.subr.bf16.mxu0 %v6508_v55  ;;  %3807 = vmatprep.subr.bf16.mxu1 %v6590_v42 }
 0x478   : > { %3681 = vmatpush1.bf16.msra.mxu0 %v6591_v51  ;;  %3809 = vmatpush1.bf16.msra.mxu1 %v6592_v33 }
 0x479   : > { %3683 = vmatprep.subr.bf16.mxu0 %v6593_v36  ;;  %3811 = vmatprep.subr.bf16.mxu1 %v6594_v53  ;;  %v6604_v36 = vld [vmem:[#allocation87_spill] sm:$0xff]  ;;  %v6605_v53 = vld [vmem:[#allocation88_spill] sm:$0xff] }
 0x47c   : > { %3685 = vmatpush1.bf16.msra.mxu0 %v6595_v54  ;;  %3813 = vmatpush1.bf16.msra.mxu1 %v6596_v60  ;;  %v6606_v54 = vld [vmem:[#allocation89_spill] sm:$0xff]  ;;  %v6607_v60 = vld [vmem:[#allocation90_spill] sm:$0xff] }
 0x47d   : > { %3687 = vmatprep.subr.bf16.mxu0 %v6597_v3  ;;  %3815 = vmatprep.subr.bf16.mxu1 %v6598_v7  ;;  %v6608_v3 = vld [vmem:[#allocation91_spill] sm:$0xff]  ;;  %v6609_v7 = vld [vmem:[#allocation92_spill] sm:$0xff] }
 0x480   : > { %3689 = vmatpush1.bf16.msra.mxu0 %v6599_v8  ;;  %3817 = vmatpush1.bf16.msra.mxu1 %v6600_v31  ;;  %v6610_v8 = vld [vmem:[#allocation93_spill] sm:$0xff]  ;;  %v6611_v31 = vld [vmem:[#allocation94_spill] sm:$0xff] }
 0x481   : > { %3691 = vmatprep.subr.bf16.mxu0 %v6601_v47  ;;  %3819 = vmatprep.subr.bf16.mxu1 %v6602_v40  ;;  %v6612_v47 = vld [vmem:[#allocation95_spill] sm:$0xff]  ;;  %v6613_v40 = vld [vmem:[#allocation96_spill] sm:$0xff] }
 0x484   : > { %3693 = vmatpush1.bf16.msra.mxu0 %v6603_v63  ;;  %3821 = vmatpush1.bf16.msra.mxu1 %v6604_v36  ;;  %v6614_v63 = vld [vmem:[#allocation97_spill] sm:$0xff]  ;;  %v6615_v36 = vld [vmem:[#allocation98_spill] sm:$0xff] }
 0x485   : > { %3695 = vmatprep.subr.bf16.mxu0 %v6605_v53  ;;  %3823 = vmatprep.subr.bf16.mxu1 %v6606_v54  ;;  %v6616_v53 = vld [vmem:[#allocation99_spill] sm:$0xff]  ;;  %v6617_v54 = vld [vmem:[#allocation100_spill] sm:$0xff] }
 0x488   : > { %3697 = vmatpush1.bf16.msra.mxu0 %v6607_v60  ;;  %3825 = vmatpush1.bf16.msra.mxu1 %v6608_v3  ;;  %v6618_v60 = vld [vmem:[#allocation101_spill] sm:$0xff]  ;;  %v6619_v3 = vld [vmem:[#allocation102_spill] sm:$0xff] }
 0x489   : > { %3699 = vmatprep.subr.bf16.mxu0 %v6609_v7  ;;  %3827 = vmatprep.subr.bf16.mxu1 %v6610_v8  ;;  %v6620_v7 = vld [vmem:[#allocation103_spill] sm:$0xff]  ;;  %v6621_v8 = vld [vmem:[#allocation104_spill] sm:$0xff] }
 0x48c   : > { %3701 = vmatpush1.bf16.msra.mxu0 %v6611_v31  ;;  %3829 = vmatpush1.bf16.msra.mxu1 %v6612_v47  ;;  %v6622_v31 = vld [vmem:[#allocation105_spill] sm:$0xff]  ;;  %v6623_v47 = vld [vmem:[#allocation106_spill] sm:$0xff] }
 0x48d   : > { %3703 = vmatprep.subr.bf16.mxu0 %v6613_v40  ;;  %3831 = vmatprep.subr.bf16.mxu1 %v6614_v63  ;;  %v6624_v40 = vld [vmem:[#allocation107_spill] sm:$0xff]  ;;  %v6625_v63 = vld [vmem:[#allocation108_spill] sm:$0xff] }
 0x490   : > { %3705 = vmatpush1.bf16.msra.mxu0 %v6615_v36  ;;  %3833 = vmatpush1.bf16.msra.mxu1 %v6616_v53  ;;  %v6626_v36 = vld [vmem:[#allocation109_spill] sm:$0xff] }
 0x491   : > { %3707 = vmatprep.subr.bf16.mxu0 %v6617_v54  ;;  %3835 = vmatprep.subr.bf16.mxu1 %v6618_v60  ;;  %v6627_v54 = vld [vmem:[#allocation111_spill] sm:$0xff]  ;;  %v794_v60 = vld [vmem:[#allocation2 + $0x30] sm:$0xff] }
 0x494   : > { %3709 = vmatpush1.bf16.msra.mxu0 %v6619_v3  ;;  %3837 = vmatpush1.bf16.msra.mxu1 %v6620_v7  ;;  %v6628_v3 = vld [vmem:[#allocation112_spill] sm:$0xff] }
 0x495   : > { %3711 = vmatprep.subr.bf16.mxu0 %v6621_v8  ;;  %3839 = vmatprep.subr.bf16.mxu1 %v6622_v31  ;;  %v836_v8 = vadd.f32 %v5694_v0, %v794_v60  ;;  %v6630_v60 = vld [vmem:[#allocation27_spill] sm:$0xff] }
 0x498   : > { %3713 = vmatpush1.bf16.msra.mxu0 %v6623_v47  ;;  %3841 = vmatpush1.bf16.msra.mxu1 %v6624_v40 }
 0x499   : > { %3715 = vmatprep.subr.bf16.mxu0 %v6625_v63  ;;  %3843 = vmatprep.subr.bf16.mxu1 %v6626_v36  ;;  %v1684_v36 = vadd.f32 %v5788_v37, %v836_v8  ;;  %v6631_v8 = vld [vmem:[#allocation28_spill] sm:$0xff] }
 0x49b   : > { %4561 = vtanh.f32 %v1684_v36  ;;  %v6629_v36 = vld [vmem:[#allocation26_spill] sm:$0xff] }
 0x49c   : > { %3717 = vmatpush1.bf16.msra.mxu0 %v6546_v49  ;;  %3845 = vmatpush1.bf16.msra.mxu1 %v6627_v54 }
 0x49d   : > { %3719 = vmatprep.subr.bf16.mxu0 %v6628_v3  ;;  %3847 = vmatprep.subr.bf16.mxu1 %v6549_v9 }
 0x4a0   : > { %3721 = vmatpush1.bf16.msra.mxu0 %v6550_v58  ;;  %3849 = vmatpush1.bf16.msra.mxu1 %v6551_v27 }
 0x4a1   : > { %3723 = vmatprep.subr.bf16.mxu0 %v6552_v29  ;;  %3851 = vmatprep.subr.bf16.mxu1 %v6553_v50 }
 0x4a4   : > { %3725 = vmatpush1.bf16.msra.mxu0 %v6554_v28  ;;  %3853 = vmatpush1.bf16.msra.mxu1 %v6555_v46 }
 0x4a5   : > { %3727 = vmatprep.subr.bf16.mxu0 %v5524_v38  ;;  %3855 = vmatprep.subr.bf16.mxu1 %v6556_v13  ;;  %v4562_v37 = vpop.eup %4561 }
 0x4a8   : > { %3729 = vmatpush1.bf16.msra.mxu0 %v5530_v12  ;;  %3857 = vmatpush1.bf16.msra.mxu1 %v5534_v14 }
 0x4a9   : > { %3731 = vmatprep.subr.bf16.mxu0 %v5536_v22  ;;  %3859 = vmatprep.subr.bf16.mxu1 %v5539_v24 }
 0x4ac   : > { %3733 = vmatpush1.bf16.msra.mxu0 %v5542_v32  ;;  %3861 = vmatpush1.bf16.msra.mxu1 %v5546_v59 }
 0x4ad   : > { %3735 = vmatprep.subr.bf16.mxu0 %v5548_v2  ;;  %3863 = vmatprep.subr.bf16.mxu1 %v5551_v21 }
 0x4b0   : > { %3737 = vmatpush1.bf16.msra.mxu0 %v5554_v41  ;;  %3865 = vmatpush1.bf16.msra.mxu1 %v5558_v62 }
 0x4b1   : > { %3867 = vmatprep.subr.bf16.mxu0 %v5173_v20  ;;  %3995 = vmatprep.subr.bf16.mxu1 %v5177_v25 }
 0x4b3   : > { %1826 = vmatmul.mubr.f32.vlgmr.msra.gmra.mrb[4].mxu0 %v4562_v37  ;;  %1968 = vmatmul.mubr.f32.vlgmr.msra.gmra.mrb[4].mxu1 %v4562_v37  ;;  %v6632_v37 = vld [vmem:[#allocation29_spill] sm:$0xff] }
 0x4b4   : > { %3869 = vmatpush1.bf16.msra.mxu0 %v5179_v26  ;;  %3997 = vmatpush1.bf16.msra.mxu1 %v5182_v30 }
 0x4b5   : > { %3871 = vmatprep.subr.bf16.mxu0 %v5186_v34  ;;  %3999 = vmatprep.subr.bf16.mxu1 %v5188_v35 }
 0x4b8   : > { %3873 = vmatpush1.bf16.msra.mxu0 %v5191_v39  ;;  %4001 = vmatpush1.bf16.msra.mxu1 %v5195_v43 }
 0x4b9   : > { %3875 = vmatprep.subr.bf16.mxu0 %v5197_v44  ;;  %4003 = vmatprep.subr.bf16.mxu1 %v5199_v48 }
 0x4bc   : > { %3877 = vmatpush1.bf16.msra.mxu0 %v5202_v52  ;;  %4005 = vmatpush1.bf16.msra.mxu1 %v5206_v56 }
 0x4bd   : > { %3879 = vmatprep.subr.bf16.mxu0 %v5208_v57  ;;  %4007 = vmatprep.subr.bf16.mxu1 %v5211_v61 }
 0x4c0   : > { %3881 = vmatpush1.bf16.msra.mxu0 %v5214_v4  ;;  %4009 = vmatpush1.bf16.msra.mxu1 %v5218_v5  ;;  %v6633_v5 = vld [vmem:[#allocation30_spill] sm:$0xff] }
 0x4c1   : > { %3883 = vmatprep.subr.bf16.mxu0 %v5220_v6  ;;  %4011 = vmatprep.subr.bf16.mxu1 %v5223_v10  ;;  %v6634_v6 = vld [vmem:[#allocation31_spill] sm:$0xff]  ;;  %v6635_v10 = vld [vmem:[#allocation32_spill] sm:$0xff]  ;;  %v799_v4 = vld [vmem:[#allocation2 + $0x58] sm:$0xff] }
 0x4c4   : > { %3885 = vmatpush1.bf16.msra.mxu0 %v5226_v16  ;;  %4013 = vmatpush1.bf16.msra.mxu1 %v5230_v17  ;;  %v6636_v16 = vld [vmem:[#allocation33_spill] sm:$0xff]  ;;  %v6637_v17 = vld [vmem:[#allocation34_spill] sm:$0xff] }
 0x4c5   : > { %3887 = vmatprep.subr.bf16.mxu0 %v5232_v18  ;;  %4015 = vmatprep.subr.bf16.mxu1 %v5235_v23  ;;  %v6638_v18 = vld [vmem:[#allocation35_spill] sm:$0xff]  ;;  %v6639_v23 = vld [vmem:[#allocation36_spill] sm:$0xff] }
 0x4c8   : > { %3889 = vmatpush1.bf16.msra.mxu0 %v6629_v36  ;;  %4017 = vmatpush1.bf16.msra.mxu1 %v6630_v60  ;;  %v6640_v36 = vld [vmem:[#allocation37_spill] sm:$0xff]  ;;  %v6641_v60 = vld [vmem:[#allocation38_spill] sm:$0xff] }
 0x4c9   : > { %3891 = vmatprep.subr.bf16.mxu0 %v6631_v8  ;;  %4019 = vmatprep.subr.bf16.mxu1 %v6632_v37  ;;  %v6642_v8 = vld [vmem:[#allocation39_spill] sm:$0xff]  ;;  %v6643_v37 = vld [vmem:[#allocation40_spill] sm:$0xff] }
 0x4cc   : > { %3893 = vmatpush1.bf16.msra.mxu0 %v6633_v5  ;;  %4021 = vmatpush1.bf16.msra.mxu1 %v6634_v6  ;;  %v6644_v5 = vld [vmem:[#allocation41_spill] sm:$0xff]  ;;  %v6645_v6 = vld [vmem:[#allocation42_spill] sm:$0xff] }
 0x4cd   : > { %3895 = vmatprep.subr.bf16.mxu0 %v6635_v10  ;;  %4023 = vmatprep.subr.bf16.mxu1 %v6636_v16  ;;  %v6646_v10 = vld [vmem:[#allocation43_spill] sm:$0xff]  ;;  %v6647_v16 = vld [vmem:[#allocation44_spill] sm:$0xff] }
 0x4d0   : > { %3897 = vmatpush1.bf16.msra.mxu0 %v6637_v17  ;;  %4025 = vmatpush1.bf16.msra.mxu1 %v6638_v18  ;;  %v6648_v17 = vld [vmem:[#allocation45_spill] sm:$0xff]  ;;  %v6649_v18 = vld [vmem:[#allocation46_spill] sm:$0xff] }
 0x4d1   : > { %3899 = vmatprep.subr.bf16.mxu0 %v6639_v23  ;;  %4027 = vmatprep.subr.bf16.mxu1 %v6640_v36  ;;  %v6650_v23 = vld [vmem:[#allocation47_spill] sm:$0xff]  ;;  %v6651_v36 = vld [vmem:[#allocation48_spill] sm:$0xff] }
 0x4d4   : > { %3901 = vmatpush1.bf16.msra.mxu0 %v6641_v60  ;;  %4029 = vmatpush1.bf16.msra.mxu1 %v6642_v8  ;;  %v6652_v60 = vld [vmem:[#allocation49_spill] sm:$0xff]  ;;  %v6653_v8 = vld [vmem:[#allocation50_spill] sm:$0xff] }
 0x4d5   : > { %3903 = vmatprep.subr.bf16.mxu0 %v6643_v37  ;;  %4031 = vmatprep.subr.bf16.mxu1 %v6644_v5  ;;  %v6654_v37 = vld [vmem:[#allocation51_spill] sm:$0xff]  ;;  %v6655_v5 = vld [vmem:[#allocation52_spill] sm:$0xff] }
 0x4d8   : > { %3905 = vmatpush1.bf16.msra.mxu0 %v6645_v6  ;;  %4033 = vmatpush1.bf16.msra.mxu1 %v6646_v10  ;;  %v6656_v6 = vld [vmem:[#allocation53_spill] sm:$0xff]  ;;  %v6657_v10 = vld [vmem:[#allocation54_spill] sm:$0xff] }
 0x4d9   : > { %3907 = vmatprep.subr.bf16.mxu0 %v6647_v16  ;;  %4035 = vmatprep.subr.bf16.mxu1 %v6648_v17  ;;  %v6658_v16 = vld [vmem:[#allocation55_spill] sm:$0xff]  ;;  %v6659_v17 = vld [vmem:[#allocation56_spill] sm:$0xff] }
 0x4dc   : > { %3909 = vmatpush1.bf16.msra.mxu0 %v6649_v18  ;;  %4037 = vmatpush1.bf16.msra.mxu1 %v6650_v23  ;;  %v6660_v18 = vld [vmem:[#allocation57_spill] sm:$0xff]  ;;  %v6661_v23 = vld [vmem:[#allocation58_spill] sm:$0xff] }
 0x4dd   : > { %3911 = vmatprep.subr.bf16.mxu0 %v6651_v36  ;;  %4039 = vmatprep.subr.bf16.mxu1 %v6652_v60  ;;  %v6662_v36 = vld [vmem:[#allocation59_spill] sm:$0xff]  ;;  %v6663_v60 = vld [vmem:[#allocation60_spill] sm:$0xff] }
 0x4e0   : > { %3913 = vmatpush1.bf16.msra.mxu0 %v6653_v8  ;;  %4041 = vmatpush1.bf16.msra.mxu1 %v6654_v37  ;;  %v6664_v8 = vld [vmem:[#allocation61_spill] sm:$0xff]  ;;  %v6665_v37 = vld [vmem:[#allocation62_spill] sm:$0xff] }
 0x4e1   : > { %3915 = vmatprep.subr.bf16.mxu0 %v6655_v5  ;;  %4043 = vmatprep.subr.bf16.mxu1 %v6656_v6  ;;  %v6666_v5 = vld [vmem:[#allocation63_spill] sm:$0xff]  ;;  %v6667_v6 = vld [vmem:[#allocation64_spill] sm:$0xff] }
 0x4e4   : > { %3917 = vmatpush1.bf16.msra.mxu0 %v6657_v10  ;;  %4045 = vmatpush1.bf16.msra.mxu1 %v6658_v16  ;;  %v6668_v10 = vld [vmem:[#allocation65_spill] sm:$0xff]  ;;  %v6669_v16 = vld [vmem:[#allocation66_spill] sm:$0xff] }
 0x4e5   : > { %3919 = vmatprep.subr.bf16.mxu0 %v6659_v17  ;;  %4047 = vmatprep.subr.bf16.mxu1 %v6660_v18  ;;  %v6670_v17 = vld [vmem:[#allocation67_spill] sm:$0xff]  ;;  %v6671_v18 = vld [vmem:[#allocation68_spill] sm:$0xff] }
 0x4e8   : > { %3921 = vmatpush1.bf16.msra.mxu0 %v6661_v23  ;;  %4049 = vmatpush1.bf16.msra.mxu1 %v6662_v36  ;;  %v6672_v23 = vld [vmem:[#allocation69_spill] sm:$0xff]  ;;  %v796_v36 = vld [vmem:[#allocation2 + $0x40] sm:$0xff] }
 0x4e9   : > { %3923 = vmatprep.subr.bf16.mxu0 %v6663_v60  ;;  %4051 = vmatprep.subr.bf16.mxu1 %v6664_v8  ;;  %v797_v60 = vld [vmem:[#allocation2 + $0x48] sm:$0xff]  ;;  %v838_v8 = vadd.f32 %v5639_v15, %v796_v36 }
 0x4ec   : > { %3925 = vmatpush1.bf16.msra.mxu0 %v6665_v37  ;;  %4053 = vmatpush1.bf16.msra.mxu1 %v6666_v5  ;;  %v839_v37 = vadd.f32 %v5642_v1, %v797_v60  ;;  %v6683_v60 = vld [vmem:[#allocation86_spill] sm:$0xff] }
 0x4ed   : > { %3927 = vmatprep.subr.bf16.mxu0 %v6667_v6  ;;  %4055 = vmatprep.subr.bf16.mxu1 %v6668_v10  ;;  %v841_v10 = vadd.f32 %v5645_v45, %v799_v4  ;;  %v6675_v4 = vld [vmem:[#allocation78_spill] sm:$0xff] }
 0x4f0   : > { %3929 = vmatpush1.bf16.msra.mxu0 %v6669_v16  ;;  %4057 = vmatpush1.bf16.msra.mxu1 %v6670_v17 }
 0x4f1   : > { %3931 = vmatprep.subr.bf16.mxu0 %v6671_v18  ;;  %4059 = vmatprep.subr.bf16.mxu1 %v6672_v23 }
 0x586   : > { %v1827_v5 = vpop.f32.mrb[4].mxu0  ;;  %v5923_v61 = vpop.f32.mrb[4].mxu1 }
 0x587   : > { %v1829_v6 = vpop.f32.mrb[5].mxu0  ;;  %v1971_v16 = vpop.f32.mrb[5].mxu1  ;;  %v1974_v57 = vadd.f32 %v1827_v5, %v838_v8  ;;  %v6676_v5 = vld [vmem:[#allocation79_spill] sm:$0xff] }
 0x588   : > { %v1975_v17 = vadd.f32 %v1829_v6, %v839_v37  ;;  %v1977_v56 = vadd.f32 %v1971_v16, %v841_v10  ;;  %v6677_v6 = vld [vmem:[#allocation80_spill] sm:$0xff]  ;;  %v6678_v10 = vld [vmem:[#allocation81_spill] sm:$0xff]  ;;  %v6679_v16 = vld [vmem:[#allocation82_spill] sm:$0xff] }
 0x589   : > { %v6684_v8 = vld [vmem:[#allocation87_spill] sm:$0xff]  ;;  %v6685_v37 = vld [vmem:[#allocation88_spill] sm:$0xff] }
 0x58a   : > { %4563 = vtanh.f32 %v1975_v17  ;;  %v6680_v17 = vld [vmem:[#allocation83_spill] sm:$0xff] }
 0x58b   : > { %4565 = vtanh.f32 %v1974_v57  ;;  %v6674_v57 = vld [vmem:[#allocation77_spill] sm:$0xff] }
 0x58c   : > { %4567 = vtanh.f32 %v1977_v56  ;;  %v6673_v56 = vld [vmem:[#allocation76_spill] sm:$0xff] }
 0x594   : > { %v4564_v23 = vpop.eup %4563 }
 0x595   : > { %v4566_v18 = vpop.eup %4565  ;;  %2046 = vmatprep.mubr.f32.mxu0 %v4564_v23  ;;  %2188 = vmatprep.mubr.f32.mxu1 %v4564_v23  ;;  %v6682_v23 = vld [vmem:[#allocation85_spill] sm:$0xff] }
 0x596   : > { %2047 = vmatmul.mubr.f32.vlgmr.msra.gmra.mrb[6].mxu0 %v4566_v18  ;;  %2189 = vmatmul.mubr.f32.vlgmr.msra.gmra.mrb[6].mxu1 %v4566_v18  ;;  %v4568_v36 = vpop.eup %4567  ;;  %v6681_v18 = vld [vmem:[#allocation84_spill] sm:$0xff] }
 0x597   : > { %3933 = vmatpush1.bf16.msra.mxu0 %v6506_v11  ;;  %4061 = vmatpush1.bf16.msra.mxu1 %v6507_v19 }
 0x598   : > { %2117 = vmatprep.mubr.f32.mxu0 %v4568_v36  ;;  %2259 = vmatprep.mubr.f32.mxu1 %v4568_v36  ;;  %v6686_v36 = vld [vmem:[#allocation89_spill] sm:$0xff] }
 0x599   : > { %3935 = vmatprep.subr.bf16.mxu0 %v6508_v55  ;;  %4063 = vmatprep.subr.bf16.mxu1 %v6590_v42 }
 0x59b   : > { %3937 = vmatpush1.bf16.msra.mxu0 %v6591_v51  ;;  %4065 = vmatpush1.bf16.msra.mxu1 %v6592_v33 }
 0x59c   : > { %3939 = vmatprep.subr.bf16.mxu0 %v6673_v56  ;;  %4067 = vmatprep.subr.bf16.mxu1 %v6674_v57 }
 0x59f   : > { %3941 = vmatpush1.bf16.msra.mxu0 %v6675_v4  ;;  %4069 = vmatpush1.bf16.msra.mxu1 %v6676_v5  ;;  %v6687_v5 = vld [vmem:[#allocation90_spill] sm:$0xff] }
 0x5a0   : > { %3943 = vmatprep.subr.bf16.mxu0 %v6677_v6  ;;  %4071 = vmatprep.subr.bf16.mxu1 %v6678_v10  ;;  %v6688_v6 = vld [vmem:[#allocation91_spill] sm:$0xff]  ;;  %v6689_v10 = vld [vmem:[#allocation92_spill] sm:$0xff] }
 0x5a3   : > { %3945 = vmatpush1.bf16.msra.mxu0 %v6679_v16  ;;  %4073 = vmatpush1.bf16.msra.mxu1 %v6680_v17  ;;  %v6690_v16 = vld [vmem:[#allocation93_spill] sm:$0xff]  ;;  %v6691_v17 = vld [vmem:[#allocation94_spill] sm:$0xff] }
 0x5a4   : > { %3947 = vmatprep.subr.bf16.mxu0 %v6681_v18  ;;  %4075 = vmatprep.subr.bf16.mxu1 %v6682_v23  ;;  %v6692_v18 = vld [vmem:[#allocation95_spill] sm:$0xff]  ;;  %v6693_v23 = vld [vmem:[#allocation96_spill] sm:$0xff] }
 0x5a7   : > { %3949 = vmatpush1.bf16.msra.mxu0 %v6683_v60  ;;  %4077 = vmatpush1.bf16.msra.mxu1 %v6684_v8  ;;  %v6694_v60 = vld [vmem:[#allocation97_spill] sm:$0xff]  ;;  %v6695_v8 = vld [vmem:[#allocation98_spill] sm:$0xff] }
 0x5a8   : > { %3951 = vmatprep.subr.bf16.mxu0 %v6685_v37  ;;  %4079 = vmatprep.subr.bf16.mxu1 %v6686_v36  ;;  %v6696_v36 = vld [vmem:[#allocation100_spill] sm:$0xff] }
 0x5ab   : > { %3953 = vmatpush1.bf16.msra.mxu0 %v6687_v5  ;;  %4081 = vmatpush1.bf16.msra.mxu1 %v6688_v6  ;;  %v6697_v5 = vld [vmem:[#allocation101_spill] sm:$0xff]  ;;  %v6698_v6 = vld [vmem:[#allocation102_spill] sm:$0xff] }
 0x5ac   : > { %3955 = vmatprep.subr.bf16.mxu0 %v6689_v10  ;;  %4083 = vmatprep.subr.bf16.mxu1 %v6690_v16  ;;  %v6699_v16 = vld [vmem:[#allocation104_spill] sm:$0xff] }
 0x5af   : > { %3957 = vmatpush1.bf16.msra.mxu0 %v6691_v17  ;;  %4085 = vmatpush1.bf16.msra.mxu1 %v6692_v18 }
 0x5b0   : > { %3959 = vmatprep.subr.bf16.mxu0 %v6693_v23  ;;  %4087 = vmatprep.subr.bf16.mxu1 %v6694_v60 }
 0x5b3   : > { %3961 = vmatpush1.bf16.msra.mxu0 %v6695_v8  ;;  %4089 = vmatpush1.bf16.msra.mxu1 %v6616_v53  ;;  %v6700_v8 = vld [vmem:[#allocation109_spill] sm:$0xff] }
 0x5b4   : > { %3963 = vmatprep.subr.bf16.mxu0 %v6696_v36  ;;  %4091 = vmatprep.subr.bf16.mxu1 %v6697_v5  ;;  %v798_v5 = vld [vmem:[#allocation2 + $0x50] sm:$0xff] }
 0x5b7   : > { %3965 = vmatpush1.bf16.msra.mxu0 %v6698_v6  ;;  %4093 = vmatpush1.bf16.msra.mxu1 %v6620_v7 }
 0x5b8   : > { %3967 = vmatprep.subr.bf16.mxu0 %v6699_v16  ;;  %4095 = vmatprep.subr.bf16.mxu1 %v6622_v31  ;;  %v840_v16 = vadd.f32 %v5694_v0, %v798_v5  ;;  %v6712_v5 = vld [vmem:[#allocation26_spill] sm:$0xff] }
 0x5bb   : > { %3969 = vmatpush1.bf16.msra.mxu0 %v6623_v47  ;;  %4097 = vmatpush1.bf16.msra.mxu1 %v6624_v40 }
 0x5bc   : > { %3971 = vmatprep.subr.bf16.mxu0 %v6625_v63  ;;  %4099 = vmatprep.subr.bf16.mxu1 %v6700_v8  ;;  %v1976_v8 = vadd.f32 %v5923_v61, %v840_v16  ;;  %v6713_v16 = vld [vmem:[#allocation27_spill] sm:$0xff] }
 0x5be   : > { %4569 = vtanh.f32 %v1976_v8  ;;  %v6714_v8 = vld [vmem:[#allocation28_spill] sm:$0xff] }
 0x5bf   : > { %3973 = vmatpush1.bf16.msra.mxu0 %v6546_v49  ;;  %4101 = vmatpush1.bf16.msra.mxu1 %v6627_v54 }
 0x5c0   : > { %3975 = vmatprep.subr.bf16.mxu0 %v6628_v3  ;;  %4103 = vmatprep.subr.bf16.mxu1 %v6549_v9 }
 0x5c3   : > { %3977 = vmatpush1.bf16.msra.mxu0 %v6550_v58  ;;  %4105 = vmatpush1.bf16.msra.mxu1 %v6551_v27 }
 0x5c4   : > { %3979 = vmatprep.subr.bf16.mxu0 %v6552_v29  ;;  %4107 = vmatprep.subr.bf16.mxu1 %v6553_v50 }
 0x5c7   : > { %3981 = vmatpush1.bf16.msra.mxu0 %v6554_v28  ;;  %4109 = vmatpush1.bf16.msra.mxu1 %v6555_v46 }
 0x5c8   : > { %3983 = vmatprep.subr.bf16.mxu0 %v5524_v38  ;;  %4111 = vmatprep.subr.bf16.mxu1 %v6556_v13  ;;  %v4570_v61 = vpop.eup %4569 }
 0x5cb   : > { %3985 = vmatpush1.bf16.msra.mxu0 %v5530_v12  ;;  %4113 = vmatpush1.bf16.msra.mxu1 %v5534_v14 }
 0x5cc   : > { %3987 = vmatprep.subr.bf16.mxu0 %v5536_v22  ;;  %4115 = vmatprep.subr.bf16.mxu1 %v5539_v24 }
 0x5cf   : > { %3989 = vmatpush1.bf16.msra.mxu0 %v5542_v32  ;;  %4117 = vmatpush1.bf16.msra.mxu1 %v5546_v59 }
 0x5d0   : > { %3991 = vmatprep.subr.bf16.mxu0 %v5548_v2  ;;  %4119 = vmatprep.subr.bf16.mxu1 %v5551_v21 }
 0x5d3   : > { %3993 = vmatpush1.bf16.msra.mxu0 %v5554_v41  ;;  %4121 = vmatpush1.bf16.msra.mxu1 %v5558_v62 }
 0x5d4   : > { %4123 = vmatprep.subr.bf16.mxu0 %v5173_v20  ;;  %4251 = vmatprep.subr.bf16.mxu1 %v5177_v25  ;;  %v6701_v20 = vld [vmem:[#allocation15_spill] sm:$0xff]  ;;  %v6702_v25 = vld [vmem:[#allocation16_spill] sm:$0xff] }
 0x5d6   : > { %2118 = vmatmul.mubr.f32.vlgmr.msra.gmra.mrb[6].mxu0 %v4570_v61  ;;  %2260 = vmatmul.mubr.f32.vlgmr.msra.gmra.mrb[6].mxu1 %v4570_v61  ;;  %v6715_v61 = vld [vmem:[#allocation29_spill] sm:$0xff] }
 0x5d7   : > { %4125 = vmatpush1.bf16.msra.mxu0 %v5179_v26  ;;  %4253 = vmatpush1.bf16.msra.mxu1 %v5182_v30  ;;  %v6703_v26 = vld [vmem:[#allocation17_spill] sm:$0xff]  ;;  %v6704_v30 = vld [vmem:[#allocation18_spill] sm:$0xff] }
 0x5d8   : > { %4127 = vmatprep.subr.bf16.mxu0 %v5186_v34  ;;  %4255 = vmatprep.subr.bf16.mxu1 %v5188_v35  ;;  %v6705_v34 = vld [vmem:[#allocation19_spill] sm:$0xff]  ;;  %v6706_v35 = vld [vmem:[#allocation20_spill] sm:$0xff] }
 0x5db   : > { %4129 = vmatpush1.bf16.msra.mxu0 %v5191_v39  ;;  %4257 = vmatpush1.bf16.msra.mxu1 %v5195_v43  ;;  %v6707_v39 = vld [vmem:[#allocation21_spill] sm:$0xff]  ;;  %v6708_v43 = vld [vmem:[#allocation22_spill] sm:$0xff] }
 0x5dc   : > { %4131 = vmatprep.subr.bf16.mxu0 %v5197_v44  ;;  %4259 = vmatprep.subr.bf16.mxu1 %v5199_v48  ;;  %v6709_v44 = vld [vmem:[#allocation23_spill] sm:$0xff]  ;;  %v6710_v48 = vld [vmem:[#allocation24_spill] sm:$0xff] }
 0x5df   : > { %4133 = vmatpush1.bf16.msra.mxu0 %v5202_v52  ;;  %4261 = vmatpush1.bf16.msra.mxu1 %v6701_v20  ;;  %v6711_v52 = vld [vmem:[#allocation25_spill] sm:$0xff]  ;;  %v6716_v20 = vld [vmem:[#allocation30_spill] sm:$0xff] }
 0x5e0   : > { %4135 = vmatprep.subr.bf16.mxu0 %v6702_v25  ;;  %4263 = vmatprep.subr.bf16.mxu1 %v6703_v26  ;;  %v6717_v25 = vld [vmem:[#allocation31_spill] sm:$0xff]  ;;  %v6718_v26 = vld [vmem:[#allocation32_spill] sm:$0xff] }
 0x5e3   : > { %4137 = vmatpush1.bf16.msra.mxu0 %v6704_v30  ;;  %4265 = vmatpush1.bf16.msra.mxu1 %v6705_v34  ;;  %v6719_v30 = vld [vmem:[#allocation33_spill] sm:$0xff]  ;;  %v6720_v34 = vld [vmem:[#allocation34_spill] sm:$0xff] }
 0x5e4   : > { %4139 = vmatprep.subr.bf16.mxu0 %v6706_v35  ;;  %4267 = vmatprep.subr.bf16.mxu1 %v6707_v39  ;;  %v6721_v35 = vld [vmem:[#allocation35_spill] sm:$0xff]  ;;  %v6722_v39 = vld [vmem:[#allocation36_spill] sm:$0xff] }
 0x5e7   : > { %4141 = vmatpush1.bf16.msra.mxu0 %v6708_v43  ;;  %4269 = vmatpush1.bf16.msra.mxu1 %v6709_v44  ;;  %v6723_v43 = vld [vmem:[#allocation37_spill] sm:$0xff]  ;;  %v6724_v44 = vld [vmem:[#allocation38_spill] sm:$0xff] }
 0x5e8   : > { %4143 = vmatprep.subr.bf16.mxu0 %v6710_v48  ;;  %4271 = vmatprep.subr.bf16.mxu1 %v6711_v52  ;;  %v6725_v48 = vld [vmem:[#allocation39_spill] sm:$0xff]  ;;  %v6726_v52 = vld [vmem:[#allocation40_spill] sm:$0xff] }
 0x5eb   : > { %4145 = vmatpush1.bf16.msra.mxu0 %v6712_v5  ;;  %4273 = vmatpush1.bf16.msra.mxu1 %v6713_v16  ;;  %v6727_v5 = vld [vmem:[#allocation41_spill] sm:$0xff]  ;;  %v6728_v16 = vld [vmem:[#allocation42_spill] sm:$0xff] }
 0x5ec   : > { %4147 = vmatprep.subr.bf16.mxu0 %v6714_v8  ;;  %4275 = vmatprep.subr.bf16.mxu1 %v6715_v61  ;;  %v6729_v8 = vld [vmem:[#allocation43_spill] sm:$0xff]  ;;  %v6730_v61 = vld [vmem:[#allocation44_spill] sm:$0xff] }
 0x5ef   : > { %4149 = vmatpush1.bf16.msra.mxu0 %v6716_v20  ;;  %4277 = vmatpush1.bf16.msra.mxu1 %v6717_v25  ;;  %v6731_v20 = vld [vmem:[#allocation45_spill] sm:$0xff]  ;;  %v6732_v25 = vld [vmem:[#allocation46_spill] sm:$0xff] }
 0x5f0   : > { %4151 = vmatprep.subr.bf16.mxu0 %v6718_v26  ;;  %4279 = vmatprep.subr.bf16.mxu1 %v6719_v30  ;;  %v6733_v26 = vld [vmem:[#allocation47_spill] sm:$0xff]  ;;  %v6734_v30 = vld [vmem:[#allocation48_spill] sm:$0xff] }
 0x5f3   : > { %4153 = vmatpush1.bf16.msra.mxu0 %v6720_v34  ;;  %4281 = vmatpush1.bf16.msra.mxu1 %v6721_v35  ;;  %v6735_v34 = vld [vmem:[#allocation49_spill] sm:$0xff]  ;;  %v6736_v35 = vld [vmem:[#allocation50_spill] sm:$0xff] }
 0x5f4   : > { %4155 = vmatprep.subr.bf16.mxu0 %v6722_v39  ;;  %4283 = vmatprep.subr.bf16.mxu1 %v6723_v43  ;;  %v6737_v39 = vld [vmem:[#allocation51_spill] sm:$0xff]  ;;  %v6738_v43 = vld [vmem:[#allocation52_spill] sm:$0xff] }
 0x5f7   : > { %4157 = vmatpush1.bf16.msra.mxu0 %v6724_v44  ;;  %4285 = vmatpush1.bf16.msra.mxu1 %v6725_v48  ;;  %v6739_v44 = vld [vmem:[#allocation53_spill] sm:$0xff]  ;;  %v6740_v48 = vld [vmem:[#allocation54_spill] sm:$0xff] }
 0x5f8   : > { %4159 = vmatprep.subr.bf16.mxu0 %v6726_v52  ;;  %4287 = vmatprep.subr.bf16.mxu1 %v6727_v5  ;;  %v6741_v52 = vld [vmem:[#allocation55_spill] sm:$0xff]  ;;  %v6742_v5 = vld [vmem:[#allocation56_spill] sm:$0xff] }
 0x5fb   : > { %4161 = vmatpush1.bf16.msra.mxu0 %v6728_v16  ;;  %4289 = vmatpush1.bf16.msra.mxu1 %v6729_v8  ;;  %v6743_v16 = vld [vmem:[#allocation57_spill] sm:$0xff]  ;;  %v6744_v8 = vld [vmem:[#allocation58_spill] sm:$0xff] }
 0x5fc   : > { %4163 = vmatprep.subr.bf16.mxu0 %v6730_v61  ;;  %4291 = vmatprep.subr.bf16.mxu1 %v6731_v20  ;;  %v6745_v61 = vld [vmem:[#allocation59_spill] sm:$0xff]  ;;  %v6746_v20 = vld [vmem:[#allocation60_spill] sm:$0xff] }
 0x5ff   : > { %4165 = vmatpush1.bf16.msra.mxu0 %v6732_v25  ;;  %4293 = vmatpush1.bf16.msra.mxu1 %v6733_v26  ;;  %v6747_v25 = vld [vmem:[#allocation61_spill] sm:$0xff]  ;;  %v6748_v26 = vld [vmem:[#allocation62_spill] sm:$0xff] }
 0x600   : > { %4167 = vmatprep.subr.bf16.mxu0 %v6734_v30  ;;  %4295 = vmatprep.subr.bf16.mxu1 %v6735_v34  ;;  %v6749_v30 = vld [vmem:[#allocation63_spill] sm:$0xff]  ;;  %v6750_v34 = vld [vmem:[#allocation64_spill] sm:$0xff] }
 0x603   : > { %4169 = vmatpush1.bf16.msra.mxu0 %v6736_v35  ;;  %4297 = vmatpush1.bf16.msra.mxu1 %v6737_v39  ;;  %v6751_v35 = vld [vmem:[#allocation65_spill] sm:$0xff]  ;;  %v6752_v39 = vld [vmem:[#allocation66_spill] sm:$0xff] }
 0x604   : > { %4171 = vmatprep.subr.bf16.mxu0 %v6738_v43  ;;  %4299 = vmatprep.subr.bf16.mxu1 %v6739_v44  ;;  %v6753_v43 = vld [vmem:[#allocation67_spill] sm:$0xff]  ;;  %v6754_v44 = vld [vmem:[#allocation68_spill] sm:$0xff] }
 0x607   : > { %4173 = vmatpush1.bf16.msra.mxu0 %v6740_v48  ;;  %4301 = vmatpush1.bf16.msra.mxu1 %v6741_v52  ;;  %v6755_v48 = vld [vmem:[#allocation69_spill] sm:$0xff]  ;;  %v800_v52 = vld [vmem:[#allocation2 + $0x60] sm:$0xff] }
 0x608   : > { %4175 = vmatprep.subr.bf16.mxu0 %v6742_v5  ;;  %4303 = vmatprep.subr.bf16.mxu1 %v6743_v16  ;;  %v801_v5 = vld [vmem:[#allocation2 + $0x68] sm:$0xff]  ;;  %v803_v16 = vld [vmem:[#allocation2 + $0x78] sm:$0xff] }
 0x60b   : > { %4177 = vmatpush1.bf16.msra.mxu0 %v6744_v8  ;;  %4305 = vmatpush1.bf16.msra.mxu1 %v6745_v61  ;;  %v842_v8 = vadd.f32 %v5639_v15, %v800_v52  ;;  %v843_v61 = vadd.f32 %v5642_v1, %v801_v5  ;;  %v6756_v5 = vld [vmem:[#allocation79_spill] sm:$0xff] }
 0x60c   : > { %4179 = vmatprep.subr.bf16.mxu0 %v6746_v20  ;;  %4307 = vmatprep.subr.bf16.mxu1 %v6747_v25 }
 0x60f   : > { %4181 = vmatpush1.bf16.msra.mxu0 %v6748_v26  ;;  %4309 = vmatpush1.bf16.msra.mxu1 %v6749_v30  ;;  %v845_v26 = vadd.f32 %v5645_v45, %v803_v16  ;;  %v6759_v16 = vld [vmem:[#allocation82_spill] sm:$0xff] }
 0x610   : > { %4183 = vmatprep.subr.bf16.mxu0 %v6750_v34  ;;  %4311 = vmatprep.subr.bf16.mxu1 %v6751_v35 }
 0x613   : > { %4185 = vmatpush1.bf16.msra.mxu0 %v6752_v39  ;;  %4313 = vmatpush1.bf16.msra.mxu1 %v6753_v43 }
 0x614   : > { %4187 = vmatprep.subr.bf16.mxu0 %v6754_v44  ;;  %4315 = vmatprep.subr.bf16.mxu1 %v6755_v48 }
 0x6a9   : > { %v2119_v20 = vpop.f32.mrb[6].mxu0  ;;  %v6058_v25 = vpop.f32.mrb[6].mxu1 }
 0x6aa   : > { %v2121_v30 = vpop.f32.mrb[7].mxu0  ;;  %v2263_v34 = vpop.f32.mrb[7].mxu1  ;;  %v2266_v35 = vadd.f32 %v2119_v20, %v842_v8  ;;  %v6767_v8 = vld [vmem:[#allocation91_spill] sm:$0xff]  ;;  %v6769_v20 = vld [vmem:[#allocation98_spill] sm:$0xff] }
 0x6ab   : > { %v2267_v39 = vadd.f32 %v2121_v30, %v843_v61  ;;  %v2269_v43 = vadd.f32 %v2263_v34, %v845_v26  ;;  %v6768_v61 = vld [vmem:[#allocation93_spill] sm:$0xff]  ;;  %v2602_v34 = vld [vmem:[#allocation9 + $0x120] sm:$0xff] }
 0x6ad   : > { %4571 = vtanh.f32 %v2267_v39  ;;  %v2588_v39 = vld [vmem:[#allocation9 + $0xb0] sm:$0xff] }
 0x6ae   : > { %4573 = vtanh.f32 %v2266_v35  ;;  %v2603_v35 = vld [vmem:[#allocation9 + $0x128] sm:$0xff] }
 0x6af   : > { %4575 = vtanh.f32 %v2269_v43  ;;  %v2589_v43 = vld [vmem:[#allocation9 + $0xb8] sm:$0xff] }
 0x6b7   : > { %v4572_v44 = vpop.eup %4571 }
 0x6b8   : > { %v4574_v48 = vpop.eup %4573  ;;  %2338 = vmatprep.mubr.f32.mxu0 %v4572_v44  ;;  %2480 = vmatprep.mubr.f32.mxu1 %v4572_v44  ;;  %v2620_v44 = vld [vmem:[#allocation9 + $0x1b0] sm:$0xff] }
 0x6b9   : > { %2339 = vmatmul.mubr.f32.vlgmr.msra.gmra.mrb[8].mxu0 %v4574_v48  ;;  %2481 = vmatmul.mubr.f32.vlgmr.msra.gmra.mrb[8].mxu1 %v4574_v48  ;;  %v4576_v52 = vpop.eup %4575  ;;  %v2621_v48 = vld [vmem:[#allocation9 + $0x1b8] sm:$0xff] }
 0x6ba   : > { %4189 = vmatpush1.bf16.msra.mxu0 %v6506_v11  ;;  %4317 = vmatpush1.bf16.msra.mxu1 %v6507_v19  ;;  %v6757_v11 = vld [vmem:[#allocation80_spill] sm:$0xff]  ;;  %v6758_v19 = vld [vmem:[#allocation81_spill] sm:$0xff] }
 0x6bb   : > { %2409 = vmatprep.mubr.f32.mxu0 %v4576_v52  ;;  %2551 = vmatprep.mubr.f32.mxu1 %v4576_v52 }
 0x6bc   : > { %4191 = vmatprep.subr.bf16.mxu0 %v6508_v55  ;;  %4319 = vmatprep.subr.bf16.mxu1 %v6590_v42  ;;  %v6760_v55 = vld [vmem:[#allocation83_spill] sm:$0xff]  ;;  %v6761_v42 = vld [vmem:[#allocation84_spill] sm:$0xff] }
 0x6be   : > { %4193 = vmatpush1.bf16.msra.mxu0 %v6591_v51  ;;  %4321 = vmatpush1.bf16.msra.mxu1 %v6592_v33  ;;  %v6762_v51 = vld [vmem:[#allocation85_spill] sm:$0xff]  ;;  %v6763_v33 = vld [vmem:[#allocation86_spill] sm:$0xff] }
 0x6bf   : > { %4195 = vmatprep.subr.bf16.mxu0 %v6673_v56  ;;  %4323 = vmatprep.subr.bf16.mxu1 %v6674_v57  ;;  %v6764_v56 = vld [vmem:[#allocation87_spill] sm:$0xff]  ;;  %v6765_v57 = vld [vmem:[#allocation89_spill] sm:$0xff] }
 0x6c2   : > { %4197 = vmatpush1.bf16.msra.mxu0 %v6675_v4  ;;  %4325 = vmatpush1.bf16.msra.mxu1 %v6756_v5  ;;  %v6766_v4 = vld [vmem:[#allocation90_spill] sm:$0xff]  ;;  %v4420_v5 = vpack.c.bf16 %v2603_v35, %v2602_v34  ;;  %v2612_v34 = vld [vmem:[#allocation9 + $0x170] sm:$0xff] }
 0x6c3   : > { %4199 = vmatprep.subr.bf16.mxu0 %v6757_v11  ;;  %4327 = vmatprep.subr.bf16.mxu1 %v6758_v19  ;;  %v2572_v11 = vld [vmem:[#allocation9 + $0x30] sm:$0xff]  ;;  %v4390_v19 = vpack.c.bf16 %v2589_v43, %v2588_v39  ;;  %v2613_v35 = vld [vmem:[#allocation9 + $0x178] sm:$0xff] }
 0x6c4   : > { %v4440_v43 = vpack.c.bf16 %v2613_v35, %v2612_v34 }
 0x6c6   : > { %4201 = vmatpush1.bf16.msra.mxu0 %v6759_v16  ;;  %4329 = vmatpush1.bf16.msra.mxu1 %v6760_v55  ;;  %v4422_v16 = vpack.c.bf16 %v2621_v48, %v2620_v44  ;;  %v2573_v55 = vld [vmem:[#allocation9 + $0x38] sm:$0xff]  ;;  %v805_v48 = vld [vmem:[#allocation2 + $0x88] sm:$0xff] }
 0x6c7   : > { %4203 = vmatprep.subr.bf16.mxu0 %v6761_v42  ;;  %4331 = vmatprep.subr.bf16.mxu1 %v6762_v51  ;;  %v2604_v42 = vld [vmem:[#allocation9 + $0x130] sm:$0xff]  ;;  %v2605_v51 = vld [vmem:[#allocation9 + $0x138] sm:$0xff] }
 0x6c8   : > { %v804_v44 = vld [vmem:[#allocation2 + $0x80] sm:$0xff] }
 0x6ca   : > { %4205 = vmatpush1.bf16.msra.mxu0 %v6763_v33  ;;  %4333 = vmatpush1.bf16.msra.mxu1 %v6764_v56  ;;  %v4392_v33 = vpack.c.bf16 %v2573_v55, %v2572_v11  ;;  %v4424_v56 = vpack.c.bf16 %v2605_v51, %v2604_v42  ;;  %v846_v11 = vadd.f32 %v5639_v15, %v804_v44 }
 0x6cb   : > { %4207 = vmatprep.subr.bf16.mxu0 %v6685_v37  ;;  %4335 = vmatprep.subr.bf16.mxu1 %v6765_v57  ;;  %v6770_v37 = vld [vmem:[#allocation101_spill] sm:$0xff]  ;;  %v2590_v57 = vld [vmem:[#allocation9 + $0xc0] sm:$0xff] }
 0x6ce   : > { %4209 = vmatpush1.bf16.msra.mxu0 %v6766_v4  ;;  %4337 = vmatpush1.bf16.msra.mxu1 %v6767_v8  ;;  %v2591_v4 = vld [vmem:[#allocation9 + $0xc8] sm:$0xff] }
 0x6cf   : > { %4211 = vmatprep.subr.bf16.mxu0 %v6689_v10  ;;  %4339 = vmatprep.subr.bf16.mxu1 %v6768_v61  ;;  %v6771_v10 = vld [vmem:[#allocation104_spill] sm:$0xff]  ;;  %v4394_v8 = vpack.c.bf16 %v2591_v4, %v2590_v57  ;;  %v2622_v61 = vld [vmem:[#allocation9 + $0x1c0] sm:$0xff] }
 0x6d2   : > { %4213 = vmatpush1.bf16.msra.mxu0 %v6691_v17  ;;  %4341 = vmatpush1.bf16.msra.mxu1 %v6692_v18  ;;  %v6772_v17 = vld [vmem:[#allocation109_spill] sm:$0xff]  ;;  %v2587_v18 = vld [vmem:[#allocation9 + $0xa8] sm:$0xff] }
 0x6d3   : > { %4215 = vmatprep.subr.bf16.mxu0 %v6693_v23  ;;  %4343 = vmatprep.subr.bf16.mxu1 %v6694_v60  ;;  %v2618_v23 = vld [vmem:[#allocation9 + $0x1a0] sm:$0xff]  ;;  %v2619_v60 = vld [vmem:[#allocation9 + $0x1a8] sm:$0xff] }
 0x6d4   : > { %v4418_v30 = vpack.c.bf16 %v2619_v60, %v2618_v23  ;;  %v2597_v60 = vld [vmem:[#allocation9 + $0xf8] sm:$0xff] }
 0x6d6   : > { %4217 = vmatpush1.bf16.msra.mxu0 %v6769_v20  ;;  %4345 = vmatpush1.bf16.msra.mxu1 %v6616_v53  ;;  %v802_v53 = vld [vmem:[#allocation2 + $0x70] sm:$0xff] }
 0x6d7   : > { %4219 = vmatprep.subr.bf16.mxu0 %v6696_v36  ;;  %4347 = vmatprep.subr.bf16.mxu1 %v6770_v37  ;;  %v2570_v36 = vld [vmem:[#allocation9 + $0x20] sm:$0xff]  ;;  %v2623_v20 = vld [vmem:[#allocation9 + $0x1c8] sm:$0xff] }
 0x6d8   : > { %v4426_v37 = vpack.c.bf16 %v2623_v20, %v2622_v61 }
 0x6da   : > { %4221 = vmatpush1.bf16.msra.mxu0 %v6698_v6  ;;  %4349 = vmatpush1.bf16.msra.mxu1 %v6620_v7  ;;  %v844_v7 = vadd.f32 %v5694_v0, %v802_v53  ;;  %v2606_v53 = vld [vmem:[#allocation9 + $0x140] sm:$0xff] }
 0x6db   : > { %4223 = vmatprep.subr.bf16.mxu0 %v6771_v10  ;;  %4351 = vmatprep.subr.bf16.mxu1 %v6622_v31  ;;  %v2574_v10 = vld [vmem:[#allocation9 + $0x40] sm:$0xff] }
 0x6dc   : > { %v2268_v31 = vadd.f32 %v6058_v25, %v844_v7  ;;  %v2571_v25 = vld [vmem:[#allocation9 + $0x28] sm:$0xff] }
 0x6dd   : > { %v4388_v52 = vpack.c.bf16 %v2571_v25, %v2570_v36  ;;  %v2607_v7 = vld [vmem:[#allocation9 + $0x148] sm:$0xff] }
 0x6de   : > { %4225 = vmatpush1.bf16.msra.mxu0 %v6623_v47  ;;  %4353 = vmatpush1.bf16.msra.mxu1 %v6624_v40  ;;  %4577 = vtanh.f32 %v2268_v31  ;;  %v2600_v47 = vld [vmem:[#allocation9 + $0x110] sm:$0xff]  ;;  %v2601_v40 = vld [vmem:[#allocation9 + $0x118] sm:$0xff] }
 0x6df   : > { %4227 = vmatprep.subr.bf16.mxu0 %v6625_v63  ;;  %4355 = vmatprep.subr.bf16.mxu1 %v6772_v17  ;;  %v2586_v63 = vld [vmem:[#allocation9 + $0xa0] sm:$0xff]  ;;  %v2575_v17 = vld [vmem:[#allocation9 + $0x48] sm:$0xff] }
 0x6e0   : > { %v4386_v26 = vpack.c.bf16 %v2587_v18, %v2586_v63  ;;  %v4396_v31 = vpack.c.bf16 %v2575_v17, %v2574_v10  ;;  %v2610_v63 = vld [vmem:[#allocation9 + $0x160] sm:$0xff]  ;;  %v2596_v18 = vld [vmem:[#allocation9 + $0xf0] sm:$0xff] }
 0x6e1   : > { %v4406_v36 = vpack.c.bf16 %v2597_v60, %v2596_v18  ;;  %v2894_v10 = vld [vmem:[#allocation11] ss:$0 sm:$0xff] }
 0x6e2   : > { %4229 = vmatpush1.bf16.msra.mxu0 %v6546_v49  ;;  %4357 = vmatpush1.bf16.msra.mxu1 %v6627_v54  ;;  %v2567_v49 = vld [vmem:[#allocation9 + $0x8] sm:$0xff]  ;;  %v2568_v54 = vld [vmem:[#allocation9 + $0x10] sm:$0xff] }
 0x6e3   : > { %4231 = vmatprep.subr.bf16.mxu0 %v6628_v3  ;;  %4359 = vmatprep.subr.bf16.mxu1 %v6549_v9  ;;  %v2616_v9 = vld [vmem:[#allocation9 + $0x190] sm:$0xff]  ;;  %v2569_v3 = vld [vmem:[#allocation9 + $0x18] sm:$0xff] }
 0x6e6   : > { %4233 = vmatpush1.bf16.msra.mxu0 %v6550_v58  ;;  %4361 = vmatpush1.bf16.msra.mxu1 %v6551_v27  ;;  %v2582_v58 = vld [vmem:[#allocation9 + $0x80] sm:$0xff]  ;;  %v2583_v27 = vld [vmem:[#allocation9 + $0x88] sm:$0xff] }
 0x6e7   : > { %4235 = vmatprep.subr.bf16.mxu0 %v6552_v29  ;;  %4363 = vmatprep.subr.bf16.mxu1 %v6553_v50  ;;  %v2614_v29 = vld [vmem:[#allocation9 + $0x180] sm:$0xff]  ;;  %v2615_v50 = vld [vmem:[#allocation9 + $0x188] sm:$0xff] }
 0x6e8   : > { %v4578_v6 = vpop.eup %4577 }
 0x6ea   : > { %4237 = vmatpush1.bf16.msra.mxu0 %v6554_v28  ;;  %4365 = vmatpush1.bf16.msra.mxu1 %v6555_v46  ;;  %v2584_v46 = vld [vmem:[#allocation9 + $0x90] sm:$0xff]  ;;  %v2617_v28 = vld [vmem:[#allocation9 + $0x198] sm:$0xff] }
 0x6eb   : > { %4239 = vmatprep.subr.bf16.mxu0 %v5524_v38  ;;  %4367 = vmatprep.subr.bf16.mxu1 %v6556_v13  ;;  %v2566_v38 = vld [vmem:[#allocation9] sm:$0xff] }
 0x6ec   : > { %v2598_v13 = vld [vmem:[#allocation9 + $0x100] sm:$0xff] }
 0x6ee   : > { %4241 = vmatpush1.bf16.msra.mxu0 %v5530_v12  ;;  %4369 = vmatpush1.bf16.msra.mxu1 %v5534_v14  ;;  %v4378_v12 = vpack.c.bf16 %v2583_v27, %v2582_v58  ;;  %v4410_v14 = vpack.c.bf16 %v2615_v50, %v2614_v29  ;;  %v4428_v58 = vpack.c.bf16 %v2607_v7, %v2606_v53  ;;  %v2592_v27 = vld [vmem:[#allocation9 + $0xd0] sm:$0xff]  ;;  %v2593_v29 = vld [vmem:[#allocation9 + $0xd8] sm:$0xff] }
 0x6ef   : > { %4243 = vmatprep.subr.bf16.mxu0 %v5536_v22  ;;  %4371 = vmatprep.subr.bf16.mxu1 %v5539_v24  ;;  %v2599_v22 = vld [vmem:[#allocation9 + $0x108] sm:$0xff]  ;;  %v2585_v24 = vld [vmem:[#allocation9 + $0x98] sm:$0xff]  ;;  %v2624_v50 = vld [vmem:[#allocation9 + $0x1d0] sm:$0xff] }
 0x6f2   : > { %4245 = vmatpush1.bf16.msra.mxu0 %v5542_v32  ;;  %4373 = vmatpush1.bf16.msra.mxu1 %v5546_v59  ;;  %v4380_v32 = vpack.c.bf16 %v2567_v49, %v2566_v38  ;;  %v4412_v59 = vpack.c.bf16 %v2599_v22, %v2598_v13  ;;  %v4398_v38 = vpack.c.bf16 %v2593_v29, %v2592_v27  ;;  %v2625_v49 = vld [vmem:[#allocation9 + $0x1d8] sm:$0xff] }
 0x6f3   : > { %4247 = vmatprep.subr.bf16.mxu0 %v5548_v2  ;;  %4375 = vmatprep.subr.bf16.mxu1 %v5551_v21  ;;  %v4382_v2 = vpack.c.bf16 %v2585_v24, %v2584_v46  ;;  %v4414_v21 = vpack.c.bf16 %v2617_v28, %v2616_v9  ;;  %v4430_v13 = vpack.c.bf16 %v2625_v49, %v2624_v50  ;;  %v2608_v46 = vld [vmem:[#allocation9 + $0x150] sm:$0xff]  ;;  %v2609_v24 = vld [vmem:[#allocation9 + $0x158] sm:$0xff]  ;;  %v2594_v28 = vld [vmem:[#allocation9 + $0xe0] sm:$0xff] }
 0x6f4   : > { %v4432_v9 = vpack.c.bf16 %v2609_v24, %v2608_v46 }
 0x6f6   : > { %4249 = vmatpush1.bf16.msra.mxu0 %v5554_v41  ;;  %4377 = vmatpush1.bf16.msra.mxu1 %v5558_v62  ;;  %v4384_v41 = vpack.c.bf16 %v2569_v3, %v2568_v54  ;;  %v4416_v62 = vpack.c.bf16 %v2601_v40, %v2600_v47  ;;  %v2627_v3 = vld [vmem:[#allocation9 + $0x1e8] sm:$0xff] }
 0x6f7   : > { %4379 = vmatprep.subr.bf16.mxu0 %v4378_v12  ;;  %4411 = vmatprep.subr.bf16.mxu1 %v4410_v14  ;;  %v2576_v12 = vld [vmem:[#allocation9 + $0x50] sm:$0xff]  ;;  %v2577_v14 = vld [vmem:[#allocation9 + $0x58] sm:$0xff] }
 0x6f8   : > { %v4400_v22 = vpack.c.bf16 %v2577_v14, %v2576_v12 }
 0x6f9   : > { %2410 = vmatmul.mubr.f32.vlgmr.msra.gmra.mrb[8].mxu0 %v4578_v6  ;;  %2552 = vmatmul.mubr.f32.vlgmr.msra.gmra.mrb[8].mxu1 %v4578_v6  ;;  %v2611_v6 = vld [vmem:[#allocation9 + $0x168] sm:$0xff] }
 0x6fa   : > { %4381 = vmatpush3.bf16.msra.mxu0 %v4380_v32  ;;  %4413 = vmatpush3.bf16.msra.mxu1 %v4412_v59  ;;  %v2595_v32 = vld [vmem:[#allocation9 + $0xe8] sm:$0xff]  ;;  %v2626_v59 = vld [vmem:[#allocation9 + $0x1e0] sm:$0xff]  ;;  %v4436_v23 = vpack.c.bf16 %v2611_v6, %v2610_v63 }
 0x6fb   : > { %4383 = vmatprep.subr.bf16.mxu0 %v4382_v2  ;;  %4415 = vmatprep.subr.bf16.mxu1 %v4414_v21  ;;  %v4402_v54 = vpack.c.bf16 %v2595_v32, %v2594_v28  ;;  %v2578_v2 = vld [vmem:[#allocation9 + $0x60] sm:$0xff]  ;;  %v2579_v21 = vld [vmem:[#allocation9 + $0x68] sm:$0xff]  ;;  %v4434_v47 = vpack.c.bf16 %v2627_v3, %v2626_v59 }
 0x6fc   : > { %v4404_v40 = vpack.c.bf16 %v2579_v21, %v2578_v2 }
 0x6fe   : > { %4385 = vmatpush3.bf16.msra.mxu0 %v4384_v41  ;;  %4417 = vmatpush3.bf16.msra.mxu1 %v4416_v62  ;;  %v2628_v41 = vld [vmem:[#allocation9 + $0x1f0] sm:$0xff]  ;;  %v2629_v62 = vld [vmem:[#allocation9 + $0x1f8] sm:$0xff] }
 0x6ff   : > { %4387 = vmatprep.subr.bf16.mxu0 %v4386_v26  ;;  %4419 = vmatprep.subr.bf16.mxu1 %v4418_v30  ;;  %v4438_v25 = vpack.c.bf16 %v2629_v62, %v2628_v41  ;;  %v2580_v26 = vld [vmem:[#allocation9 + $0x70] sm:$0xff]  ;;  %v2581_v30 = vld [vmem:[#allocation9 + $0x78] sm:$0xff] }
 0x700   : > { %v4408_v39 = vpack.c.bf16 %v2581_v30, %v2580_v26 }
 0x702   : > { %4389 = vmatpush3.bf16.msra.mxu0 %v4388_v52  ;;  %4421 = vmatpush3.bf16.msra.mxu1 %v4420_v5  ;;  %v807_v52 = vld [vmem:[#allocation2 + $0x98] sm:$0xff]  ;;  %v806_v5 = vld [vmem:[#allocation2 + $0x90] sm:$0xff] }
 0x703   : > { %4391 = vmatprep.subr.bf16.mxu0 %v4390_v19  ;;  %4423 = vmatprep.subr.bf16.mxu1 %v4422_v16  ;;  %v847_v19 = vadd.f32 %v5642_v1, %v805_v48  ;;  %v849_v16 = vadd.f32 %v5645_v45, %v807_v52  ;;  %v848_v55 = vadd.f32 %v5694_v0, %v806_v5 }
 0x706   : > { %4393 = vmatpush3.bf16.msra.mxu0 %v4392_v33  ;;  %4425 = vmatpush3.bf16.msra.mxu1 %v4424_v56 }
 0x707   : > { %4395 = vmatprep.subr.bf16.mxu0 %v4394_v8  ;;  %4427 = vmatprep.subr.bf16.mxu1 %v4426_v37 }
 0x70a   : > { %4397 = vmatpush3.bf16.msra.mxu0 %v4396_v31  ;;  %4429 = vmatpush3.bf16.msra.mxu1 %v4428_v58 }
 0x70b   : > { %4399 = vmatprep.subr.bf16.mxu0 %v4398_v38  ;;  %4431 = vmatprep.subr.bf16.mxu1 %v4430_v13 }
 0x70e   : > { %4401 = vmatpush3.bf16.msra.mxu0 %v4400_v22  ;;  %4433 = vmatpush3.bf16.msra.mxu1 %v4432_v9 }
 0x70f   : > { %4403 = vmatprep.subr.bf16.mxu0 %v4402_v54  ;;  %4435 = vmatprep.subr.bf16.mxu1 %v4434_v47 }
 0x712   : > { %4405 = vmatpush3.bf16.msra.mxu0 %v4404_v40  ;;  %4437 = vmatpush3.bf16.msra.mxu1 %v4436_v23 }
 0x713   : > { %4407 = vmatprep.subr.bf16.mxu0 %v4406_v36  ;;  %4439 = vmatprep.subr.bf16.mxu1 %v4438_v25 }
 0x716   : > { %4409 = vmatpush3.bf16.msra.mxu0 %v4408_v39  ;;  %4441 = vmatpush3.bf16.msra.mxu1 %v4440_v43 }
 0x7cc   : > { %v2411_v42 = vpop.f32.mrb[8].mxu0  ;;  %v2553_v51 = vpop.f32.mrb[8].mxu1 }
 0x7cd   : > { %v2558_v33 = vadd.f32 %v2411_v42, %v846_v11  ;;  %v2413_v56 = vpop.f32.mrb[9].mxu0  ;;  %v2555_v57 = vpop.f32.mrb[9].mxu1  ;;  %v2560_v61 = vadd.f32 %v2553_v51, %v848_v55 }
 0x7ce   : > { %v2559_v4 = vadd.f32 %v2413_v56, %v847_v19  ;;  %v2561_v8 = vadd.f32 %v2555_v57, %v849_v16 }
 0x7cf   : > { %4579 = vtanh.f32 %v2558_v33 }
 0x7d0   : > { %4581 = vtanh.f32 %v2559_v4 }
 0x7d1   : > { %4583 = vtanh.f32 %v2561_v8 }
 0x7d2   : > { %4585 = vtanh.f32 %v2560_v61 }
 0x7d9   : > { %v4580_v20 = vpop.eup %4579 }
 0x7da   : > { %v4582_v15 = vpop.eup %4581 }
 0x7db   : > { %v4584_v37 = vpop.eup %4583  ;;  %2701 = vmatprep.mubr.f32.mxu0 %v4582_v15 }
 0x7dc   : > { %v4586_v1 = vpop.eup %4585  ;;  %2771 = vmatprep.mubr.f32.mxu1 %v4584_v37  ;;  %2702 = vmatmul.mubr.f32.vlgmr.msra.gmra.mrb[10].mxu0 %v4580_v20 }
 0x7dd   : > { %2772 = vmatmul.mubr.f32.vlgmr.msra.gmra.mrb[10].mxu1 %v4586_v1 }
 0x8af   : > { %v2932_v45 = vpop.f32.mrb[10].mxu0 }
 0x8b0   : > { %v2967_v0 = vpop.f32.mrb[10].mxu1  ;;  %v2933_v17 = vpop.f32.mrb[11].mxu0 }
 0x8b1   : > { %v2934_v53 = vadd.f32 %v2933_v17, %v2932_v45  ;;  %v2968_v7 = vpop.f32.mrb[11].mxu1 }
 0x8b2   : > { %v2969_v31 = vadd.f32 %v2968_v7, %v2967_v0 }
 0x8b3   : > { %v2704_v58 = vadd.f32 %v2934_v53, %v2894_v10 }
 0x8b5   : > { %v2774_v27 = vadd.f32 %v2969_v31, %v2704_v58 }
 0x8b7   : > { %2777 = vst [vmem:[%s6151_s6] sm:$0xff] %v2774_v27 }
 0x8b8 PF: > { %p18_p11 = scmp.ge.s32.totalorder %s4841_s26, 6   ;;  %s6773_s21 = smov %s4761_s22 }
 0x8b9   : > { %s6774_s22 = smov %s4765_s23  ;;  %s6775_s23 = smov %s4851_s29 }
 0x8ba   : > { %s6776_s24 = smov %s4841_s26  ;;  %20 = sbr.rel (!%p18_p11) target bundleno = 7 (0x7), region = 135 }
 0x8c1   :  { %2789 = vsyncpa [#allocation5], 1 }
 0x8c2   :  { %2791 = vsyncpa [#allocation5 + $0x1], 1 }
 0x8c3   :  { %2792 = vsyncpa [#allocation7], 1 }
 0x8c4   :  { %2793 = vsyncpa [#allocation10], 1 }

</bundles_post_ra>
